<compile_context>
chip_gen: v6e
topology: v6e:2x2x1
jax: 0.10.0
libtpu: 0.0.40
codegen_flags: <defaults>
</compile_context>

<pallas_src>
import jax
import jax.numpy as jnp
from jax.experimental import pallas as pl
from jax.experimental.pallas import tpu as pltpu


def _round_up(v, m):
    return ((v + m - 1) // m) * m


def _decoder_kernel(x_ref, w1_ref, b1_ref, w2_ref, b2_ref, w3_ref, b3_ref, o_ref):
    # Weights arrive as bf16 (half the HBM bytes vs f32); MXU accumulates in f32.
    x = x_ref[...].astype(jnp.bfloat16)
    h1 = jnp.dot(x, w1_ref[...], preferred_element_type=jnp.float32) + b1_ref[...]
    h1 = jnp.maximum(h1, 0.0).astype(jnp.bfloat16)
    h2 = jnp.dot(h1, w2_ref[...], preferred_element_type=jnp.float32) + b2_ref[...]
    h2 = jnp.maximum(h2, 0.0).astype(jnp.bfloat16)
    out = jnp.dot(h2, w3_ref[...], preferred_element_type=jnp.float32) + b3_ref[...]
    o_ref[...] = out.astype(o_ref.dtype)


def pc_decoder_forward(x, params, num_points):
    """x: (B, hidden_rep_dim) f32 -> (B, num_points, 3) f32."""
    w1, b1, w2, b2, w3, b3 = params
    B, H = x.shape
    D1 = w1.shape[1]          # 1024
    D2 = w2.shape[1]          # 1024
    out_dim = num_points * 3

    # --- dtype: stream weights as bf16, biases stay f32 (tiny) -------------
    w1b = w1.astype(jnp.bfloat16)
    w2b = w2.astype(jnp.bfloat16)
    w3b = w3.astype(jnp.bfloat16)
    b1_2d = b1.reshape(1, -1).astype(jnp.float32)
    b2_2d = b2.reshape(1, -1).astype(jnp.float32)
    b3_2d = b3.reshape(1, -1).astype(jnp.float32)

    # --- padding / tiling ---------------------------------------------------
    # Lane-dense output: pad N of layer 3 to a multiple of 128.
    N_pad = _round_up(out_dim, 128)
    if N_pad != out_dim:
        w3b = jnp.pad(w3b, ((0, 0), (0, N_pad - out_dim)))
        b3_2d = jnp.pad(b3_2d, ((0, 0), (0, N_pad - out_dim)))

    # Batch tile: multiple of 8 sublanes, capped at 128 rows per MXU pass.
    TB = min(_round_up(B, 8), 128)
    B_pad = _round_up(B, TB)
    x_p = jnp.pad(x, ((0, B_pad - B), (0, 0))) if B_pad != B else x

    # N tile of layer 3: largest of {512, 256, 128} that divides N_pad.
    TN = 128
    for cand in (512, 256, 128):
        if N_pad % cand == 0:
            TN = cand
            break

    grid = (B_pad // TB, N_pad // TN)

    flat = pl.pallas_call(
        _decoder_kernel,
        out_shape=jax.ShapeDtypeStruct((B_pad, N_pad), jnp.float32),
        grid=grid,
        in_specs=[
            pl.BlockSpec((TB, H), lambda i, j: (i, 0)),     # x: per batch tile
            pl.BlockSpec((H, D1), lambda i, j: (0, 0)),     # w1: resident
            pl.BlockSpec((1, D1), lambda i, j: (0, 0)),     # b1: resident
            pl.BlockSpec((D1, D2), lambda i, j: (0, 0)),    # w2: resident
            pl.BlockSpec((1, D2), lambda i, j: (0, 0)),     # b2: resident
            pl.BlockSpec((D2, TN), lambda i, j: (0, j)),    # w3: N-tiled
            pl.BlockSpec((1, TN), lambda i, j: (0, j)),     # b3: N-tiled
        ],
        out_specs=pl.BlockSpec((TB, TN), lambda i, j: (i, j)),
        compiler_params=pltpu.CompilerParams(
            dimension_semantics=("parallel", "parallel")),
    )(x_p, w1b, b1_2d, w2b, b2_2d, w3b, b3_2d)

    return flat[:B, :out_dim].reshape(B, num_points, 3)


def init_params(key, hidden_rep_dim, num_points):
    """Deterministic synthetic parameters (matching nn.Linear shapes)."""
    k1, k2, k3, k4, k5, k6 = jax.random.split(key, 6)
    # stored as (in, out) -- transpose of PyTorch's (out, in) layout
    w1 = jax.random.normal(k1, (hidden_rep_dim, 1024), jnp.float32) * 0.05
    b1 = jax.random.normal(k2, (1024,), jnp.float32) * 0.01
    w2 = jax.random.normal(k3, (1024, 1024), jnp.float32) * 0.03
    b2 = jax.random.normal(k4, (1024,), jnp.float32) * 0.01
    w3 = jax.random.normal(k5, (1024, num_points * 3), jnp.float32) * 0.03
    b3 = jax.random.normal(k6, (num_points * 3,), jnp.float32) * 0.01
    return (w1, b1, w2, b2, w3, b3)


if __name__ == "__main__":
    batch_size = 2
    hidden_rep_dim = 32
    num_points = 256  # output dim = 768, lane-dense (multiple of 128)

    key = jax.random.PRNGKey(0)
    k_x, k_p = jax.random.split(key)
    x = jax.random.normal(k_x, (batch_size, hidden_rep_dim), jnp.float32)
    params = init_params(k_p, hidden_rep_dim, num_points)

    out = pc_decoder_forward(x, params, num_points)
    out = jax.block_until_ready(out)

    # Pure-JAX reference using the same bf16-weight / f32-accumulate recipe.
    w1, b1, w2, b2, w3, b3 = params
    xb = x.astype(jnp.bfloat16)
    h1 = jnp.dot(xb, w1.astype(jnp.bfloat16),
                 preferred_element_type=jnp.float32) + b1
    h1 = jnp.maximum(h1, 0.0).astype(jnp.bfloat16)
    h2 = jnp.dot(h1, w2.astype(jnp.bfloat16),
                 preferred_element_type=jnp.float32) + b2
    h2 = jnp.maximum(h2, 0.0).astype(jnp.bfloat16)
    ref = (jnp.dot(h2, w3.astype(jnp.bfloat16),
                   preferred_element_type=jnp.float32) + b3)
    ref = ref.reshape(-1, num_points, 3)

    assert out.shape == (batch_size, num_points, 3)
    assert jnp.allclose(out, ref, atol=1e-2, rtol=1e-2), (
        float(jnp.max(jnp.abs(out - ref))))

    print("KERNEL_OK")
</pallas_src>

<mosaic_0001>
module attributes {stable_mosaic.version = 11 : i64} {
  func.func @_decoder_kernel(%arg0: i32, %arg1: i32, %arg2: memref<8x32xf32, #tpu.memory_space<vmem>>, %arg3: memref<32x1024xbf16, #tpu.memory_space<vmem>>, %arg4: memref<1x1024xf32, #tpu.memory_space<vmem>>, %arg5: memref<1024x1024xbf16, #tpu.memory_space<vmem>>, %arg6: memref<1x1024xf32, #tpu.memory_space<vmem>>, %arg7: memref<1024x256xbf16, #tpu.memory_space<vmem>>, %arg8: memref<1x256xf32, #tpu.memory_space<vmem>>, %arg9: memref<8x256xf32, #tpu.memory_space<vmem>>) attributes {dimension_semantics = [#tpu.dimension_semantics<parallel>, #tpu.dimension_semantics<parallel>], iteration_bounds = array<i64: 1, 3>, scalar_prefetch = 0 : i64, scratch_operands = 0 : i64, tpu.core_type = #tpu.core_type<tc>, window_params = [{transform_indices = @transform_0, window_bounds = array<i64: 8, 32>}, {pipeline_mode = #tpu.pipeline_mode<synchronous>, transform_indices = @transform_1, window_bounds = array<i64: 32, 1024>}, {pipeline_mode = #tpu.pipeline_mode<synchronous>, transform_indices = @transform_2, window_bounds = array<i64: 1, 1024>}, {pipeline_mode = #tpu.pipeline_mode<synchronous>, transform_indices = @transform_3, window_bounds = array<i64: 1024, 1024>}, {pipeline_mode = #tpu.pipeline_mode<synchronous>, transform_indices = @transform_4, window_bounds = array<i64: 1, 1024>}, {transform_indices = @transform_5, window_bounds = array<i64: 1024, 256>}, {transform_indices = @transform_6, window_bounds = array<i64: 1, 256>}, {transform_indices = @transform_7, window_bounds = array<i64: 8, 256>}]} {
    %c0 = arith.constant 0 : index
    %c0_0 = arith.constant 0 : index
    %0 = vector.load %arg2[%c0, %c0_0] : memref<8x32xf32, #tpu.memory_space<vmem>>, vector<8x32xf32>
    %1 = arith.truncf %0 : vector<8x32xf32> to vector<8x32xbf16>
    %c0_1 = arith.constant 0 : index
    %c0_2 = arith.constant 0 : index
    %2 = vector.load %arg3[%c0_1, %c0_2] : memref<32x1024xbf16, #tpu.memory_space<vmem>>, vector<32x1024xbf16>
    %cst = arith.constant dense<0.000000e+00> : vector<8x1024xf32>
    %3 = tpu.matmul %1, %2, %cst {dimension_numbers = #tpu.dot_dimension_numbers<[1], [0], [0], [1], [0, 0, 1, 1], [], []>} : vector<8x32xbf16>, vector<32x1024xbf16>, vector<8x1024xf32> -> vector<8x1024xf32>
    %c0_3 = arith.constant 0 : index
    %c0_4 = arith.constant 0 : index
    %4 = vector.load %arg4[%c0_3, %c0_4] : memref<1x1024xf32, #tpu.memory_space<vmem>>, vector<1x1024xf32>
    %5 = vector.broadcast %4 : vector<1x1024xf32> to vector<8x1024xf32>
    %6 = arith.addf %3, %5 : vector<8x1024xf32>
    %cst_5 = arith.constant 0.000000e+00 : f32
    %7 = vector.broadcast %cst_5 : f32 to vector<8x1024xf32>
    %8 = arith.maximumf %6, %7 : vector<8x1024xf32>
    %9 = arith.truncf %8 : vector<8x1024xf32> to vector<8x1024xbf16>
    %c0_6 = arith.constant 0 : index
    %c0_7 = arith.constant 0 : index
    %10 = vector.load %arg5[%c0_6, %c0_7] : memref<1024x1024xbf16, #tpu.memory_space<vmem>>, vector<1024x1024xbf16>
    %cst_8 = arith.constant dense<0.000000e+00> : vector<8x1024xf32>
    %11 = tpu.matmul %9, %10, %cst_8 {dimension_numbers = #tpu.dot_dimension_numbers<[1], [0], [0], [1], [0, 0, 1, 1], [], []>} : vector<8x1024xbf16>, vector<1024x1024xbf16>, vector<8x1024xf32> -> vector<8x1024xf32>
    %c0_9 = arith.constant 0 : index
    %c0_10 = arith.constant 0 : index
    %12 = vector.load %arg6[%c0_9, %c0_10] : memref<1x1024xf32, #tpu.memory_space<vmem>>, vector<1x1024xf32>
    %13 = vector.broadcast %12 : vector<1x1024xf32> to vector<8x1024xf32>
    %14 = arith.addf %11, %13 : vector<8x1024xf32>
    %cst_11 = arith.constant 0.000000e+00 : f32
    %15 = vector.broadcast %cst_11 : f32 to vector<8x1024xf32>
    %16 = arith.maximumf %14, %15 : vector<8x1024xf32>
    %17 = arith.truncf %16 : vector<8x1024xf32> to vector<8x1024xbf16>
    %c0_12 = arith.constant 0 : index
    %c0_13 = arith.constant 0 : index
    %18 = vector.load %arg7[%c0_12, %c0_13] : memref<1024x256xbf16, #tpu.memory_space<vmem>>, vector<1024x256xbf16>
    %cst_14 = arith.constant dense<0.000000e+00> : vector<8x256xf32>
    %19 = tpu.matmul %17, %18, %cst_14 {dimension_numbers = #tpu.dot_dimension_numbers<[1], [0], [0], [1], [0, 0, 1, 1], [], []>} : vector<8x1024xbf16>, vector<1024x256xbf16>, vector<8x256xf32> -> vector<8x256xf32>
    %c0_15 = arith.constant 0 : index
    %c0_16 = arith.constant 0 : index
    %20 = vector.load %arg8[%c0_15, %c0_16] : memref<1x256xf32, #tpu.memory_space<vmem>>, vector<1x256xf32>
    %21 = vector.broadcast %20 : vector<1x256xf32> to vector<8x256xf32>
    %22 = arith.addf %19, %21 : vector<8x256xf32>
    %c0_17 = arith.constant 0 : index
    %c0_18 = arith.constant 0 : index
    %23 = vector.load %arg9[%c0_17, %c0_18] : memref<8x256xf32, #tpu.memory_space<vmem>>, vector<8x256xf32>
    tpu.vector_store %arg9[%c0_17, %c0_18], %22 {strides = array<i32>} : memref<8x256xf32, #tpu.memory_space<vmem>>, vector<8x256xf32>,
    return
  }
  func.func @transform_0(%arg0: i32, %arg1: i32) -> (i32, i32) {
    %c0_i32 = arith.constant 0 : i32
    %c0_i32_0 = arith.constant 0 : i32
    return %arg0, %c0_i32 : i32, i32
  }
  func.func @transform_1(%arg0: i32, %arg1: i32) -> (i32, i32) {
    %c0_i32 = arith.constant 0 : i32
    %c0_i32_0 = arith.constant 0 : i32
    %c0_i32_1 = arith.constant 0 : i32
    return %c0_i32, %c0_i32_0 : i32, i32
  }
  func.func @transform_2(%arg0: i32, %arg1: i32) -> (i32, i32) {
    %c0_i32 = arith.constant 0 : i32
    %c0_i32_0 = arith.constant 0 : i32
    %c0_i32_1 = arith.constant 0 : i32
    return %c0_i32, %c0_i32_0 : i32, i32
  }
  func.func @transform_3(%arg0: i32, %arg1: i32) -> (i32, i32) {
    %c0_i32 = arith.constant 0 : i32
    %c0_i32_0 = arith.constant 0 : i32
    %c0_i32_1 = arith.constant 0 : i32
    return %c0_i32, %c0_i32_0 : i32, i32
  }
  func.func @transform_4(%arg0: i32, %arg1: i32) -> (i32, i32) {
    %c0_i32 = arith.constant 0 : i32
    %c0_i32_0 = arith.constant 0 : i32
    %c0_i32_1 = arith.constant 0 : i32
    return %c0_i32, %c0_i32_0 : i32, i32
  }
  func.func @transform_5(%arg0: i32, %arg1: i32) -> (i32, i32) {
    %c0_i32 = arith.constant 0 : i32
    %c0_i32_0 = arith.constant 0 : i32
    return %c0_i32, %arg1 : i32, i32
  }
  func.func @transform_6(%arg0: i32, %arg1: i32) -> (i32, i32) {
    %c0_i32 = arith.constant 0 : i32
    %c0_i32_0 = arith.constant 0 : i32
    return %c0_i32, %arg1 : i32, i32
  }
  func.func @transform_7(%arg0: i32, %arg1: i32) -> (i32, i32) {
    %c0_i32 = arith.constant 0 : i32
    return %arg0, %arg1 : i32, i32
  }
}

</mosaic_0001>

<bundles_post_ra>
// kernel: tpu_custom_call.1
= control target key start
LH: loop header
LB: loop body
LE: loop exit
PB: predicated region body
PF: predicated region fallthrough
CT: control target
= control target key end

     0   :  { %s7529_s0 = inlined_call_operand.hbm [shape: f32[8,32], index: 0, kind: input, shape index: {}]   ;;  %s7530_s1 = inlined_call_operand.hbm [shape: bf16[32,1024], index: 1, kind: input, shape index: {}]   ;;  %s7531_s2 = inlined_call_operand.hbm [shape: f32[1,1024], index: 2, kind: input, shape index: {}]   ;;  %s7532_s3 = inlined_call_operand.hbm [shape: bf16[1024,1024], index: 3, kind: input, shape index: {}]   ;;  %s7533_s4 = inlined_call_operand.hbm [shape: f32[1,1024], index: 4, kind: input, shape index: {}]   ;;  %s7534_s5 = inlined_call_operand.hbm [shape: bf16[1024,768], index: 5, kind: input, shape index: {}]   ;;  %s7535_s6 = inlined_call_operand.hbm [shape: f32[1,768], index: 6, kind: input, shape index: {}]   ;;  %s7536_s7 = inlined_call_operand.hbm [shape: f32[8,768], index: 7, kind: output, shape index: {}]  }
   0x1   :  { %7543 = sst [smem:[#allocation23_spill]] %s7530_s1 }
   0x2   :  { %7544 = sst [smem:[#allocation24_spill]] %s7532_s3 }
   0x3   :  { %7545 = sst [smem:[#allocation25_spill]] %s7534_s5 }
   0x4   :  { %12 = vsyncpa [#allocation3], 0 }
   0x5   :  { %13 = vsyncpa [#allocation6], 0 }
   0x6   :  { %14 = vsyncpa [#allocation9], 0 }
   0x7   :  { %15 = vsyncpa [#allocation12], 0 }
   0x8   :  { %17 = vsyncpa [#allocation12 + $0x1], 0 }
   0x9   :  { %18 = vsyncpa [#allocation4], 0 }
   0xa   :  { %20 = vsyncpa [#allocation4 + $0x1], 0  ;;  %s6993_s24 = smov 0   ;;  %s6995_s25 = smov 0  }
   0xb   :  { %s6997_s26 = smov 0   ;;  %s6999_s27 = smov 0  }
   0xc   :  { %s7001_s28 = smov 0   ;;  %s7003_s29 = smov 0  }
   0xd LB: > { %s7024_s30 = sadd.s32 4294967295, %s6937_s29   ;;  %s5651_s8 = sadd.s32 4294967294, %s6937_s29   ;;  %s6937_s29 = sphi %s7003_s29, %s26_s29   ;;  %s6933_s28 = sphi %s7001_s28, %s7577_s28   ;;  %s6929_s27 = sphi %s6999_s27, %s7576_s27   ;;  %s6925_s26 = sphi %s6997_s26, %s7575_s26   ;;  %s6921_s25 = sphi %s6995_s25, %s7574_s25   ;;  %s6917_s24 = sphi %s6993_s24, %s7573_s24  }
   0xe   : > { %p168_p0 = scmp.ne.s32.totalorder %s6921_s25, %s6917_s24  ;;  %p7537_p1 = scmp.eq.s32.totalorder %s7024_s30, 0 }
   0xf   : > { %p226_p3 = scmp.eq.s32.totalorder %s5651_s8, 2  ;;  %p5652_p5 = scmp.ge.s32.totalorder %s6937_s29, 1 }
  0x10   : > { %p7033_p4 = por %p7537_p1, %p168_p0  ;;  %p233_p7 = scmp.lt.s32.totalorder %s6937_s29, 4 }
  0x11   : > { %p7038_p6 = por %p226_p3, %p168_p0  ;;  %s6939_s12 = smov [#allocation5]  }
  0x12   : > { %s7546_s9 = scalar_select %p7033_p4, 1, 0 }
  0x13   : > { %s7547_s10 = scalar_select %p7038_p6, 1, 0 }
  0x14   : > { %p7043_p8 = pnand %p5652_p5, %p233_p7  ;;  %s258_s13 = sshll.u32 %s6939_s12, 4  ;;  %s259_s13 = int_to_ptr.vmem [resolvable:$true] %s258_s13 }
  0x15   : > { %7548 = sst [smem:[#allocation20_spill]] %s7547_s10  ;;  %s6940_s15 = smov [#allocation8]  }
  0x16   : > { %p6368_p9 = pneg %p7043_p8  ;;  %s282_s16 = sshll.u32 %s6940_s15, 4  ;;  %s283_s16 = int_to_ptr.vmem [resolvable:$true] %s282_s16 }
  0x17   : > { %s6670_s18 = scalar_lea.vmem %s259_s13, 2048  ;;  %p6678_p3 = scmp.lt.s32.totalorder %s259_s13, %s259_s13 }
  0x18   : > { %p7051_p10 = pnand %p6368_p9, %p7537_p1  ;;  %p6671_p12 = scmp.ne.s32.totalorder %s259_s13, %s6670_s18 }
  0x19   : > { %p6679_p5 = scmp.lt.s32.totalorder %s6670_s18, %s6670_s18 }
  0x1a   : > { %p7057_p11 = pneg %p7051_p10 }
  0x1b   : > { %p6680_p7 = por %p6679_p5, %p6678_p3 }
  0x1c   : > { %p6673_p13 = pnand %p6671_p12, %p7057_p11 }
  0x1e   : > { %p6674_p0 = pneg %p6673_p13 }
  0x20   : > { %p6681_p9 = pnand %p6680_p7, %p6674_p0 }
  0x22   : > { %6684 = shalt.err (!%p6681_p9)
}
  0x23   : > { %s6941_s19 = smov 512   ;;  %s6942_s20 = smov 32  }
  0x24   : > { %s7552_s1 = sld [smem:[#allocation23_spill]]  ;;  %s6696_s23 = scalar_lea.vmem %s283_s16, 65536 }
  0x25   : > { %p6697_p1 = scmp.ne.s32.totalorder %s283_s16, %s6696_s23  ;;  %p6704_p13 = scmp.lt.s32.totalorder %s283_s16, %s283_s16 }
  0x26   : > { %p6705_p6 = scmp.lt.s32.totalorder %s6696_s23, %s6696_s23 }
  0x27   : > { %p6699_p2 = pnand %p6697_p1, %p7057_p11 }
  0x28   : > { %p6706_p4 = por %p6705_p6, %p6704_p13 }
  0x29   : > { %p6700_p12 = pneg %p6699_p2 }
  0x2a   : > { %6374 = dma.hbm_to_vmem [thread:$0]  (!%p7051_p10), %s7552_s1, 2048, %s259_s13, [#allocation6], %s6941_s19, %s6941_s19, %s6942_s20  }
  0x2b   : > { %p6707_p3 = pnand %p6706_p4, %p6700_p12 }
  0x2d   : > { %6710 = shalt.err (!%p6707_p3)
}
  0x2e   : > { %s7553_s3 = sld [smem:[#allocation24_spill]]  ;;  %s35_s13 = sadd.s32 1, %s6933_s28 }
  0x2f   : > { %s155_s15 = sadd.s32 1, %s6925_s26  ;;  %p36_p1 = scmp.ge.s32.totalorder %s35_s13, 3 }
  0x30   : > { %p162_p2 = scmp.ne.s32.totalorder %s6925_s26, %s6921_s25  ;;  %p163_p4 = scmp.eq.s32.totalorder %s6937_s29, 0 }
  0x31   : > { %p6400_p6 = scmp.lt.s32.totalorder %s6937_s29, 3  ;;  %s7579_s13 = smov (%p36_p1, %s35_s13), 0 }
  0x32   : > { %7554 = sst [smem:[#allocation21_spill]] %s7579_s13  ;;  %p164_p0 = por %p163_p4, %p162_p2 }
  0x33   : > { %p7555_p5 = scmp.eq.s32.totalorder %s7024_s30, 2  ;;  %s152_s21 = ssub.s32 %s6933_s28, %s7579_s13 }
  0x34   : > { %6380 = dma.hbm_to_vmem [thread:$0]  (!%p7051_p10), %s7553_s3, 65536, %s283_s16, [#allocation9], %s6941_s19, %s6941_s19, %s6942_s20  }
  0x35   : > { %p7085_p7 = por %p7555_p5, %p162_p2  ;;  %s307_s22 = sand.u32 1, %s6937_s29  }
  0x36   : > { %p153_p9 = scmp.eq.s32.totalorder %s152_s21, 0  ;;  %s7541_s16 = sand.u32 1, %s6925_s26  }
  0x37   : > { %s6339_s19 = sshll.u32 %s6933_s28, 7  ;;  %s5659_s23 = sshll.u32 %s7541_s16, 10 }
  0x38   : > { %s7095_s20 = scalar_select %p153_p9, %s6925_s26, %s155_s15  }
  0x39   : > { %s7558_s5 = sld [smem:[#allocation25_spill]]  ;;  %p7102_p12 = pnand %p6400_p6, %p164_p0 }
  0x3a   : > { %7557 = sst [smem:[#allocation22_spill]] %s7095_s20  ;;  %s311_s10 = scalar_lea.vmem [#allocation11], %s5659_s23 }
  0x3b   : > { %s318_s13 = sshll.u32 %s311_s10, 4  ;;  %s7106_s21 = scalar_lea.sflag [#allocation12], %s307_s22  ;;  %s319_s13 = int_to_ptr.vmem [resolvable:$true] %s318_s13 }
  0x3c   : > { %p7542_p13 = pneg %p7102_p12  ;;  %s6724_s15 = scalar_lea.vmem %s319_s13, 16384 }
  0x3d   : > { %p6725_p3 = scmp.ne.s32.totalorder %s319_s13, %s6724_s15 }
  0x3f   : > { %s317_s1 = scalar_lea.hbm %s7558_s5, %s6339_s19  ;;  %p6727_p1 = pnand %p6725_p3, %p7542_p13 }
  0x40   : > { %s6943_s19 = smov [#allocation11]  }
  0x41   : > { %p6728_p2 = pneg %p6727_p1  ;;  %s6729_s8 = sshll.u32 %s6943_s19, 4  ;;  %s6730_s8 = int_to_ptr.vmem [resolvable:$false] %s6729_s8 }
  0x42   : > { %s6731_s12 = scalar_lea.vmem %s6730_s8, 32768  ;;  %p6732_p4 = scmp.lt.s32.totalorder %s319_s13, %s6730_s8 }
  0x43   : > { %p6733_p6 = scmp.lt.s32.totalorder %s6731_s12, %s6724_s15 }
  0x45   : > { %p6734_p0 = por %p6733_p6, %p6732_p4 }
  0x47   : > { %p6735_p5 = pnand %p6734_p0, %p6728_p2 }
  0x49   : > { %6738 = shalt.err (!%p6735_p5)
}
  0x4a   : > { %s6944_s10 = smov 384   ;;  %s6945_s22 = smov 128  }
  0x4b   : > { %s6946_s23 = smov 8   ;;  %s6947_s16 = smov [#allocation2]  }
  0x4c   : > { %6387 = dma.hbm_to_vmem [thread:$0]  (!%p7102_p12), %s317_s1, 16384, %s319_s13, %s7106_s21, %s6944_s10, %s6945_s22, %s6946_s23  }
  0x4d   : > { %s248_s5 = sshll.u32 %s6947_s16, 4  ;;  %s249_s5 = int_to_ptr.vmem [resolvable:$true] %s248_s5 }
  0x4e   : > { %s6750_s20 = scalar_lea.vmem %s249_s5, 128  ;;  %p6758_p13 = scmp.lt.s32.totalorder %s249_s5, %s249_s5 }
  0x4f   : > { %p6751_p9 = scmp.ne.s32.totalorder %s249_s5, %s6750_s20  ;;  %p6759_p4 = scmp.lt.s32.totalorder %s6750_s20, %s6750_s20 }
  0x51   : > { %p6753_p3 = pnand %p6751_p9, %p7057_p11  ;;  %p6760_p2 = por %p6759_p4, %p6758_p13 }
  0x53   : > { %p6754_p1 = pneg %p6753_p3 }
  0x55   : > { %p6761_p6 = pnand %p6760_p2, %p6754_p1 }
  0x57   : > { %6764 = shalt.err (!%p6761_p6)
}
  0x58   : > { %6371 = dma.hbm_to_vmem [thread:$0]  (!%p7051_p10), %s7529_s0, 128, %s249_s5, [#allocation3]  }
  0x59   : > { %s6948_s1 = smov [#allocation7]   ;;  %s6949_s16 = smov [#allocation10]  }
  0x5a   : > { %s272_s13 = sshll.u32 %s6948_s1, 4  ;;  %s296_s8 = sshll.u32 %s6949_s16, 4  ;;  %s273_s13 = int_to_ptr.vmem [resolvable:$true] %s272_s13  ;;  %s297_s8 = int_to_ptr.vmem [resolvable:$true] %s296_s8 }
  0x5b   : > { %s6776_s12 = scalar_lea.vmem %s273_s13, 128  ;;  %p6784_p13 = scmp.lt.s32.totalorder %s273_s13, %s273_s13 }
  0x5c   : > { %p6777_p0 = scmp.ne.s32.totalorder %s273_s13, %s6776_s12  ;;  %p6785_p3 = scmp.lt.s32.totalorder %s6776_s12, %s6776_s12 }
  0x5e   : > { %p6779_p5 = pnand %p6777_p0, %p7057_p11  ;;  %p6786_p1 = por %p6785_p3, %p6784_p13 }
  0x60   : > { %p6780_p9 = pneg %p6779_p5 }
  0x62   : > { %p6787_p4 = pnand %p6786_p1, %p6780_p9 }
  0x64   : > { %6790 = shalt.err (!%p6787_p4)
}
  0x65   : > { %6377 = dma.hbm_to_vmem [thread:$0]  (!%p7051_p10), %s7531_s2, 128, %s273_s13, [#allocation6]  }
  0x66   : > { %s7560_s5 = sand.u32 1, %s6925_s26   ;;  %s6802_s23 = scalar_lea.vmem %s297_s8, 128 }
  0x67   : > { %s5662_s22 = sshll.u32 %s7560_s5, 1  ;;  %p6803_p2 = scmp.ne.s32.totalorder %s297_s8, %s6802_s23 }
  0x68   : > { %p6810_p5 = scmp.lt.s32.totalorder %s297_s8, %s297_s8  ;;  %p6811_p13 = scmp.lt.s32.totalorder %s6802_s23, %s6802_s23 }
  0x69   : > { %p6805_p6 = pnand %p6803_p2, %p7057_p11 }
  0x6a   : > { %p6812_p9 = por %p6811_p13, %p6810_p5 }
  0x6b   : > { %p6806_p0 = pneg %p6805_p6 }
  0x6d   : > { %p6813_p3 = pnand %p6812_p9, %p6806_p0 }
  0x6f   : > { %6816 = shalt.err (!%p6813_p3)
}
  0x70   : > { %6383 = dma.hbm_to_vmem [thread:$0]  (!%p7051_p10), %s7533_s4, 128, %s297_s8, [#allocation9]  }
  0x71   : > { %s6340_s1 = sshll.u32 %s6933_s28, 5  ;;  %s332_s12 = scalar_lea.vmem [#allocation13], %s5662_s22 }
  0x72   : > { %s338_s17 = scalar_lea.hbm %s7535_s6, %s6340_s1  ;;  %s340_s20 = sshll.u32 %s332_s12, 4  ;;  %s341_s20 = int_to_ptr.vmem [resolvable:$true] %s340_s20 }
  0x73   : > { %s6830_s10 = scalar_lea.vmem %s341_s20, 32  ;;  %p7561_p1 = pneg %p7102_p12 }
  0x74   : > { %p6831_p11 = scmp.ne.s32.totalorder %s341_s20, %s6830_s10  ;;  %s6950_s14 = smov [#allocation13]  }
  0x75   : > { %s6835_s5 = sshll.u32 %s6950_s14, 4  ;;  %s6836_s5 = int_to_ptr.vmem [resolvable:$false] %s6835_s5 }
  0x76   : > { %p6833_p4 = pnand %p6831_p11, %p7561_p1  ;;  %s6837_s23 = scalar_lea.vmem %s6836_s5, 64 }
  0x77   : > { %p6838_p6 = scmp.lt.s32.totalorder %s341_s20, %s6836_s5  ;;  %p6839_p10 = scmp.lt.s32.totalorder %s6837_s23, %s6830_s10 }
  0x78   : > { %p6834_p2 = pneg %p6833_p4 }
  0x79   : > { %p6840_p0 = por %p6839_p10, %p6838_p6 }
  0x7b   : > { %p6841_p5 = pnand %p6840_p0, %p6834_p2 }
  0x7d   : > { %6844 = shalt.err (!%p6841_p5)
}
  0x7e   : > { %6390 = dma.hbm_to_vmem [thread:$0]  (!%p7102_p12), %s338_s17, 32, %s341_s20, %s7106_s21  }
  0x7f   : > { %349 = sbr.rel (%p7043_p8) target bundleno = 1222 (0x4c6), region = 48  ;;  %p7562_p13 = scmp.eq.s32.totalorder (!%p7043_p8), %s7024_s30, 0 }
  0x84   : > { %6896 = dma.done.wait (%p7562_p13), [#allocation3], 128   ;;  %p7563_p9 = pmov %p7562_p13 }
  0x86   : > { %6898 = vsyncadd (%p7563_p9), [#allocation3], 4294967168  ;;  %p7564_p3 = pmov %p7563_p9 }
  0x88   : > { %6900 = dma.done.wait (%p7564_p3), [#allocation6], 2176   ;;  %p7565_p11 = pmov %p7564_p3 }
  0x89   : > { %p7566_p1 = pmov %p7564_p3 }
  0x8a   : > { %6902 = vsyncadd (%p7565_p11), [#allocation6], 4294965120 }
  0x8b   : > { %6904 = dma.done.wait (%p7566_p1), [#allocation9], 65664   ;;  %p7567_p12 = pmov %p7566_p1 }
  0x8c   : > { %s371_s3 = sand.u32 1, %s7024_s30   ;;  %s7165_s11 = sand.u32 1, %s6921_s25  }
  0x8d   : > { %6906 = vsyncadd (%p7567_p12), [#allocation9], 4294901632  ;;  %s5671_s21 = sshll.u32 %s7165_s11, 10  ;;  %s372_s8 = scalar_lea.sflag [#allocation12], %s371_s3 }
  0x8e   : > { %s7168_s22 = scalar_lea.vmem [#allocation11], %s5671_s21  ;;  %p7568_p8 = scmp.ne.s32.totalorder %s7546_s9, 0 }
  0x90   : > { %6908 = dma.done.wait (%p7568_p8), %s372_s8, 16416  }
  0x91   : > { %6910 = vsyncadd (%p7568_p8), %s372_s8, 4294950880  ;;  %v6951_v0 = vmov 0   ;;  %v434_v1 = vld [vmem:[#allocation5 + $0x40] sm:$0xff]  ;;  %v435_v3 = vld [vmem:[#allocation5 + $0x48] sm:$0xff]  ;;  %vm564_vm0 = vcmask 261120   ;;  %s5672_s30 = sshll.u32 %s7165_s11, 1 }
  0x92   : > { %600 = vmatprep.mubr.bf16.mxu0 %v6951_v0  ;;  %641 = vmatprep.mubr.bf16.mxu1 %v6951_v0  ;;  %v438_v2 = vld [vmem:[#allocation5 + $0x60] sm:$0xff]  ;;  %v439_v5 = vld [vmem:[#allocation5 + $0x68] sm:$0xff]  ;;  %v436_v15 = vld [vmem:[#allocation5 + $0x50] sm:$0xff]  ;;  %s384_s9 = scalar_lea.vmem [#allocation13], %s5672_s30  ;;  %s5673_s15 = sshll.u32 %s7165_s11, 4 }
  0x93   : > { %v5683_v4 = vcombine.high %v434_v1, %v438_v2  ;;  %v5682_v6 = vcombine.low %v434_v1, %v438_v2  ;;  %v426_v7 = vld [vmem:[#allocation5] sm:$0xff]  ;;  %v5685_v9 = vcombine.high %v435_v3, %v439_v5  ;;  %v5684_v10 = vcombine.low %v435_v3, %v439_v5  ;;  %v427_v12 = vld [vmem:[#allocation5 + $0x8] sm:$0xff]  ;;  %v440_v16 = vld [vmem:[#allocation5 + $0x70] sm:$0xff]  ;;  %s6341_s19 = sshll.u32 %s6929_s27, 8  ;;  %s419_s1 = scalar_lea.vmem [#allocation14], %s5673_s15 }
  0x94   : > { %v430_v8 = vld [vmem:[#allocation5 + $0x20] sm:$0xff]  ;;  %v431_v13 = vld [vmem:[#allocation5 + $0x28] sm:$0xff]  ;;  %v437_v17 = vld [vmem:[#allocation5 + $0x58] sm:$0xff]  ;;  %v5687_v22 = vcombine.high %v436_v15, %v440_v16  ;;  %v5686_v29 = vcombine.low %v436_v15, %v440_v16  ;;  %s5497_s13 = sshll.u32 %s419_s1, 4  ;;  %s7482_s12 = scalar_lea.hbm %s7536_s7, %s6341_s19  ;;  %s7484_s13 = int_to_ptr.vmem [resolvable:$true] %s5497_s13 }
  0x95   : > { %v5675_v11 = vcombine.high %v426_v7, %v430_v8  ;;  %580 = vmatprep.subr.bf16.mxu0 %v5683_v4  ;;  %v5677_v14 = vcombine.high %v427_v12, %v431_v13  ;;  %621 = vmatprep.subr.bf16.mxu1 %v5685_v9  ;;  %v5674_v18 = vcombine.low %v426_v7, %v430_v8  ;;  %v424_v19 = vld [vmem:[#allocation2] sm:$0xff]  ;;  %v428_v24 = vld [vmem:[#allocation5 + $0x10] sm:$0xff]  ;;  %v804_v33 = vld [vmem:[#allocation8 + $0x1c0] sm:$0xff]  ;;  %s5481_s27 = scalar_lea.sflag [#allocation4], %s7165_s11  ;;  %s6845_s20 = scalar_lea.vmem %s7484_s13, 256 }
  0x96   : > { %581 = vmatpush1.bf16.msra.mxu0 %v5682_v6  ;;  %v441_v20 = vld [vmem:[#allocation5 + $0x78] sm:$0xff]  ;;  %622 = vmatpush1.bf16.msra.mxu1 %v5684_v10  ;;  %v5676_v21 = vcombine.low %v427_v12, %v431_v13  ;;  %v432_v25 = vld [vmem:[#allocation5 + $0x30] sm:$0xff]  ;;  %v425_v26 = vpack.c.bf16 %v424_v19, %v424_v19  ;;  %v808_v34 = vld [vmem:[#allocation8 + $0x1e0] sm:$0xff]  ;;  %p6846_p4 = scmp.ne.s32.totalorder %s7484_s13, %s6845_s20  ;;  %s6952_s10 = smov [#allocation14]  }
  0x97   : > { %582 = vmatprep.subr.bf16.mxu0 %v5675_v11  ;;  %623 = vmatprep.subr.bf16.mxu1 %v5677_v14  ;;  %v5689_v23 = vcombine.high %v437_v17, %v441_v20  ;;  %v429_v27 = vld [vmem:[#allocation5 + $0x18] sm:$0xff]  ;;  %v5688_v30 = vcombine.low %v437_v17, %v441_v20  ;;  %v5679_v31 = vcombine.high %v428_v24, %v432_v25  ;;  %v932_v35 = vld [vmem:[#allocation8 + $0x5c0] sm:$0xff]  ;;  %s6849_s14 = sshll.u32 %s6952_s10, 4  ;;  %s6850_s14 = int_to_ptr.vmem [resolvable:$false] %s6849_s14 }
  0x98   : > { %v433_v28 = vld [vmem:[#allocation5 + $0x38] sm:$0xff]  ;;  %v936_v36 = vld [vmem:[#allocation8 + $0x5e0] sm:$0xff]  ;;  %v5678_v37 = vcombine.low %v428_v24, %v432_v25  ;;  %v5751_v39 = vcombine.high %v804_v33, %v808_v34  ;;  %v5750_v45 = vcombine.low %v804_v33, %v808_v34  ;;  %p6847_p2 = pnand %p6846_p4, %p7085_p7  ;;  %s6851_s5 = scalar_lea.vmem %s6850_s14, 512 }
  0x99   : > { %v5681_v32 = vcombine.high %v429_v27, %v433_v28  ;;  %v5680_v38 = vcombine.low %v429_v27, %v433_v28  ;;  %v5879_v40 = vcombine.high %v932_v35, %v936_v36  ;;  %v796_v41 = vld [vmem:[#allocation8 + $0x180] sm:$0xff]  ;;  %v5878_v46 = vcombine.low %v932_v35, %v936_v36  ;;  %p6852_p10 = scmp.lt.s32.totalorder %s7484_s13, %s6850_s14  ;;  %p6853_p0 = scmp.lt.s32.totalorder %s6851_s5, %s6845_s20 }
  0x9a   : > { %583 = vmatpush1.bf16.msra.mxu0 %v5674_v18  ;;  %624 = vmatpush1.bf16.msra.mxu1 %v5676_v21  ;;  %v800_v42 = vld [vmem:[#allocation8 + $0x1a0] sm:$0xff]  ;;  %p6848_p6 = pneg %p6847_p2 }
  0x9b   : > { %662 = vmatprep.subr.bf16.mxu0 %v5687_v22  ;;  %703 = vmatprep.subr.bf16.mxu1 %v5689_v23  ;;  %v924_v43 = vld [vmem:[#allocation8 + $0x580] sm:$0xff]  ;;  %v5743_v47 = vcombine.high %v796_v41, %v800_v42  ;;  %v5742_v53 = vcombine.low %v796_v41, %v800_v42  ;;  %p6854_p5 = por %p6853_p0, %p6852_p10 }
  0x9c   : > { %v928_v44 = vld [vmem:[#allocation8 + $0x5a0] sm:$0xff] }
  0x9d   : > { %5690 = vmatmul.mubr.msk.bf16.vlgmr.msra.gmra.mxu0 %vm564_vm0, %v425_v26  ;;  %5691 = vmatmul.mubr.msk.bf16.vlgmr.msra.gmra.mxu1 %vm564_vm0, %v425_v26  ;;  %v5871_v48 = vcombine.high %v924_v43, %v928_v44  ;;  %v788_v49 = vld [vmem:[#allocation8 + $0x140] sm:$0xff]  ;;  %v5870_v54 = vcombine.low %v924_v43, %v928_v44  ;;  %p6855_p13 = pnand %p6854_p5, %p6848_p6 }
  0x9e   : > { %663 = vmatpush1.bf16.msra.mxu0 %v5686_v29  ;;  %704 = vmatpush1.bf16.msra.mxu1 %v5688_v30  ;;  %v792_v50 = vld [vmem:[#allocation8 + $0x160] sm:$0xff] }
  0x9f   : > { %664 = vmatprep.subr.bf16.mxu0 %v5679_v31  ;;  %705 = vmatprep.subr.bf16.mxu1 %v5681_v32  ;;  %v916_v51 = vld [vmem:[#allocation8 + $0x540] sm:$0xff]  ;;  %v5735_v55 = vcombine.high %v788_v49, %v792_v50  ;;  %v5734_v61 = vcombine.low %v788_v49, %v792_v50 }
  0xa0   : > { %682 = vmatprep.mubr.bf16.mxu0 %v6951_v0  ;;  %723 = vmatprep.mubr.bf16.mxu1 %v6951_v0  ;;  %v920_v52 = vld [vmem:[#allocation8 + $0x560] sm:$0xff] }
  0xa1   : > { %v5863_v56 = vcombine.high %v916_v51, %v920_v52  ;;  %v780_v57 = vld [vmem:[#allocation8 + $0x100] sm:$0xff]  ;;  %v5862_v0 = vcombine.low %v916_v51, %v920_v52 }
  0xa2   : > { %665 = vmatpush1.bf16.msra.mxu0 %v5678_v37  ;;  %706 = vmatpush1.bf16.msra.mxu1 %v5680_v38  ;;  %v784_v58 = vld [vmem:[#allocation8 + $0x120] sm:$0xff] }
  0xa3   : > { %3862 = vmatprep.subr.bf16.mxu0 %v5751_v39  ;;  %3903 = vmatprep.subr.bf16.mxu1 %v5879_v40  ;;  %v908_v59 = vld [vmem:[#allocation8 + $0x500] sm:$0xff]  ;;  %v5727_v1 = vcombine.high %v780_v57, %v784_v58  ;;  %v5726_v5 = vcombine.low %v780_v57, %v784_v58 }
  0xa4   : > { %v912_v60 = vld [vmem:[#allocation8 + $0x520] sm:$0xff] }
  0xa5   : > { %5692 = vmatmul.mubr.msk.bf16.vlgmr.msra.gmra.mxu0 %vm564_vm0, %v425_v26  ;;  %5693 = vmatmul.mubr.msk.bf16.vlgmr.msra.gmra.mxu1 %vm564_vm0, %v425_v26  ;;  %v772_v62 = vld [vmem:[#allocation8 + $0xc0] sm:$0xff]  ;;  %v5855_v4 = vcombine.high %v908_v59, %v912_v60  ;;  %v5854_v8 = vcombine.low %v908_v59, %v912_v60 }
  0xa6   : > { %3863 = vmatpush1.bf16.msra.mxu0 %v5750_v45  ;;  %3904 = vmatpush1.bf16.msra.mxu1 %v5878_v46  ;;  %v776_v63 = vld [vmem:[#allocation8 + $0xe0] sm:$0xff] }
  0xa7   : > { %3864 = vmatprep.subr.bf16.mxu0 %v5743_v47  ;;  %3905 = vmatprep.subr.bf16.mxu1 %v5871_v48  ;;  %v900_v2 = vld [vmem:[#allocation8 + $0x4c0] sm:$0xff]  ;;  %v5719_v9 = vcombine.high %v772_v62, %v776_v63  ;;  %v5718_v13 = vcombine.low %v772_v62, %v776_v63 }
  0xa8   : > { %v904_v3 = vld [vmem:[#allocation8 + $0x4e0] sm:$0xff] }
  0xa9   : > { %v764_v6 = vld [vmem:[#allocation8 + $0x80] sm:$0xff]  ;;  %v5847_v12 = vcombine.high %v900_v2, %v904_v3  ;;  %v5846_v16 = vcombine.low %v900_v2, %v904_v3 }
  0xaa   : > { %3865 = vmatpush1.bf16.msra.mxu0 %v5742_v53  ;;  %3906 = vmatpush1.bf16.msra.mxu1 %v5870_v54  ;;  %v768_v7 = vld [vmem:[#allocation8 + $0xa0] sm:$0xff] }
  0xab   : > { %3866 = vmatprep.subr.bf16.mxu0 %v5735_v55  ;;  %3907 = vmatprep.subr.bf16.mxu1 %v5863_v56  ;;  %v892_v10 = vld [vmem:[#allocation8 + $0x480] sm:$0xff]  ;;  %v5711_v17 = vcombine.high %v764_v6, %v768_v7  ;;  %v5710_v21 = vcombine.low %v764_v6, %v768_v7 }
  0xac   : > { %v896_v11 = vld [vmem:[#allocation8 + $0x4a0] sm:$0xff] }
  0xad   : > { %v756_v14 = vld [vmem:[#allocation8 + $0x40] sm:$0xff]  ;;  %v5839_v20 = vcombine.high %v892_v10, %v896_v11  ;;  %v5838_v24 = vcombine.low %v892_v10, %v896_v11 }
  0xae   : > { %3867 = vmatpush1.bf16.msra.mxu0 %v5734_v61  ;;  %3908 = vmatpush1.bf16.msra.mxu1 %v5862_v0  ;;  %v760_v15 = vld [vmem:[#allocation8 + $0x60] sm:$0xff] }
  0xaf   : > { %3868 = vmatprep.subr.bf16.mxu0 %v5727_v1  ;;  %3909 = vmatprep.subr.bf16.mxu1 %v5855_v4  ;;  %v884_v18 = vld [vmem:[#allocation8 + $0x440] sm:$0xff]  ;;  %v5703_v25 = vcombine.high %v756_v14, %v760_v15  ;;  %v5702_v29 = vcombine.low %v756_v14, %v760_v15 }
  0xb0   : > { %v888_v19 = vld [vmem:[#allocation8 + $0x460] sm:$0xff] }
  0xb1   : > { %v748_v22 = vld [vmem:[#allocation8] sm:$0xff]  ;;  %v5831_v28 = vcombine.high %v884_v18, %v888_v19  ;;  %v5830_v32 = vcombine.low %v884_v18, %v888_v19 }
  0xb2   : > { %3869 = vmatpush1.bf16.msra.mxu0 %v5726_v5  ;;  %3910 = vmatpush1.bf16.msra.mxu1 %v5854_v8  ;;  %v752_v23 = vld [vmem:[#allocation8 + $0x20] sm:$0xff] }
  0xb3   : > { %3870 = vmatprep.subr.bf16.mxu0 %v5719_v9  ;;  %3911 = vmatprep.subr.bf16.mxu1 %v5847_v12  ;;  %v876_v26 = vld [vmem:[#allocation8 + $0x400] sm:$0xff]  ;;  %v5695_v33 = vcombine.high %v748_v22, %v752_v23  ;;  %v5694_v37 = vcombine.low %v748_v22, %v752_v23 }
  0xb4   : > { %v880_v27 = vld [vmem:[#allocation8 + $0x420] sm:$0xff] }
  0xb5   : > { %v868_v30 = vld [vmem:[#allocation8 + $0x3c0] sm:$0xff]  ;;  %v5823_v36 = vcombine.high %v876_v26, %v880_v27  ;;  %v5822_v40 = vcombine.low %v876_v26, %v880_v27 }
  0xb6   : > { %3871 = vmatpush1.bf16.msra.mxu0 %v5718_v13  ;;  %3912 = vmatpush1.bf16.msra.mxu1 %v5846_v16  ;;  %v872_v31 = vld [vmem:[#allocation8 + $0x3e0] sm:$0xff] }
  0xb7   : > { %3872 = vmatprep.subr.bf16.mxu0 %v5711_v17  ;;  %3913 = vmatprep.subr.bf16.mxu1 %v5839_v20  ;;  %v996_v34 = vld [vmem:[#allocation8 + $0x7c0] sm:$0xff]  ;;  %v5815_v41 = vcombine.high %v868_v30, %v872_v31  ;;  %v5814_v45 = vcombine.low %v868_v30, %v872_v31 }
  0xb8   : > { %v1000_v35 = vld [vmem:[#allocation8 + $0x7e0] sm:$0xff] }
  0xb9   : > { %v860_v38 = vld [vmem:[#allocation8 + $0x380] sm:$0xff]  ;;  %v5943_v44 = vcombine.high %v996_v34, %v1000_v35  ;;  %v5942_v48 = vcombine.low %v996_v34, %v1000_v35 }
  0xba   : > { %3873 = vmatpush1.bf16.msra.mxu0 %v5710_v21  ;;  %3914 = vmatpush1.bf16.msra.mxu1 %v5838_v24  ;;  %v864_v39 = vld [vmem:[#allocation8 + $0x3a0] sm:$0xff] }
  0xbb   : > { %3874 = vmatprep.subr.bf16.mxu0 %v5703_v25  ;;  %3915 = vmatprep.subr.bf16.mxu1 %v5831_v28  ;;  %v988_v42 = vld [vmem:[#allocation8 + $0x780] sm:$0xff]  ;;  %v5807_v49 = vcombine.high %v860_v38, %v864_v39  ;;  %v5806_v53 = vcombine.low %v860_v38, %v864_v39 }
  0xbc   : > { %v992_v43 = vld [vmem:[#allocation8 + $0x7a0] sm:$0xff] }
  0xbd   : > { %v852_v46 = vld [vmem:[#allocation8 + $0x340] sm:$0xff]  ;;  %v5935_v52 = vcombine.high %v988_v42, %v992_v43  ;;  %v5934_v56 = vcombine.low %v988_v42, %v992_v43  ;;  %v444_v43 = vlaneseq }
  0xbe   : > { %3875 = vmatpush1.bf16.msra.mxu0 %v5702_v29  ;;  %3916 = vmatpush1.bf16.msra.mxu1 %v5830_v32  ;;  %v856_v47 = vld [vmem:[#allocation8 + $0x360] sm:$0xff] }
  0xbf   : > { %3876 = vmatprep.subr.bf16.mxu0 %v5695_v33  ;;  %3917 = vmatprep.subr.bf16.mxu1 %v5823_v36  ;;  %v980_v50 = vld [vmem:[#allocation8 + $0x740] sm:$0xff]  ;;  %v5799_v57 = vcombine.high %v852_v46, %v856_v47  ;;  %v5798_v61 = vcombine.low %v852_v46, %v856_v47  ;;  %v7191_v46 = vld [vmem:[#allocation7] sm:$0xff] }
  0xc0   : > { %v984_v51 = vld [vmem:[#allocation8 + $0x760] sm:$0xff] }
  0xc1   : > { %v844_v54 = vld [vmem:[#allocation8 + $0x300] sm:$0xff]  ;;  %v5927_v60 = vcombine.high %v980_v50, %v984_v51  ;;  %v5926_v0 = vcombine.low %v980_v50, %v984_v51 }
  0xc2   : > { %3877 = vmatpush1.bf16.msra.mxu0 %v5694_v37  ;;  %3918 = vmatpush1.bf16.msra.mxu1 %v5822_v40  ;;  %v848_v55 = vld [vmem:[#allocation8 + $0x320] sm:$0xff] }
  0xc3   : > { %3878 = vmatprep.subr.bf16.mxu0 %v5815_v41  ;;  %3919 = vmatprep.subr.bf16.mxu1 %v5943_v44  ;;  %v972_v58 = vld [vmem:[#allocation8 + $0x700] sm:$0xff]  ;;  %v5791_v1 = vcombine.high %v844_v54, %v848_v55  ;;  %v5790_v5 = vcombine.low %v844_v54, %v848_v55  ;;  %v7186_v44 = vshrl.u32 %v444_v43, 7 }
  0xc4   : > { %v976_v59 = vld [vmem:[#allocation8 + $0x720] sm:$0xff] }
  0xc5   : > { %v836_v62 = vld [vmem:[#allocation8 + $0x2c0] sm:$0xff]  ;;  %v5919_v4 = vcombine.high %v972_v58, %v976_v59  ;;  %v5918_v8 = vcombine.low %v972_v58, %v976_v59  ;;  %v454_v47 = vsub.s32 2, %v7186_v44 }
  0xc6   : > { %3879 = vmatpush2.bf16.msra.mxu0 %v5814_v45  ;;  %3920 = vmatpush2.bf16.msra.mxu1 %v5942_v48  ;;  %v840_v63 = vld [vmem:[#allocation8 + $0x2e0] sm:$0xff]  ;;  %v7189_v45 = vsub.s32 0, %v7186_v44  ;;  %v7195_v48 = vsub.s32 1, %v7186_v44 }
  0xc7   : > { %3880 = vmatprep.subr.bf16.mxu0 %v5807_v49  ;;  %3921 = vmatprep.subr.bf16.mxu1 %v5935_v52  ;;  %v964_v2 = vld [vmem:[#allocation8 + $0x6c0] sm:$0xff]  ;;  %v5783_v9 = vcombine.high %v836_v62, %v840_v63  ;;  %v5782_v13 = vcombine.low %v836_v62, %v840_v63  ;;  %v458_v49 = vsub.s32 3, %v7186_v44  ;;  %v455_v51 = vrot.slane %v7191_v46, %v454_v47 }
  0xc8   : > { %v968_v3 = vld [vmem:[#allocation8 + $0x6e0] sm:$0xff]  ;;  %v447_v50 = vrot.slane %v7191_v46, %v7189_v45  ;;  %v451_v52 = vrot.slane %v7191_v46, %v7195_v48 }
  0xc9   : > { %v828_v6 = vld [vmem:[#allocation8 + $0x280] sm:$0xff]  ;;  %v5911_v12 = vcombine.high %v964_v2, %v968_v3  ;;  %v5910_v14 = vcombine.low %v964_v2, %v968_v3  ;;  %v459_v54 = vrot.slane %v7191_v46, %v458_v49  ;;  %v474_v2 = vsub.s32 7, %v7186_v44 }
  0xca   : > { %3881 = vmatpush2.bf16.msra.mxu0 %v5806_v53  ;;  %3922 = vmatpush2.bf16.msra.mxu1 %v5934_v56  ;;  %v832_v7 = vld [vmem:[#allocation8 + $0x2a0] sm:$0xff] }
  0xcb   : > { %3882 = vmatprep.subr.bf16.mxu0 %v5799_v57  ;;  %3923 = vmatprep.subr.bf16.mxu1 %v5927_v60  ;;  %v956_v10 = vld [vmem:[#allocation8 + $0x680] sm:$0xff]  ;;  %v5775_v15 = vcombine.high %v828_v6, %v832_v7  ;;  %v5774_v17 = vcombine.low %v828_v6, %v832_v7 }
  0xcc   : > { %v960_v11 = vld [vmem:[#allocation8 + $0x6a0] sm:$0xff] }
  0xcd   : > { %v5903_v16 = vcombine.high %v956_v10, %v960_v11  ;;  %v5902_v18 = vcombine.low %v956_v10, %v960_v11  ;;  %v820_v19 = vld [vmem:[#allocation8 + $0x240] sm:$0xff] }
  0xce   : > { %3883 = vmatpush2.bf16.msra.mxu0 %v5798_v61  ;;  %3924 = vmatpush2.bf16.msra.mxu1 %v5926_v0  ;;  %v824_v20 = vld [vmem:[#allocation8 + $0x260] sm:$0xff]  ;;  %v466_v61 = vsub.s32 5, %v7186_v44 }
  0xcf   : > { %3884 = vmatprep.subr.bf16.mxu0 %v5791_v1  ;;  %3925 = vmatprep.subr.bf16.mxu1 %v5919_v4  ;;  %v948_v21 = vld [vmem:[#allocation8 + $0x640] sm:$0xff]  ;;  %v5767_v22 = vcombine.high %v820_v19, %v824_v20  ;;  %v5766_v24 = vcombine.low %v820_v19, %v824_v20  ;;  %v475_v19 = vrot.slane %v7191_v46, %v474_v2 }
  0xd0   : > { %v952_v23 = vld [vmem:[#allocation8 + $0x660] sm:$0xff] }
  0xd1   : > { %v5894_v25 = vcombine.low %v948_v21, %v952_v23  ;;  %v5895_v26 = vcombine.high %v948_v21, %v952_v23  ;;  %v812_v27 = vld [vmem:[#allocation8 + $0x200] sm:$0xff] }
  0xd2   : > { %3885 = vmatpush2.bf16.msra.mxu0 %v5790_v5  ;;  %3926 = vmatpush2.bf16.msra.mxu1 %v5918_v8  ;;  %v816_v28 = vld [vmem:[#allocation8 + $0x220] sm:$0xff] }
  0xd3   : > { %3886 = vmatprep.subr.bf16.mxu0 %v5783_v9  ;;  %3927 = vmatprep.subr.bf16.mxu1 %v5911_v12  ;;  %v940_v29 = vld [vmem:[#allocation8 + $0x600] sm:$0xff]  ;;  %v5759_v30 = vcombine.high %v812_v27, %v816_v28  ;;  %v5758_v32 = vcombine.low %v812_v27, %v816_v28 }
  0xd4   : > { %v944_v31 = vld [vmem:[#allocation8 + $0x620] sm:$0xff] }
  0xd5   : > { %v5886_v33 = vcombine.low %v940_v29, %v944_v31  ;;  %v5887_v34 = vcombine.high %v940_v29, %v944_v31  ;;  %v7178_v35 = vld [vmem:[#allocation8 + $0x9c0] sm:$0xff] }
  0xd6   : > { %3887 = vmatpush2.bf16.msra.mxu0 %v5782_v13  ;;  %3928 = vmatpush2.bf16.msra.mxu1 %v5910_v14  ;;  %v1064_v36 = vld [vmem:[#allocation8 + $0x9e0] sm:$0xff]  ;;  %v467_v14 = vrot.slane %v7191_v46, %v466_v61 }
  0xd7   : > { %3888 = vmatprep.subr.bf16.mxu0 %v5775_v15  ;;  %3929 = vmatprep.subr.bf16.mxu1 %v5903_v16  ;;  %v7180_v37 = vld [vmem:[#allocation8 + $0xdc0] sm:$0xff]  ;;  %v6007_v38 = vcombine.high %v7178_v35, %v1064_v36  ;;  %v6006_v40 = vcombine.low %v7178_v35, %v1064_v36 }
  0xd8   : > { %v1192_v39 = vld [vmem:[#allocation8 + $0xde0] sm:$0xff] }
  0xd9   : > { %v6134_v41 = vcombine.low %v7180_v37, %v1192_v39  ;;  %v6135_v42 = vcombine.high %v7180_v37, %v1192_v39  ;;  %v1052_v5 = vld [vmem:[#allocation8 + $0x980] sm:$0xff] }
  0xda   : > { %3889 = vmatpush2.bf16.msra.mxu0 %v5774_v17  ;;  %3930 = vmatpush2.bf16.msra.mxu1 %v5902_v18  ;;  %v1056_v6 = vld [vmem:[#allocation8 + $0x9a0] sm:$0xff] }
  0xdb   : > { %3890 = vmatprep.subr.bf16.mxu0 %v5767_v22  ;;  %3931 = vmatprep.subr.bf16.mxu1 %v5895_v26  ;;  %v1180_v9 = vld [vmem:[#allocation8 + $0xd80] sm:$0xff]  ;;  %v5999_v17 = vcombine.high %v1052_v5, %v1056_v6  ;;  %v5998_v27 = vcombine.low %v1052_v5, %v1056_v6 }
  0xdc   : > { %v1184_v10 = vld [vmem:[#allocation8 + $0xda0] sm:$0xff] }
  0xdd   : > { %v6127_v20 = vcombine.high %v1180_v9, %v1184_v10  ;;  %v1044_v21 = vld [vmem:[#allocation8 + $0x940] sm:$0xff] }
  0xde   : > { %3891 = vmatpush2.bf16.msra.mxu0 %v5766_v24  ;;  %3932 = vmatpush2.bf16.msra.mxu1 %v5894_v25  ;;  %v1048_v22 = vld [vmem:[#allocation8 + $0x960] sm:$0xff] }
  0xdf   : > { %3892 = vmatprep.subr.bf16.mxu0 %v5759_v30  ;;  %3933 = vmatprep.subr.bf16.mxu1 %v5887_v34  ;;  %v1172_v24 = vld [vmem:[#allocation8 + $0xd40] sm:$0xff]  ;;  %v6126_v30 = vcombine.low %v1180_v9, %v1184_v10  ;;  %v5991_v31 = vcombine.high %v1044_v21, %v1048_v22 }
  0xe0   : > { %v1176_v25 = vld [vmem:[#allocation8 + $0xd60] sm:$0xff] }
  0xe1   : > { %v6119_v34 = vcombine.high %v1172_v24, %v1176_v25  ;;  %v1036_v35 = vld [vmem:[#allocation8 + $0x900] sm:$0xff] }
  0xe2   : > { %3893 = vmatpush2.bf16.msra.mxu0 %v5758_v32  ;;  %3934 = vmatpush2.bf16.msra.mxu1 %v5886_v33  ;;  %v1040_v36 = vld [vmem:[#allocation8 + $0x920] sm:$0xff] }
  0xe3   : > { %3944 = vmatprep.subr.bf16.mxu0 %v6007_v38  ;;  %3985 = vmatprep.subr.bf16.mxu1 %v6135_v42  ;;  %v1164_v39 = vld [vmem:[#allocation8 + $0xd00] sm:$0xff] }
  0xe4   : > { %v1168_v42 = vld [vmem:[#allocation8 + $0xd20] sm:$0xff] }
  0xe5   : > { %v1152_v5 = vld [vmem:[#allocation8 + $0xca0] sm:$0xff] }
  0xe6   : > { %v1012_v10 = vld [vmem:[#allocation8 + $0x840] sm:$0xff] }
 0x15d   : > { %v602_v53 = vpop.f32.mrf.mxu0  ;;  %v643_v56 = vpop.f32.mrf.mxu1 }
 0x15e   : > { %v603_v55 = vadd.f32 %v602_v53, %v447_v50  ;;  %v644_v57 = vadd.f32 %v643_v56, %v455_v51  ;;  %v5983_v53 = vcombine.high %v1036_v35, %v1040_v36  ;;  %v1028_v56 = vld [vmem:[#allocation8 + $0x8c0] sm:$0xff] }
 0x15f   : > { %v604_v58 = vpop.f32.mrf.mxu0  ;;  %v645_v60 = vpop.f32.mrf.mxu1 }
 0x160   : > { %v605_v59 = vadd.f32 %v604_v58, %v451_v52  ;;  %v732_v62 = vmax.f32 %v603_v55, 0.0  ;;  %v734_v63 = vmax.f32 %v644_v57, 0.0  ;;  %v646_v0 = vadd.f32 %v645_v60, %v459_v54  ;;  %v1032_v57 = vld [vmem:[#allocation8 + $0x8e0] sm:$0xff] }
 0x161   : > { %v606_v1 = vpop.f32.mrf.mxu0  ;;  %v647_v4 = vpop.f32.mrf.mxu1  ;;  %v6118_v52 = vcombine.low %v1172_v24, %v1176_v25  ;;  %v6111_v55 = vcombine.high %v1164_v39, %v1168_v42  ;;  %v1156_v58 = vld [vmem:[#allocation8 + $0xcc0] sm:$0xff]  ;;  %v5982_v60 = vcombine.low %v1036_v35, %v1040_v36  ;;  %v5974_v6 = vcombine.low %v1028_v56, %v1032_v57 }
 0x162   : > { %v733_v3 = vmax.f32 %v605_v59, 0.0  ;;  %v735_v7 = vmax.f32 %v646_v0, 0.0  ;;  %v7210_v11 = vpack.c.bf16 %v734_v63, %v734_v63  ;;  %v7217_v15 = vpack.c.bf16 %v732_v62, %v732_v62  ;;  %v1160_v59 = vld [vmem:[#allocation8 + $0xce0] sm:$0xff] }
 0x163   : > { %v607_v8 = vpop.f32.mrf.mxu0  ;;  %v648_v13 = vpop.f32.mrf.mxu1  ;;  %v6110_v62 = vcombine.low %v1164_v39, %v1168_v42  ;;  %v5975_v63 = vcombine.high %v1028_v56, %v1032_v57  ;;  %v6103_v0 = vcombine.high %v1156_v58, %v1160_v59  ;;  %v1020_v1 = vld [vmem:[#allocation8 + $0x880] sm:$0xff] }
 0x164   : > { %v7212_v12 = vpack.c.bf16 %v733_v3, %v733_v3  ;;  %v7219_v16 = vpack.c.bf16 %v735_v7, %v735_v7  ;;  %v1024_v3 = vld [vmem:[#allocation8 + $0x8a0] sm:$0xff]  ;;  %v6102_v7 = vcombine.low %v1156_v58, %v1160_v59 }
 0x165   : > { %v7221_v18 = vpop.f32.mrf.mxu0  ;;  %v7227_v23 = vpop.f32.mrf.mxu1  ;;  %v1148_v4 = vld [vmem:[#allocation8 + $0xc80] sm:$0xff]  ;;  %v5967_v8 = vcombine.high %v1020_v1, %v1024_v3 }
 0x166   : > { %3894 = vmatprep.mubr.bf16.mxu0 %v7212_v12  ;;  %3935 = vmatprep.mubr.bf16.mxu1 %v7219_v16  ;;  %v6095_v9 = vcombine.high %v1148_v4, %v1152_v5  ;;  %v1016_v13 = vld [vmem:[#allocation8 + $0x860] sm:$0xff] }
 0x167   : > { %3895 = vmatmul.mubr.bf16.vlgmr.msra.gmra.mxu0 %v7217_v15  ;;  %v686_v26 = vpop.f32.mrf.mxu0  ;;  %3936 = vmatmul.mubr.bf16.vlgmr.msra.gmra.mxu1 %v7210_v11  ;;  %v727_v29 = vpop.f32.mrf.mxu1  ;;  %v1004_v24 = vld [vmem:[#allocation8 + $0x800] sm:$0xff] }
 0x168   : > { %3945 = vmatpush1.bf16.msra.mxu0 %v6006_v40  ;;  %v687_v28 = vadd.f32 %v686_v26, %v467_v14  ;;  %3986 = vmatpush1.bf16.msra.mxu1 %v6134_v41  ;;  %v728_v33 = vadd.f32 %v727_v29, %v475_v19  ;;  %v5990_v40 = vcombine.low %v1044_v21, %v1048_v22  ;;  %v1140_v14 = vld [vmem:[#allocation8 + $0xc40] sm:$0xff] }
 0x169   : > { %3946 = vmatprep.subr.bf16.mxu0 %v5999_v17  ;;  %v688_v32 = vpop.f32.mrf.mxu0  ;;  %3987 = vmatprep.subr.bf16.mxu1 %v6127_v20  ;;  %v729_v38 = vpop.f32.mrf.mxu1  ;;  %v1144_v17 = vld [vmem:[#allocation8 + $0xc60] sm:$0xff]  ;;  %v5966_v19 = vcombine.low %v1020_v1, %v1024_v3  ;;  %v6094_v20 = vcombine.low %v1148_v4, %v1152_v5  ;;  %v5959_v21 = vcombine.high %v1012_v10, %v1016_v13 }
 0x16a   : > { %v737_v37 = vmax.f32 %v687_v28, 0.0  ;;  %v739_v43 = vmax.f32 %v728_v33, 0.0  ;;  %v6087_v22 = vcombine.high %v1140_v14, %v1144_v17  ;;  %v1008_v25 = vld [vmem:[#allocation8 + $0x820] sm:$0xff]  ;;  %v5958_v28 = vcombine.low %v1012_v10, %v1016_v13 }
 0x16b   : > { %v689_v50 = vpop.f32.mrf.mxu0  ;;  %v730_v41 = vpop.f32.mrf.mxu1  ;;  %v1132_v26 = vld [vmem:[#allocation8 + $0xc00] sm:$0xff]  ;;  %v6086_v29 = vcombine.low %v1140_v14, %v1144_v17  ;;  %v5950_v36 = vcombine.low %v1004_v24, %v1008_v25 }
 0x16c   : > { %3947 = vmatpush1.bf16.msra.mxu0 %v5998_v27  ;;  %v7232_v51 = vpack.c.bf16 %v737_v37, %v737_v37  ;;  %3988 = vmatpush1.bf16.msra.mxu1 %v6126_v30  ;;  %v7234_v54 = vpack.c.bf16 %v739_v43, %v739_v43  ;;  %v1136_v27 = vld [vmem:[#allocation8 + $0xc20] sm:$0xff]  ;;  %v5951_v30 = vcombine.high %v1004_v24, %v1008_v25 }
 0x16d   : > { %3948 = vmatprep.subr.bf16.mxu0 %v5991_v31  ;;  %3989 = vmatprep.subr.bf16.mxu1 %v6119_v34  ;;  %v6079_v31 = vcombine.high %v1132_v26, %v1136_v27  ;;  %v1124_v32 = vld [vmem:[#allocation8 + $0xbc0] sm:$0xff]  ;;  %v6078_v37 = vcombine.low %v1132_v26, %v1136_v27 }
 0x16e   : > { %3976 = vmatprep.mubr.bf16.mxu0 %v7232_v51  ;;  %4017 = vmatprep.mubr.bf16.mxu1 %v7234_v54  ;;  %v1128_v33 = vld [vmem:[#allocation8 + $0xbe0] sm:$0xff] }
 0x16f   : > { %v1252_v34 = vld [vmem:[#allocation8 + $0xfc0] sm:$0xff]  ;;  %v6071_v38 = vcombine.high %v1124_v32, %v1128_v33  ;;  %v6070_v41 = vcombine.low %v1124_v32, %v1128_v33 }
 0x170   : > { %3949 = vmatpush1.bf16.msra.mxu0 %v5990_v40  ;;  %3990 = vmatpush1.bf16.msra.mxu1 %v6118_v52  ;;  %v1256_v35 = vld [vmem:[#allocation8 + $0xfe0] sm:$0xff] }
 0x171   : > { %3950 = vmatprep.subr.bf16.mxu0 %v5983_v53  ;;  %3991 = vmatprep.subr.bf16.mxu1 %v6111_v55  ;;  %v6199_v39 = vcombine.high %v1252_v34, %v1256_v35  ;;  %v1116_v42 = vld [vmem:[#allocation8 + $0xb80] sm:$0xff]  ;;  %v6198_v52 = vcombine.low %v1252_v34, %v1256_v35 }
 0x172   : > { %v1120_v43 = vld [vmem:[#allocation8 + $0xba0] sm:$0xff] }
 0x173   : > { %v1244_v50 = vld [vmem:[#allocation8 + $0xf80] sm:$0xff]  ;;  %v6063_v53 = vcombine.high %v1116_v42, %v1120_v43 }
 0x174   : > { %3951 = vmatpush1.bf16.msra.mxu0 %v5982_v60  ;;  %3992 = vmatpush1.bf16.msra.mxu1 %v6110_v62  ;;  %v1248_v40 = vld [vmem:[#allocation8 + $0xfa0] sm:$0xff]  ;;  %v6062_v60 = vcombine.low %v1116_v42, %v1120_v43 }
 0x175   : > { %3952 = vmatprep.subr.bf16.mxu0 %v5975_v63  ;;  %3993 = vmatprep.subr.bf16.mxu1 %v6103_v0  ;;  %v6191_v55 = vcombine.high %v1244_v50, %v1248_v40  ;;  %v1108_v56 = vld [vmem:[#allocation8 + $0xb40] sm:$0xff]  ;;  %v6190_v62 = vcombine.low %v1244_v50, %v1248_v40 }
 0x176   : > { %v1112_v57 = vld [vmem:[#allocation8 + $0xb60] sm:$0xff] }
 0x177   : > { %v1236_v58 = vld [vmem:[#allocation8 + $0xf40] sm:$0xff]  ;;  %v6055_v63 = vcombine.high %v1108_v56, %v1112_v57 }
 0x178   : > { %3953 = vmatpush1.bf16.msra.mxu0 %v5974_v6  ;;  %3994 = vmatpush1.bf16.msra.mxu1 %v6102_v7  ;;  %v1240_v59 = vld [vmem:[#allocation8 + $0xf60] sm:$0xff]  ;;  %v6054_v6 = vcombine.low %v1108_v56, %v1112_v57 }
 0x179   : > { %3954 = vmatprep.subr.bf16.mxu0 %v5967_v8  ;;  %3995 = vmatprep.subr.bf16.mxu1 %v6095_v9  ;;  %v6183_v0 = vcombine.high %v1236_v58, %v1240_v59  ;;  %v1100_v1 = vld [vmem:[#allocation8 + $0xb00] sm:$0xff]  ;;  %v6182_v7 = vcombine.low %v1236_v58, %v1240_v59 }
 0x17a   : > { %v1104_v3 = vld [vmem:[#allocation8 + $0xb20] sm:$0xff] }
 0x17b   : > { %v1228_v4 = vld [vmem:[#allocation8 + $0xf00] sm:$0xff]  ;;  %v6047_v8 = vcombine.high %v1100_v1, %v1104_v3 }
 0x17c   : > { %3955 = vmatpush1.bf16.msra.mxu0 %v5966_v19  ;;  %3996 = vmatpush1.bf16.msra.mxu1 %v6094_v20  ;;  %v1232_v5 = vld [vmem:[#allocation8 + $0xf20] sm:$0xff]  ;;  %v6046_v19 = vcombine.low %v1100_v1, %v1104_v3  ;;  %v937_v1 = vld [vmem:[#allocation8 + $0x5e8] sm:$0xff] }
 0x17d   : > { %3956 = vmatprep.subr.bf16.mxu0 %v5959_v21  ;;  %3997 = vmatprep.subr.bf16.mxu1 %v6087_v22  ;;  %v6175_v9 = vcombine.high %v1228_v4, %v1232_v5  ;;  %v1092_v10 = vld [vmem:[#allocation8 + $0xac0] sm:$0xff]  ;;  %v6174_v20 = vcombine.low %v1228_v4, %v1232_v5 }
 0x17e   : > { %v1096_v13 = vld [vmem:[#allocation8 + $0xae0] sm:$0xff] }
 0x17f   : > { %v1220_v14 = vld [vmem:[#allocation8 + $0xec0] sm:$0xff]  ;;  %v6039_v21 = vcombine.high %v1092_v10, %v1096_v13 }
 0x180   : > { %3957 = vmatpush1.bf16.msra.mxu0 %v5958_v28  ;;  %3998 = vmatpush1.bf16.msra.mxu1 %v6086_v29  ;;  %v1224_v17 = vld [vmem:[#allocation8 + $0xee0] sm:$0xff]  ;;  %v6038_v28 = vcombine.low %v1092_v10, %v1096_v13  ;;  %v470_v29 = vsub.s32 6, %v7186_v44  ;;  %v925_v13 = vld [vmem:[#allocation8 + $0x588] sm:$0xff] }
 0x181   : > { %3958 = vmatprep.subr.bf16.mxu0 %v5951_v30  ;;  %3999 = vmatprep.subr.bf16.mxu1 %v6079_v31  ;;  %v6167_v22 = vcombine.high %v1220_v14, %v1224_v17  ;;  %v1084_v24 = vld [vmem:[#allocation8 + $0xa80] sm:$0xff]  ;;  %v6166_v30 = vcombine.low %v1220_v14, %v1224_v17  ;;  %v462_v31 = vsub.s32 4, %v7186_v44  ;;  %v929_v14 = vld [vmem:[#allocation8 + $0x5a8] sm:$0xff] }
 0x182   : > { %v1088_v25 = vld [vmem:[#allocation8 + $0xaa0] sm:$0xff] }
 0x183   : > { %v1212_v26 = vld [vmem:[#allocation8 + $0xe80] sm:$0xff]  ;;  %v6031_v32 = vcombine.high %v1084_v24, %v1088_v25  ;;  %v463_v42 = vrot.slane %v7191_v46, %v462_v31 }
 0x184   : > { %3959 = vmatpush1.bf16.msra.mxu0 %v5950_v36  ;;  %4000 = vmatpush1.bf16.msra.mxu1 %v6078_v37  ;;  %v1216_v27 = vld [vmem:[#allocation8 + $0xea0] sm:$0xff] }
 0x185   : > { %3960 = vmatprep.subr.bf16.mxu0 %v6071_v38  ;;  %4001 = vmatprep.subr.bf16.mxu1 %v6199_v39  ;;  %v6159_v33 = vcombine.high %v1212_v26, %v1216_v27  ;;  %v1076_v34 = vld [vmem:[#allocation8 + $0xa40] sm:$0xff]  ;;  %v471_v38 = vrot.slane %v7191_v46, %v470_v29  ;;  %v6030_v39 = vcombine.low %v1084_v24, %v1088_v25  ;;  %v917_v25 = vld [vmem:[#allocation8 + $0x548] sm:$0xff] }
 0x186   : > { %v1080_v35 = vld [vmem:[#allocation8 + $0xa60] sm:$0xff]  ;;  %v6158_v43 = vcombine.low %v1212_v26, %v1216_v27  ;;  %v685_v58 = vadd.f32 %v7221_v18, %v463_v42  ;;  %v5873_v24 = vcombine.high %v925_v13, %v929_v14  ;;  %v921_v26 = vld [vmem:[#allocation8 + $0x568] sm:$0xff] }
 0x187   : > { %v1204_v36 = vld [vmem:[#allocation8 + $0xe40] sm:$0xff]  ;;  %v6023_v50 = vcombine.high %v1076_v34, %v1080_v35  ;;  %v726_v56 = vadd.f32 %v7227_v23, %v471_v38  ;;  %v6022_v57 = vcombine.low %v1076_v34, %v1080_v35  ;;  %v785_v34 = vld [vmem:[#allocation8 + $0x128] sm:$0xff]  ;;  %v5864_v38 = vcombine.low %v917_v25, %v921_v26 }
 0x188   : > { %3961 = vmatpush2.bf16.msra.mxu0 %v6070_v41  ;;  %4002 = vmatpush2.bf16.msra.mxu1 %v6198_v52  ;;  %v1208_v37 = vld [vmem:[#allocation8 + $0xe60] sm:$0xff]  ;;  %v736_v5 = vmax.f32 %v685_v58, 0.0  ;;  %v909_v35 = vld [vmem:[#allocation8 + $0x508] sm:$0xff] }
 0x189   : > { %3962 = vmatprep.subr.bf16.mxu0 %v6063_v53  ;;  %4003 = vmatprep.subr.bf16.mxu1 %v6191_v55  ;;  %v6151_v40 = vcombine.high %v1204_v36, %v1208_v37  ;;  %v1068_v41 = vld [vmem:[#allocation8 + $0xa00] sm:$0xff]  ;;  %v6150_v59 = vcombine.low %v1204_v36, %v1208_v37  ;;  %v738_v3 = vmax.f32 %v726_v56, 0.0  ;;  %v913_v36 = vld [vmem:[#allocation8 + $0x528] sm:$0xff] }
 0x18a   : > { %v1072_v52 = vld [vmem:[#allocation8 + $0xa20] sm:$0xff]  ;;  %v7250_v17 = vpack.c.bf16 %v736_v5, %v736_v5  ;;  %v5857_v42 = vcombine.high %v909_v35, %v913_v36  ;;  %v769_v58 = vld [vmem:[#allocation8 + $0xa8] sm:$0xff] }
 0x18b   : > { %v1196_v53 = vld [vmem:[#allocation8 + $0xe00] sm:$0xff]  ;;  %v6015_v46 = vcombine.high %v1068_v41, %v1072_v52  ;;  %v6014_v4 = vcombine.low %v1068_v41, %v1072_v52  ;;  %v905_v41 = vld [vmem:[#allocation8 + $0x4e8] sm:$0xff] }
 0x18c   : > { %3963 = vmatpush2.bf16.msra.mxu0 %v6062_v60  ;;  %4004 = vmatpush2.bf16.msra.mxu1 %v6190_v62  ;;  %v1200_v55 = vld [vmem:[#allocation8 + $0xe20] sm:$0xff]  ;;  %v805_v62 = vld [vmem:[#allocation8 + $0x1c8] sm:$0xff] }
 0x18d   : > { %3964 = vmatprep.subr.bf16.mxu0 %v6055_v63  ;;  %4005 = vmatprep.subr.bf16.mxu1 %v6183_v0  ;;  %v6143_v60 = vcombine.high %v1196_v53, %v1200_v55  ;;  %v809_v63 = vld [vmem:[#allocation8 + $0x1e8] sm:$0xff]  ;;  %v6142_v23 = vcombine.low %v1196_v53, %v1200_v55  ;;  %v5856_v53 = vcombine.low %v909_v35, %v913_v36 }
 0x18e   : > { %v933_v0 = vld [vmem:[#allocation8 + $0x5c8] sm:$0xff]  ;;  %v5752_v10 = vcombine.low %v805_v62, %v809_v63 }
 0x18f   : > { %v5881_v18 = vcombine.high %v933_v0, %v937_v1  ;;  %v889_v5 = vld [vmem:[#allocation8 + $0x468] sm:$0xff] }
 0x190   : > { %3965 = vmatpush2.bf16.msra.mxu0 %v6054_v6  ;;  %4006 = vmatpush2.bf16.msra.mxu1 %v6182_v7  ;;  %v5753_v6 = vcombine.high %v805_v62, %v809_v63  ;;  %v797_v7 = vld [vmem:[#allocation8 + $0x188] sm:$0xff] }
 0x191   : > { %3966 = vmatprep.subr.bf16.mxu0 %v6047_v8  ;;  %4007 = vmatprep.subr.bf16.mxu1 %v6175_v9  ;;  %v801_v8 = vld [vmem:[#allocation8 + $0x1a8] sm:$0xff]  ;;  %v7248_v9 = vpack.c.bf16 %v738_v3, %v738_v3 }
 0x192   : > { %v5744_v27 = vcombine.low %v797_v7, %v801_v8  ;;  %v761_v3 = vld [vmem:[#allocation8 + $0x68] sm:$0xff] }
 0x193   : > { %v865_v35 = vld [vmem:[#allocation8 + $0x3a8] sm:$0xff] }
 0x194   : > { %3967 = vmatpush2.bf16.msra.mxu0 %v6046_v19  ;;  %4008 = vmatpush2.bf16.msra.mxu1 %v6174_v20  ;;  %v5880_v19 = vcombine.low %v933_v0, %v937_v1  ;;  %v5745_v20 = vcombine.high %v797_v7, %v801_v8  ;;  %v757_v1 = vld [vmem:[#allocation8 + $0x48] sm:$0xff] }
 0x195   : > { %3968 = vmatprep.subr.bf16.mxu0 %v6039_v21  ;;  %4009 = vmatprep.subr.bf16.mxu1 %v6167_v22  ;;  %v789_v21 = vld [vmem:[#allocation8 + $0x148] sm:$0xff] }
 0x196   : > { %v793_v22 = vld [vmem:[#allocation8 + $0x168] sm:$0xff] }
 0x197   : > { %v5736_v37 = vcombine.low %v789_v21, %v793_v22  ;;  %v749_v8 = vld [vmem:[#allocation8 + $0x8] sm:$0xff] }
 0x198   : > { %3969 = vmatpush2.bf16.msra.mxu0 %v6038_v28  ;;  %4010 = vmatpush2.bf16.msra.mxu1 %v6166_v30  ;;  %v5872_v28 = vcombine.low %v925_v13, %v929_v14  ;;  %v5737_v30 = vcombine.high %v789_v21, %v793_v22  ;;  %v877_v13 = vld [vmem:[#allocation8 + $0x408] sm:$0xff] }
 0x199   : > { %3970 = vmatprep.subr.bf16.mxu0 %v6031_v32  ;;  %4011 = vmatprep.subr.bf16.mxu1 %v6159_v33  ;;  %v5865_v32 = vcombine.high %v917_v25, %v921_v26  ;;  %v781_v33 = vld [vmem:[#allocation8 + $0x108] sm:$0xff] }
 0x19a   : > { %v5728_v52 = vcombine.low %v781_v33, %v785_v34  ;;  %v881_v14 = vld [vmem:[#allocation8 + $0x428] sm:$0xff] }
 0x19b   : > { %v5825_v22 = vcombine.high %v877_v13, %v881_v14  ;;  %v873_v25 = vld [vmem:[#allocation8 + $0x3e8] sm:$0xff] }
 0x19c   : > { %3971 = vmatpush2.bf16.msra.mxu0 %v6030_v39  ;;  %4012 = vmatpush2.bf16.msra.mxu1 %v6158_v43  ;;  %v5729_v39 = vcombine.high %v781_v33, %v785_v34  ;;  %v773_v43 = vld [vmem:[#allocation8 + $0xc8] sm:$0xff] }
 0x19d   : > { %3972 = vmatprep.subr.bf16.mxu0 %v6023_v50  ;;  %4013 = vmatprep.subr.bf16.mxu1 %v6151_v40  ;;  %v777_v50 = vld [vmem:[#allocation8 + $0xe8] sm:$0xff] }
 0x19e   : > { %v901_v40 = vld [vmem:[#allocation8 + $0x4c8] sm:$0xff]  ;;  %v5721_v55 = vcombine.high %v773_v43, %v777_v50 }
 0x19f   : > { %v5849_v56 = vcombine.high %v901_v40, %v905_v41  ;;  %v5848_v62 = vcombine.low %v901_v40, %v905_v41  ;;  %v997_v26 = vld [vmem:[#allocation8 + $0x7c8] sm:$0xff] }
 0x1a0   : > { %3973 = vmatpush2.bf16.msra.mxu0 %v6022_v57  ;;  %4014 = vmatpush2.bf16.msra.mxu1 %v6150_v59  ;;  %v765_v57 = vld [vmem:[#allocation8 + $0x88] sm:$0xff] }
 0x1a1   : > { %3974 = vmatprep.subr.bf16.mxu0 %v6015_v46  ;;  %4015 = vmatprep.subr.bf16.mxu1 %v6143_v60  ;;  %v893_v59 = vld [vmem:[#allocation8 + $0x488] sm:$0xff]  ;;  %v5720_v60 = vcombine.low %v773_v43, %v777_v50  ;;  %v5713_v63 = vcombine.high %v765_v57, %v769_v58 }
 0x1a2   : > { %v897_v46 = vld [vmem:[#allocation8 + $0x4a8] sm:$0xff] }
 0x1a3   : > { %v5841_v0 = vcombine.high %v893_v59, %v897_v46  ;;  %v861_v34 = vld [vmem:[#allocation8 + $0x388] sm:$0xff] }
 0x1a4   : > { %3975 = vmatpush2.bf16.msra.mxu0 %v6014_v4  ;;  %4016 = vmatpush2.bf16.msra.mxu1 %v6142_v23  ;;  %v885_v4 = vld [vmem:[#allocation8 + $0x448] sm:$0xff]  ;;  %v5712_v23 = vcombine.low %v765_v57, %v769_v58 }
 0x1a5   : > { %4026 = vmatprep.subr.bf16.mxu0 %v5753_v6  ;;  %4067 = vmatprep.subr.bf16.mxu1 %v5881_v18  ;;  %v5840_v6 = vcombine.low %v893_v59, %v897_v46  ;;  %v5705_v18 = vcombine.high %v757_v1, %v761_v3  ;;  %v5833_v7 = vcombine.high %v885_v4, %v889_v5  ;;  %v989_v36 = vld [vmem:[#allocation8 + $0x788] sm:$0xff] }
 0x1a6   : > { %v853_v50 = vld [vmem:[#allocation8 + $0x348] sm:$0xff] }
 0x1a7   : > { %3977 = vmatmul.mubr.bf16.vlgmr.msra.gmra.mxu0 %v7250_v17  ;;  %4018 = vmatmul.mubr.bf16.vlgmr.msra.gmra.mxu1 %v7248_v9  ;;  %v857_v40 = vld [vmem:[#allocation8 + $0x368] sm:$0xff] }
 0x1a8   : > { %4027 = vmatpush1.bf16.msra.mxu0 %v5752_v10  ;;  %4058 = vmatprep.mubr.bf16.mxu0 %v7212_v12  ;;  %v753_v10 = vld [vmem:[#allocation8 + $0x28] sm:$0xff] }
 0x1a9   : > { %4068 = vmatpush1.bf16.msra.mxu1 %v5880_v19  ;;  %4099 = vmatprep.mubr.bf16.mxu1 %v7219_v16  ;;  %v5704_v19 = vcombine.low %v757_v1, %v761_v3  ;;  %v5697_v21 = vcombine.high %v749_v8, %v753_v10  ;;  %v981_v41 = vld [vmem:[#allocation8 + $0x748] sm:$0xff] }
 0x1aa   : > { %4028 = vmatprep.subr.bf16.mxu0 %v5745_v20  ;;  %4069 = vmatprep.subr.bf16.mxu1 %v5873_v24  ;;  %v5832_v20 = vcombine.low %v885_v4, %v889_v5  ;;  %v869_v24 = vld [vmem:[#allocation8 + $0x3c8] sm:$0xff] }
 0x1ab   : > { %v845_v58 = vld [vmem:[#allocation8 + $0x308] sm:$0xff] }
 0x1ac   : > { %4029 = vmatpush1.bf16.msra.mxu0 %v5744_v27  ;;  %v1001_v27 = vld [vmem:[#allocation8 + $0x7e8] sm:$0xff] }
 0x1ad   : > { %4070 = vmatpush1.bf16.msra.mxu1 %v5872_v28  ;;  %4030 = vmatprep.subr.bf16.mxu0 %v5737_v30  ;;  %v5696_v28 = vcombine.low %v749_v8, %v753_v10  ;;  %v5824_v30 = vcombine.low %v877_v13, %v881_v14  ;;  %v5945_v33 = vcombine.high %v997_v26, %v1001_v27  ;;  %v849_v59 = vld [vmem:[#allocation8 + $0x328] sm:$0xff] }
 0x1ae   : > { %4071 = vmatprep.subr.bf16.mxu1 %v5865_v32  ;;  %v5817_v32 = vcombine.high %v869_v24, %v873_v25  ;;  %v973_v46 = vld [vmem:[#allocation8 + $0x708] sm:$0xff] }
 0x1af   : > { %v837_v3 = vld [vmem:[#allocation8 + $0x2c8] sm:$0xff] }
 0x1b0   : > { %4031 = vmatpush1.bf16.msra.mxu0 %v5736_v37  ;;  %v993_v37 = vld [vmem:[#allocation8 + $0x7a8] sm:$0xff] }
 0x1b1   : > { %4072 = vmatpush1.bf16.msra.mxu1 %v5864_v38  ;;  %4032 = vmatprep.subr.bf16.mxu0 %v5729_v39  ;;  %v5816_v38 = vcombine.low %v869_v24, %v873_v25  ;;  %v5944_v39 = vcombine.low %v997_v26, %v1001_v27  ;;  %v5937_v43 = vcombine.high %v989_v36, %v993_v37  ;;  %v841_v4 = vld [vmem:[#allocation8 + $0x2e8] sm:$0xff] }
 0x1b2   : > { %4073 = vmatprep.subr.bf16.mxu1 %v5857_v42  ;;  %v5809_v42 = vcombine.high %v861_v34, %v865_v35  ;;  %v965_v5 = vld [vmem:[#allocation8 + $0x6c8] sm:$0xff] }
 0x1b3   : > { %v829_v10 = vld [vmem:[#allocation8 + $0x288] sm:$0xff] }
 0x1b4   : > { %4033 = vmatpush1.bf16.msra.mxu0 %v5728_v52  ;;  %v985_v52 = vld [vmem:[#allocation8 + $0x768] sm:$0xff] }
 0x1b5   : > { %4074 = vmatpush1.bf16.msra.mxu1 %v5856_v53  ;;  %4034 = vmatprep.subr.bf16.mxu0 %v5721_v55  ;;  %v5808_v53 = vcombine.low %v861_v34, %v865_v35  ;;  %v5936_v55 = vcombine.low %v989_v36, %v993_v37  ;;  %v5929_v57 = vcombine.high %v981_v41, %v985_v52  ;;  %v833_v13 = vld [vmem:[#allocation8 + $0x2a8] sm:$0xff] }
 0x1b6   : > { %4075 = vmatprep.subr.bf16.mxu1 %v5849_v56  ;;  %v5801_v56 = vcombine.high %v853_v50, %v857_v40  ;;  %v957_v14 = vld [vmem:[#allocation8 + $0x688] sm:$0xff] }
 0x1b7   : > { %v821_v25 = vld [vmem:[#allocation8 + $0x248] sm:$0xff] }
 0x1b8   : > { %4035 = vmatpush1.bf16.msra.mxu0 %v5720_v60  ;;  %v977_v60 = vld [vmem:[#allocation8 + $0x728] sm:$0xff] }
 0x1b9   : > { %4076 = vmatpush1.bf16.msra.mxu1 %v5848_v62  ;;  %4036 = vmatprep.subr.bf16.mxu0 %v5713_v63  ;;  %v5800_v62 = vcombine.low %v853_v50, %v857_v40  ;;  %v5928_v63 = vcombine.low %v981_v41, %v985_v52  ;;  %v5921_v1 = vcombine.high %v973_v46, %v977_v60  ;;  %v825_v26 = vld [vmem:[#allocation8 + $0x268] sm:$0xff] }
 0x1ba   : > { %4077 = vmatprep.subr.bf16.mxu1 %v5841_v0  ;;  %v5793_v0 = vcombine.high %v845_v58, %v849_v59  ;;  %v949_v27 = vld [vmem:[#allocation8 + $0x648] sm:$0xff] }
 0x1bb   : > { %v813_v35 = vld [vmem:[#allocation8 + $0x208] sm:$0xff] }
 0x1bc   : > { %4037 = vmatpush1.bf16.msra.mxu0 %v5712_v23  ;;  %v969_v23 = vld [vmem:[#allocation8 + $0x6e8] sm:$0xff] }
 0x1bd   : > { %4078 = vmatpush1.bf16.msra.mxu1 %v5840_v6  ;;  %4038 = vmatprep.subr.bf16.mxu0 %v5705_v18  ;;  %v5792_v6 = vcombine.low %v845_v58, %v849_v59  ;;  %v5920_v18 = vcombine.low %v973_v46, %v977_v60  ;;  %v5913_v8 = vcombine.high %v965_v5, %v969_v23  ;;  %v817_v36 = vld [vmem:[#allocation8 + $0x228] sm:$0xff] }
 0x1be   : > { %4079 = vmatprep.subr.bf16.mxu1 %v5833_v7  ;;  %v5785_v7 = vcombine.high %v837_v3, %v841_v4  ;;  %v941_v37 = vld [vmem:[#allocation8 + $0x608] sm:$0xff] }
 0x1bf   : > { %v1061_v40 = vld [vmem:[#allocation8 + $0x9c8] sm:$0xff] }
 0x1c0   : > { %4039 = vmatpush1.bf16.msra.mxu0 %v5704_v19  ;;  %v961_v19 = vld [vmem:[#allocation8 + $0x6a8] sm:$0xff] }
 0x1c1   : > { %4080 = vmatpush1.bf16.msra.mxu1 %v5832_v20  ;;  %4040 = vmatprep.subr.bf16.mxu0 %v5697_v21  ;;  %v5784_v20 = vcombine.low %v837_v3, %v841_v4  ;;  %v5912_v21 = vcombine.low %v965_v5, %v969_v23  ;;  %v5905_v24 = vcombine.high %v957_v14, %v961_v19  ;;  %v1065_v41 = vld [vmem:[#allocation8 + $0x9e8] sm:$0xff] }
 0x1c2   : > { %4081 = vmatprep.subr.bf16.mxu1 %v5825_v22  ;;  %v5777_v22 = vcombine.high %v829_v10, %v833_v13  ;;  %v1189_v52 = vld [vmem:[#allocation8 + $0xdc8] sm:$0xff]  ;;  %v6008_v60 = vcombine.low %v1061_v40, %v1065_v41 }
 0x1c3   : > { %v1053_v59 = vld [vmem:[#allocation8 + $0x988] sm:$0xff] }
 0x1c4   : > { %4041 = vmatpush1.bf16.msra.mxu0 %v5696_v28  ;;  %v953_v28 = vld [vmem:[#allocation8 + $0x668] sm:$0xff] }
 0x1c5   : > { %4082 = vmatpush1.bf16.msra.mxu1 %v5824_v30  ;;  %4042 = vmatprep.subr.bf16.mxu0 %v5817_v32  ;;  %v5776_v30 = vcombine.low %v829_v10, %v833_v13  ;;  %v5904_v32 = vcombine.low %v957_v14, %v961_v19  ;;  %v5897_v34 = vcombine.high %v949_v27, %v953_v28  ;;  %v1057_v46 = vld [vmem:[#allocation8 + $0x9a8] sm:$0xff] }
 0x1c6   : > { %4083 = vmatprep.subr.bf16.mxu1 %v5945_v33  ;;  %v5769_v33 = vcombine.high %v821_v25, %v825_v26  ;;  %v1045_v3 = vld [vmem:[#allocation8 + $0x948] sm:$0xff] }
 0x1c7   : > { %v1049_v4 = vld [vmem:[#allocation8 + $0x968] sm:$0xff] }
 0x1c8   : > { %4043 = vmatpush2.bf16.msra.mxu0 %v5816_v38  ;;  %v945_v38 = vld [vmem:[#allocation8 + $0x628] sm:$0xff] }
 0x1c9   : > { %4084 = vmatpush2.bf16.msra.mxu1 %v5944_v39  ;;  %4044 = vmatprep.subr.bf16.mxu0 %v5809_v42  ;;  %v5768_v39 = vcombine.low %v821_v25, %v825_v26  ;;  %v5896_v42 = vcombine.low %v949_v27, %v953_v28  ;;  %v5889_v50 = vcombine.high %v941_v37, %v945_v38  ;;  %v1173_v23 = vld [vmem:[#allocation8 + $0xd48] sm:$0xff] }
 0x1ca   : > { %4085 = vmatprep.subr.bf16.mxu1 %v5937_v43  ;;  %v5761_v43 = vcombine.high %v813_v35, %v817_v36  ;;  %v1037_v13 = vld [vmem:[#allocation8 + $0x908] sm:$0xff] }
 0x1cb   : > { %v1041_v14 = vld [vmem:[#allocation8 + $0x928] sm:$0xff] }
 0x1cc   : > { %4045 = vmatpush2.bf16.msra.mxu0 %v5808_v53  ;;  %v1193_v53 = vld [vmem:[#allocation8 + $0xde8] sm:$0xff] }
 0x1cd   : > { %4086 = vmatpush2.bf16.msra.mxu1 %v5936_v55  ;;  %4046 = vmatprep.subr.bf16.mxu0 %v5801_v56  ;;  %v5760_v55 = vcombine.low %v813_v35, %v817_v36  ;;  %v5888_v56 = vcombine.low %v941_v37, %v945_v38  ;;  %v6137_v58 = vcombine.high %v1189_v52, %v1193_v53  ;;  %v1165_v19 = vld [vmem:[#allocation8 + $0xd08] sm:$0xff] }
 0x1ce   : > { %4087 = vmatprep.subr.bf16.mxu1 %v5929_v57  ;;  %v6009_v57 = vcombine.high %v1061_v40, %v1065_v41  ;;  %v1029_v26 = vld [vmem:[#allocation8 + $0x8c8] sm:$0xff] }
 0x1cf   : > { %v1033_v27 = vld [vmem:[#allocation8 + $0x8e8] sm:$0xff] }
 0x1d0   : > { %4047 = vmatpush2.bf16.msra.mxu0 %v5800_v62  ;;  %v1181_v62 = vld [vmem:[#allocation8 + $0xd88] sm:$0xff] }
 0x1d1   : > { %4088 = vmatpush2.bf16.msra.mxu1 %v5928_v63  ;;  %4048 = vmatprep.subr.bf16.mxu0 %v5793_v0  ;;  %v1185_v63 = vld [vmem:[#allocation8 + $0xda8] sm:$0xff]  ;;  %v6136_v0 = vcombine.low %v1189_v52, %v1193_v53 }
 0x1d2   : > { %4089 = vmatprep.subr.bf16.mxu1 %v5921_v1  ;;  %v6001_v1 = vcombine.high %v1053_v59, %v1057_v46  ;;  %v6129_v5 = vcombine.high %v1181_v62, %v1185_v63  ;;  %v1157_v28 = vld [vmem:[#allocation8 + $0xcc8] sm:$0xff] }
 0x1d3   : > { %v1021_v36 = vld [vmem:[#allocation8 + $0x888] sm:$0xff] }
 0x1d4   : > { %4049 = vmatpush2.bf16.msra.mxu0 %v5792_v6  ;;  %v1177_v6 = vld [vmem:[#allocation8 + $0xd68] sm:$0xff] }
 0x1d5   : > { %4090 = vmatpush2.bf16.msra.mxu1 %v5920_v18  ;;  %4050 = vmatprep.subr.bf16.mxu0 %v5785_v7  ;;  %v6000_v18 = vcombine.low %v1053_v59, %v1057_v46  ;;  %v6128_v7 = vcombine.low %v1181_v62, %v1185_v63  ;;  %v6121_v10 = vcombine.high %v1173_v23, %v1177_v6  ;;  %v1025_v37 = vld [vmem:[#allocation8 + $0x8a8] sm:$0xff] }
 0x1d6   : > { %4091 = vmatprep.subr.bf16.mxu1 %v5913_v8  ;;  %v5993_v8 = vcombine.high %v1045_v3, %v1049_v4  ;;  %v1149_v38 = vld [vmem:[#allocation8 + $0xc88] sm:$0xff] }
 0x1d7   : > { %v1013_v41 = vld [vmem:[#allocation8 + $0x848] sm:$0xff] }
 0x1d8   : > { %4051 = vmatpush2.bf16.msra.mxu0 %v5784_v20  ;;  %v1169_v20 = vld [vmem:[#allocation8 + $0xd28] sm:$0xff] }
 0x1d9   : > { %4092 = vmatpush2.bf16.msra.mxu1 %v5912_v21  ;;  %4052 = vmatprep.subr.bf16.mxu0 %v5777_v22  ;;  %v5992_v21 = vcombine.low %v1045_v3, %v1049_v4  ;;  %v6120_v22 = vcombine.low %v1173_v23, %v1177_v6  ;;  %v6113_v25 = vcombine.high %v1165_v19, %v1169_v20  ;;  %v1017_v52 = vld [vmem:[#allocation8 + $0x868] sm:$0xff] }
 0x1da   : > { %4093 = vmatprep.subr.bf16.mxu1 %v5905_v24  ;;  %v5985_v24 = vcombine.high %v1037_v13, %v1041_v14  ;;  %v1141_v53 = vld [vmem:[#allocation8 + $0xc48] sm:$0xff] }
 0x1db   : > { %v1005_v46 = vld [vmem:[#allocation8 + $0x808] sm:$0xff] }
 0x1dc   : > { %4053 = vmatpush2.bf16.msra.mxu0 %v5776_v30  ;;  %v1161_v30 = vld [vmem:[#allocation8 + $0xce8] sm:$0xff] }
 0x1dd   : > { %4094 = vmatpush2.bf16.msra.mxu1 %v5904_v32  ;;  %4054 = vmatprep.subr.bf16.mxu0 %v5769_v33  ;;  %v5984_v32 = vcombine.low %v1037_v13, %v1041_v14  ;;  %v6112_v33 = vcombine.low %v1165_v19, %v1169_v20  ;;  %v6105_v35 = vcombine.high %v1157_v28, %v1161_v30  ;;  %v1133_v62 = vld [vmem:[#allocation8 + $0xc08] sm:$0xff] }
 0x1de   : > { %4095 = vmatprep.subr.bf16.mxu1 %v5897_v34  ;;  %v5977_v34 = vcombine.high %v1029_v26, %v1033_v27  ;;  %v1137_v63 = vld [vmem:[#allocation8 + $0xc28] sm:$0xff] }
 0x1df   : > { %v6081_v4 = vcombine.high %v1133_v62, %v1137_v63  ;;  %v1129_v23 = vld [vmem:[#allocation8 + $0xbe8] sm:$0xff] }
 0x1e0   : > { %4055 = vmatpush2.bf16.msra.mxu0 %v5768_v39  ;;  %v1153_v39 = vld [vmem:[#allocation8 + $0xca8] sm:$0xff] }
 0x1e1   : > { %4096 = vmatpush2.bf16.msra.mxu1 %v5896_v42  ;;  %4056 = vmatprep.subr.bf16.mxu0 %v5761_v43  ;;  %v5976_v42 = vcombine.low %v1029_v26, %v1033_v27  ;;  %v6104_v43 = vcombine.low %v1157_v28, %v1161_v30  ;;  %v6097_v40 = vcombine.high %v1149_v38, %v1153_v39  ;;  %v1253_v6 = vld [vmem:[#allocation8 + $0xfc8] sm:$0xff] }
 0x1e2   : > { %4097 = vmatprep.subr.bf16.mxu1 %v5889_v50  ;;  %v5969_v50 = vcombine.high %v1021_v36, %v1025_v37  ;;  %v1117_v14 = vld [vmem:[#allocation8 + $0xb88] sm:$0xff] }
 0x1e3   : > { %v1121_v19 = vld [vmem:[#allocation8 + $0xba8] sm:$0xff] }
 0x1e4   : > { %4057 = vmatpush2.bf16.msra.mxu0 %v5760_v55  ;;  %v1145_v55 = vld [vmem:[#allocation8 + $0xc68] sm:$0xff] }
 0x1e5   : > { %4098 = vmatpush2.bf16.msra.mxu1 %v5888_v56  ;;  %4108 = vmatprep.subr.bf16.mxu0 %v6009_v57  ;;  %v5968_v56 = vcombine.low %v1021_v36, %v1025_v37  ;;  %v6096_v57 = vcombine.low %v1149_v38, %v1153_v39  ;;  %v6089_v59 = vcombine.high %v1141_v53, %v1145_v55  ;;  %v1245_v20 = vld [vmem:[#allocation8 + $0xf88] sm:$0xff] }
 0x1e6   : > { %4149 = vmatprep.subr.bf16.mxu1 %v6137_v58  ;;  %v5961_v58 = vcombine.high %v1013_v41, %v1017_v52  ;;  %v1109_v27 = vld [vmem:[#allocation8 + $0xb48] sm:$0xff] }
 0x1e7   : > { %4059 = vmatmul.mubr.bf16.vlgmr.msra.gmra.mxu0 %v7217_v15  ;;  %v1113_v28 = vld [vmem:[#allocation8 + $0xb68] sm:$0xff] }
 0x1e8   : > { %4100 = vmatmul.mubr.bf16.vlgmr.msra.gmra.mxu1 %v7210_v11  ;;  %4109 = vmatpush1.bf16.msra.mxu0 %v6008_v60  ;;  %v1009_v60 = vld [vmem:[#allocation8 + $0x828] sm:$0xff] }
 0x1e9   : > { %4140 = vmatprep.mubr.bf16.mxu0 %v7232_v51  ;;  %4150 = vmatpush1.bf16.msra.mxu1 %v6136_v0  ;;  %v5960_v0 = vcombine.low %v1013_v41, %v1017_v52  ;;  %v5953_v3 = vcombine.high %v1005_v46, %v1009_v60  ;;  %v1237_v30 = vld [vmem:[#allocation8 + $0xf48] sm:$0xff] }
 0x1ea   : > { %4181 = vmatprep.mubr.bf16.mxu1 %v7234_v54  ;;  %4110 = vmatprep.subr.bf16.mxu0 %v6001_v1  ;;  %v6088_v1 = vcombine.low %v1141_v53, %v1145_v55  ;;  %v1101_v37 = vld [vmem:[#allocation8 + $0xb08] sm:$0xff] }
 0x1eb   : > { %4151 = vmatprep.subr.bf16.mxu1 %v6129_v5  ;;  %v1125_v5 = vld [vmem:[#allocation8 + $0xbc8] sm:$0xff] }
 0x1ec   : > { %4111 = vmatpush1.bf16.msra.mxu0 %v6000_v18  ;;  %v1257_v18 = vld [vmem:[#allocation8 + $0xfe8] sm:$0xff] }
 0x1ed   : > { %4152 = vmatpush1.bf16.msra.mxu1 %v6128_v7  ;;  %4112 = vmatprep.subr.bf16.mxu0 %v5993_v8  ;;  %v5952_v7 = vcombine.low %v1005_v46, %v1009_v60  ;;  %v6080_v8 = vcombine.low %v1133_v62, %v1137_v63  ;;  %v6201_v13 = vcombine.high %v1253_v6, %v1257_v18  ;;  %v1105_v38 = vld [vmem:[#allocation8 + $0xb28] sm:$0xff] }
 0x1ee   : > { %4153 = vmatprep.subr.bf16.mxu1 %v6121_v10  ;;  %v6073_v10 = vcombine.high %v1125_v5, %v1129_v23  ;;  %v1229_v39 = vld [vmem:[#allocation8 + $0xf08] sm:$0xff] }
 0x1ef   : > { %v1093_v52 = vld [vmem:[#allocation8 + $0xac8] sm:$0xff] }
 0x1f0   : > { %4113 = vmatpush1.bf16.msra.mxu0 %v5992_v21  ;;  %v1249_v21 = vld [vmem:[#allocation8 + $0xfa8] sm:$0xff] }
 0x1f1   : > { %4154 = vmatpush1.bf16.msra.mxu1 %v6120_v22  ;;  %4114 = vmatprep.subr.bf16.mxu0 %v5985_v24  ;;  %v6072_v22 = vcombine.low %v1125_v5, %v1129_v23  ;;  %v6200_v24 = vcombine.low %v1253_v6, %v1257_v18  ;;  %v6193_v26 = vcombine.high %v1245_v20, %v1249_v21  ;;  %v1097_v53 = vld [vmem:[#allocation8 + $0xae8] sm:$0xff] }
 0x1f2   : > { %4155 = vmatprep.subr.bf16.mxu1 %v6113_v25  ;;  %v6065_v25 = vcombine.high %v1117_v14, %v1121_v19  ;;  %v1221_v55 = vld [vmem:[#allocation8 + $0xec8] sm:$0xff] }
 0x1f3   : > { %v1085_v60 = vld [vmem:[#allocation8 + $0xa88] sm:$0xff] }
 0x1f4   : > { %4115 = vmatpush1.bf16.msra.mxu0 %v5984_v32  ;;  %v1241_v32 = vld [vmem:[#allocation8 + $0xf68] sm:$0xff] }
 0x1f5   : > { %4156 = vmatpush1.bf16.msra.mxu1 %v6112_v33  ;;  %4116 = vmatprep.subr.bf16.mxu0 %v5977_v34  ;;  %v6064_v33 = vcombine.low %v1117_v14, %v1121_v19  ;;  %v6192_v34 = vcombine.low %v1245_v20, %v1249_v21  ;;  %v6185_v36 = vcombine.high %v1237_v30, %v1241_v32  ;;  %v1089_v62 = vld [vmem:[#allocation8 + $0xaa8] sm:$0xff] }
 0x1f6   : > { %4157 = vmatprep.subr.bf16.mxu1 %v6105_v35  ;;  %v6057_v35 = vcombine.high %v1109_v27, %v1113_v28  ;;  %v1213_v63 = vld [vmem:[#allocation8 + $0xe88] sm:$0xff] }
 0x1f7   : > { %v1077_v23 = vld [vmem:[#allocation8 + $0xa48] sm:$0xff] }
 0x1f8   : > { %4117 = vmatpush1.bf16.msra.mxu0 %v5976_v42  ;;  %v1233_v42 = vld [vmem:[#allocation8 + $0xf28] sm:$0xff] }
 0x1f9   : > { %4158 = vmatpush1.bf16.msra.mxu1 %v6104_v43  ;;  %4118 = vmatprep.subr.bf16.mxu0 %v5969_v50  ;;  %v6056_v43 = vcombine.low %v1109_v27, %v1113_v28  ;;  %v6184_v50 = vcombine.low %v1237_v30, %v1241_v32  ;;  %v6177_v41 = vcombine.high %v1229_v39, %v1233_v42  ;;  %v1081_v6 = vld [vmem:[#allocation8 + $0xa68] sm:$0xff]  ;;  %v806_v28 = vld [vmem:[#allocation8 + $0x1d0] sm:$0xff] }
 0x1fa   : > { %4159 = vmatprep.subr.bf16.mxu1 %v6097_v40  ;;  %v6049_v40 = vcombine.high %v1101_v37, %v1105_v38  ;;  %v1205_v18 = vld [vmem:[#allocation8 + $0xe48] sm:$0xff]  ;;  %v810_v30 = vld [vmem:[#allocation8 + $0x1f0] sm:$0xff] }
 0x1fb   : > { %v1069_v19 = vld [vmem:[#allocation8 + $0xa08] sm:$0xff]  ;;  %v934_v32 = vld [vmem:[#allocation8 + $0x5d0] sm:$0xff] }
 0x1fc   : > { %4119 = vmatpush1.bf16.msra.mxu0 %v5968_v56  ;;  %v1225_v56 = vld [vmem:[#allocation8 + $0xee8] sm:$0xff] }
 0x1fd   : > { %4160 = vmatpush1.bf16.msra.mxu1 %v6096_v57  ;;  %4120 = vmatprep.subr.bf16.mxu0 %v5961_v58  ;;  %v6048_v57 = vcombine.low %v1101_v37, %v1105_v38  ;;  %v6176_v58 = vcombine.low %v1229_v39, %v1233_v42  ;;  %v6169_v46 = vcombine.high %v1221_v55, %v1225_v56  ;;  %v1073_v20 = vld [vmem:[#allocation8 + $0xa28] sm:$0xff]  ;;  %v7260_v37 = vld [vmem:[#allocation10] sm:$0xff]  ;;  %v798_v39 = vld [vmem:[#allocation8 + $0x190] sm:$0xff] }
 0x1fe   : > { %4161 = vmatprep.subr.bf16.mxu1 %v6089_v59  ;;  %v6041_v59 = vcombine.high %v1093_v52, %v1097_v53  ;;  %v1197_v21 = vld [vmem:[#allocation8 + $0xe08] sm:$0xff]  ;;  %v802_v42 = vld [vmem:[#allocation8 + $0x1b0] sm:$0xff] }
 0x200   : > { %4121 = vmatpush1.bf16.msra.mxu0 %v5960_v0  ;;  %v1217_v0 = vld [vmem:[#allocation8 + $0xea8] sm:$0xff] }
 0x201   : > { %4162 = vmatpush1.bf16.msra.mxu1 %v6088_v1  ;;  %4122 = vmatprep.subr.bf16.mxu0 %v5953_v3  ;;  %v6040_v1 = vcombine.low %v1093_v52, %v1097_v53  ;;  %v6168_v3 = vcombine.low %v1221_v55, %v1225_v56  ;;  %v6161_v5 = vcombine.high %v1213_v63, %v1217_v0  ;;  %v790_v56 = vld [vmem:[#allocation8 + $0x150] sm:$0xff] }
 0x202   : > { %4163 = vmatprep.subr.bf16.mxu1 %v6081_v4  ;;  %v6033_v4 = vcombine.high %v1085_v60, %v1089_v62  ;;  %v1269_v53 = vrot.slane %v7260_v37, %v7195_v48  ;;  %v5747_v55 = vcombine.high %v798_v39, %v802_v42 }
 0x204   : > { %4123 = vmatpush1.bf16.msra.mxu0 %v5952_v7  ;;  %v1209_v7 = vld [vmem:[#allocation8 + $0xe68] sm:$0xff] }
 0x205   : > { %4164 = vmatpush1.bf16.msra.mxu1 %v6080_v8  ;;  %4124 = vmatprep.subr.bf16.mxu0 %v6073_v10  ;;  %v6032_v8 = vcombine.low %v1085_v60, %v1089_v62  ;;  %v6160_v10 = vcombine.low %v1213_v63, %v1217_v0  ;;  %v6153_v14 = vcombine.high %v1205_v18, %v1209_v7  ;;  %v922_v60 = vld [vmem:[#allocation8 + $0x570] sm:$0xff] }
 0x206   : > { %4165 = vmatprep.subr.bf16.mxu1 %v6201_v13  ;;  %v6025_v13 = vcombine.high %v1077_v23, %v1081_v6  ;;  %v5746_v0 = vcombine.low %v798_v39, %v802_v42  ;;  %v766_v39 = vld [vmem:[#allocation8 + $0x90] sm:$0xff] }
 0x207   : > { %v770_v42 = vld [vmem:[#allocation8 + $0xb0] sm:$0xff] }
 0x208   : > { %4125 = vmatpush2.bf16.msra.mxu0 %v6072_v22  ;;  %v1201_v22 = vld [vmem:[#allocation8 + $0xe28] sm:$0xff] }
 0x209   : > { %4166 = vmatpush2.bf16.msra.mxu1 %v6200_v24  ;;  %4126 = vmatprep.subr.bf16.mxu0 %v6065_v25  ;;  %v6024_v24 = vcombine.low %v1077_v23, %v1081_v6  ;;  %v6152_v25 = vcombine.low %v1205_v18, %v1209_v7  ;;  %v6145_v27 = vcombine.high %v1197_v21, %v1201_v22  ;;  %v782_v7 = vld [vmem:[#allocation8 + $0x110] sm:$0xff] }
 0x20a   : > { %4167 = vmatprep.subr.bf16.mxu1 %v6193_v26  ;;  %v6017_v26 = vcombine.high %v1069_v19, %v1073_v20 }
 0x20c   : > { %4127 = vmatpush2.bf16.msra.mxu0 %v6064_v33  ;;  %v938_v33 = vld [vmem:[#allocation8 + $0x5f0] sm:$0xff] }
 0x20d   : > { %4168 = vmatpush2.bf16.msra.mxu1 %v6192_v34  ;;  %4128 = vmatprep.subr.bf16.mxu0 %v6057_v35  ;;  %v6016_v34 = vcombine.low %v1069_v19, %v1073_v20  ;;  %v6144_v35 = vcombine.low %v1197_v21, %v1201_v22  ;;  %v5883_v38 = vcombine.high %v934_v32, %v938_v33 }
 0x20e   : > { %4169 = vmatprep.subr.bf16.mxu1 %v6185_v36  ;;  %v5755_v36 = vcombine.high %v806_v28, %v810_v30  ;;  %v5882_v52 = vcombine.low %v934_v32, %v938_v33  ;;  %v902_v32 = vld [vmem:[#allocation8 + $0x4d0] sm:$0xff] }
 0x20f   : > { %v906_v33 = vld [vmem:[#allocation8 + $0x4f0] sm:$0xff] }
 0x210   : > { %4129 = vmatpush2.bf16.msra.mxu0 %v6056_v43  ;;  %v5754_v43 = vcombine.low %v806_v28, %v810_v30  ;;  %v774_v28 = vld [vmem:[#allocation8 + $0xd0] sm:$0xff] }
 0x211   : > { %4170 = vmatpush2.bf16.msra.mxu1 %v6184_v50  ;;  %4130 = vmatprep.subr.bf16.mxu0 %v6049_v40  ;;  %v1265_v50 = vrot.slane %v7260_v37, %v7189_v45  ;;  %v926_v40 = vld [vmem:[#allocation8 + $0x590] sm:$0xff] }
 0x212   : > { %4171 = vmatprep.subr.bf16.mxu1 %v6177_v41  ;;  %v930_v41 = vld [vmem:[#allocation8 + $0x5b0] sm:$0xff] }
 0x213   : > { %v778_v30 = vld [vmem:[#allocation8 + $0xf0] sm:$0xff] }
 0x214   : > { %4131 = vmatpush2.bf16.msra.mxu0 %v6048_v57  ;;  %v794_v57 = vld [vmem:[#allocation8 + $0x170] sm:$0xff] }
 0x215   : > { %4172 = vmatpush2.bf16.msra.mxu1 %v6176_v58  ;;  %4132 = vmatprep.subr.bf16.mxu0 %v6041_v59  ;;  %v5875_v59 = vcombine.high %v926_v40, %v930_v41  ;;  %v5738_v21 = vcombine.low %v790_v56, %v794_v57 }
 0x216   : > { %4173 = vmatprep.subr.bf16.mxu1 %v6169_v46  ;;  %v918_v46 = vld [vmem:[#allocation8 + $0x550] sm:$0xff] }
 0x217   : > { %v5867_v18 = vcombine.high %v918_v46, %v922_v60 }
 0x218   : > { %4133 = vmatpush2.bf16.msra.mxu0 %v6040_v1 }
 0x219   : > { %4174 = vmatpush2.bf16.msra.mxu1 %v6168_v3  ;;  %4134 = vmatprep.subr.bf16.mxu0 %v6033_v4  ;;  %v5874_v3 = vcombine.low %v926_v40, %v930_v41  ;;  %v5739_v4 = vcombine.high %v790_v56, %v794_v57  ;;  %v5722_v40 = vcombine.low %v774_v28, %v778_v30  ;;  %v762_v56 = vld [vmem:[#allocation8 + $0x70] sm:$0xff] }
 0x21a   : > { %4175 = vmatprep.subr.bf16.mxu1 %v6161_v5  ;;  %v5850_v41 = vcombine.low %v902_v32, %v906_v33  ;;  %v886_v57 = vld [vmem:[#allocation8 + $0x450] sm:$0xff] }
 0x21c   : > { %4135 = vmatpush2.bf16.msra.mxu0 %v6032_v8  ;;  %v786_v8 = vld [vmem:[#allocation8 + $0x130] sm:$0xff] }
 0x21d   : > { %4176 = vmatpush2.bf16.msra.mxu1 %v6160_v10  ;;  %4136 = vmatprep.subr.bf16.mxu0 %v6025_v13  ;;  %v910_v13 = vld [vmem:[#allocation8 + $0x510] sm:$0xff] }
 0x21e   : > { %4177 = vmatprep.subr.bf16.mxu1 %v6153_v14  ;;  %v914_v14 = vld [vmem:[#allocation8 + $0x530] sm:$0xff] }
 0x220   : > { %4137 = vmatpush2.bf16.msra.mxu0 %v6024_v24  ;;  %v5866_v24 = vcombine.low %v918_v46, %v922_v60 }
 0x221   : > { %4178 = vmatpush2.bf16.msra.mxu1 %v6152_v25  ;;  %4138 = vmatprep.subr.bf16.mxu0 %v6017_v26  ;;  %v5731_v25 = vcombine.high %v782_v7, %v786_v8 }
 0x222   : > { %4179 = vmatprep.subr.bf16.mxu1 %v6145_v27  ;;  %v5859_v27 = vcombine.high %v910_v13, %v914_v14 }
 0x224   : > { %4139 = vmatpush2.bf16.msra.mxu0 %v6016_v34  ;;  %v5730_v34 = vcombine.low %v782_v7, %v786_v8  ;;  %v870_v7 = vld [vmem:[#allocation8 + $0x3d0] sm:$0xff] }
 0x225   : > { %4180 = vmatpush2.bf16.msra.mxu1 %v6144_v35  ;;  %4190 = vmatprep.subr.bf16.mxu0 %v5755_v36  ;;  %v5858_v35 = vcombine.low %v910_v13, %v914_v14  ;;  %v5723_v36 = vcombine.high %v774_v28, %v778_v30  ;;  %v874_v8 = vld [vmem:[#allocation8 + $0x3f0] sm:$0xff] }
 0x226   : > { %4231 = vmatprep.subr.bf16.mxu1 %v5883_v38  ;;  %v5851_v38 = vcombine.high %v902_v32, %v906_v33  ;;  %v1002_v13 = vld [vmem:[#allocation8 + $0x7f0] sm:$0xff]  ;;  %v5818_v28 = vcombine.low %v870_v7, %v874_v8 }
 0x227   : > { %4141 = vmatmul.mubr.bf16.vlgmr.msra.gmra.mxu0 %v7250_v17  ;;  %v3896_v58 = vpop.f32.mrf.mxu0  ;;  %v3937_v63 = vpop.f32.mrf.mxu1 }
 0x228   : > { %4182 = vmatmul.mubr.bf16.vlgmr.msra.gmra.mxu1 %v7248_v9  ;;  %v3897_v62 = vadd.f32 %v3896_v58, %v1265_v50  ;;  %4191 = vmatpush1.bf16.msra.mxu0 %v5754_v43  ;;  %v894_v43 = vld [vmem:[#allocation8 + $0x490] sm:$0xff] }
 0x229   : > { %4222 = vmatprep.mubr.bf16.mxu0 %v7212_v12  ;;  %4232 = vmatpush1.bf16.msra.mxu1 %v5882_v52  ;;  %v3898_v1 = vpop.f32.mrf.mxu0  ;;  %v3939_v6 = vpop.f32.mrf.mxu1  ;;  %v898_v50 = vld [vmem:[#allocation8 + $0x4b0] sm:$0xff]  ;;  %v5715_v52 = vcombine.high %v766_v39, %v770_v42 }
 0x22a   : > { %v7269_v5 = vadd.f32 %v3937_v63, %v3897_v62  ;;  %4263 = vmatprep.mubr.bf16.mxu1 %v7219_v16  ;;  %v3899_v23 = vadd.f32 %v3898_v1, %v1269_v53  ;;  %4192 = vmatprep.subr.bf16.mxu0 %v5747_v55  ;;  %v5843_v53 = vcombine.high %v894_v43, %v898_v50  ;;  %v758_v55 = vld [vmem:[#allocation8 + $0x50] sm:$0xff] }
 0x22b   : > { %4233 = vmatprep.subr.bf16.mxu1 %v5875_v59  ;;  %v3900_v10 = vpop.f32.mrf.mxu0  ;;  %v3941_v20 = vpop.f32.mrf.mxu1  ;;  %v890_v58 = vld [vmem:[#allocation8 + $0x470] sm:$0xff]  ;;  %v5714_v59 = vcombine.low %v766_v39, %v770_v42  ;;  %v5842_v46 = vcombine.low %v894_v43, %v898_v50  ;;  %v5707_v60 = vcombine.high %v758_v55, %v762_v56 }
 0x22c   : > { %v7272_v19 = vadd.f32 %v3939_v6, %v3899_v23  ;;  %4193 = vmatpush1.bf16.msra.mxu0 %v5746_v0  ;;  %v5835_v62 = vcombine.high %v886_v57, %v890_v58  ;;  %v750_v63 = vld [vmem:[#allocation8 + $0x10] sm:$0xff]  ;;  %v5834_v23 = vcombine.low %v886_v57, %v890_v58 }
 0x22d   : > { %4234 = vmatpush1.bf16.msra.mxu1 %v5874_v3  ;;  %v3901_v22 = vpop.f32.mrf.mxu0  ;;  %4194 = vmatprep.subr.bf16.mxu0 %v5739_v4  ;;  %v3942_v26 = vpop.f32.mrf.mxu1  ;;  %v754_v0 = vld [vmem:[#allocation8 + $0x30] sm:$0xff]  ;;  %v5706_v4 = vcombine.low %v758_v55, %v762_v56 }
 0x22e   : > { %4235 = vmatprep.subr.bf16.mxu1 %v5867_v18  ;;  %v878_v1 = vld [vmem:[#allocation8 + $0x410] sm:$0xff]  ;;  %v5699_v6 = vcombine.high %v750_v63, %v754_v0  ;;  %v5698_v14 = vcombine.low %v750_v63, %v754_v0 }
 0x22f   : > { %v882_v3 = vld [vmem:[#allocation8 + $0x430] sm:$0xff] }
 0x230   : > { %4195 = vmatpush1.bf16.msra.mxu0 %v5738_v21  ;;  %v5827_v18 = vcombine.high %v878_v1, %v882_v3  ;;  %v998_v10 = vld [vmem:[#allocation8 + $0x7d0] sm:$0xff]  ;;  %v5826_v20 = vcombine.low %v878_v1, %v882_v3  ;;  %v5819_v21 = vcombine.high %v870_v7, %v874_v8 }
 0x231   : > { %4236 = vmatpush1.bf16.msra.mxu1 %v5866_v24  ;;  %4196 = vmatprep.subr.bf16.mxu0 %v5731_v25  ;;  %v5947_v22 = vcombine.high %v998_v10, %v1002_v13  ;;  %v862_v24 = vld [vmem:[#allocation8 + $0x390] sm:$0xff]  ;;  %v5946_v30 = vcombine.low %v998_v10, %v1002_v13 }
 0x232   : > { %4237 = vmatprep.subr.bf16.mxu1 %v5859_v27  ;;  %v866_v25 = vld [vmem:[#allocation8 + $0x3b0] sm:$0xff] }
 0x233   : > { %v990_v26 = vld [vmem:[#allocation8 + $0x790] sm:$0xff]  ;;  %v5811_v32 = vcombine.high %v862_v24, %v866_v25  ;;  %v5810_v39 = vcombine.low %v862_v24, %v866_v25 }
 0x234   : > { %4197 = vmatpush1.bf16.msra.mxu0 %v5730_v34  ;;  %v994_v27 = vld [vmem:[#allocation8 + $0x7b0] sm:$0xff] }
 0x235   : > { %4238 = vmatpush1.bf16.msra.mxu1 %v5858_v35  ;;  %4198 = vmatprep.subr.bf16.mxu0 %v5723_v36  ;;  %v5939_v33 = vcombine.high %v990_v26, %v994_v27  ;;  %v854_v34 = vld [vmem:[#allocation8 + $0x350] sm:$0xff]  ;;  %v5938_v42 = vcombine.low %v990_v26, %v994_v27 }
 0x236   : > { %4239 = vmatprep.subr.bf16.mxu1 %v5851_v38  ;;  %v858_v35 = vld [vmem:[#allocation8 + $0x370] sm:$0xff] }
 0x237   : > { %v982_v36 = vld [vmem:[#allocation8 + $0x750] sm:$0xff]  ;;  %v5803_v43 = vcombine.high %v854_v34, %v858_v35  ;;  %v5802_v55 = vcombine.low %v854_v34, %v858_v35 }
 0x238   : > { %4199 = vmatpush1.bf16.msra.mxu0 %v5722_v40  ;;  %v986_v38 = vld [vmem:[#allocation8 + $0x770] sm:$0xff] }
 0x239   : > { %4240 = vmatpush1.bf16.msra.mxu1 %v5850_v41  ;;  %4200 = vmatprep.subr.bf16.mxu0 %v5715_v52  ;;  %v5931_v50 = vcombine.high %v982_v36, %v986_v38  ;;  %v846_v40 = vld [vmem:[#allocation8 + $0x310] sm:$0xff]  ;;  %v5930_v56 = vcombine.low %v982_v36, %v986_v38 }
 0x23a   : > { %4241 = vmatprep.subr.bf16.mxu1 %v5843_v53  ;;  %v850_v41 = vld [vmem:[#allocation8 + $0x330] sm:$0xff] }
 0x23b   : > { %v974_v52 = vld [vmem:[#allocation8 + $0x710] sm:$0xff]  ;;  %v5795_v57 = vcombine.high %v846_v40, %v850_v41  ;;  %v5794_v63 = vcombine.low %v846_v40, %v850_v41 }
 0x23c   : > { %4201 = vmatpush1.bf16.msra.mxu0 %v5714_v59  ;;  %v978_v53 = vld [vmem:[#allocation8 + $0x730] sm:$0xff] }
 0x23d   : > { %4242 = vmatpush1.bf16.msra.mxu1 %v5842_v46  ;;  %4202 = vmatprep.subr.bf16.mxu0 %v5707_v60  ;;  %v5923_v58 = vcombine.high %v974_v52, %v978_v53  ;;  %v838_v59 = vld [vmem:[#allocation8 + $0x2d0] sm:$0xff]  ;;  %v5922_v0 = vcombine.low %v974_v52, %v978_v53 }
 0x23e   : > { %4243 = vmatprep.subr.bf16.mxu1 %v5835_v62  ;;  %v842_v46 = vld [vmem:[#allocation8 + $0x2f0] sm:$0xff] }
 0x23f   : > { %v966_v60 = vld [vmem:[#allocation8 + $0x6d0] sm:$0xff]  ;;  %v5787_v1 = vcombine.high %v838_v59, %v842_v46  ;;  %v5786_v7 = vcombine.low %v838_v59, %v842_v46 }
 0x240   : > { %4203 = vmatpush1.bf16.msra.mxu0 %v5706_v4  ;;  %v970_v62 = vld [vmem:[#allocation8 + $0x6f0] sm:$0xff] }
 0x241   : > { %4244 = vmatpush1.bf16.msra.mxu1 %v5834_v23  ;;  %4204 = vmatprep.subr.bf16.mxu0 %v5699_v6  ;;  %v5915_v3 = vcombine.high %v966_v60, %v970_v62  ;;  %v830_v4 = vld [vmem:[#allocation8 + $0x290] sm:$0xff]  ;;  %v5914_v8 = vcombine.low %v966_v60, %v970_v62 }
 0x242   : > { %4245 = vmatprep.subr.bf16.mxu1 %v5827_v18  ;;  %v834_v23 = vld [vmem:[#allocation8 + $0x2b0] sm:$0xff] }
 0x243   : > { %v958_v6 = vld [vmem:[#allocation8 + $0x690] sm:$0xff]  ;;  %v5779_v10 = vcombine.high %v830_v4, %v834_v23  ;;  %v5778_v24 = vcombine.low %v830_v4, %v834_v23 }
 0x244   : > { %4205 = vmatpush1.bf16.msra.mxu0 %v5698_v14  ;;  %v962_v18 = vld [vmem:[#allocation8 + $0x6b0] sm:$0xff] }
 0x245   : > { %4246 = vmatpush1.bf16.msra.mxu1 %v5826_v20  ;;  %4206 = vmatprep.subr.bf16.mxu0 %v5819_v21  ;;  %v5907_v13 = vcombine.high %v958_v6, %v962_v18  ;;  %v822_v14 = vld [vmem:[#allocation8 + $0x250] sm:$0xff]  ;;  %v5906_v25 = vcombine.low %v958_v6, %v962_v18 }
 0x246   : > { %4247 = vmatprep.subr.bf16.mxu1 %v5947_v22  ;;  %v826_v20 = vld [vmem:[#allocation8 + $0x270] sm:$0xff] }
 0x247   : > { %v950_v21 = vld [vmem:[#allocation8 + $0x650] sm:$0xff]  ;;  %v5771_v26 = vcombine.high %v822_v14, %v826_v20  ;;  %v5770_v34 = vcombine.low %v822_v14, %v826_v20 }
 0x248   : > { %4207 = vmatpush2.bf16.msra.mxu0 %v5818_v28  ;;  %v954_v22 = vld [vmem:[#allocation8 + $0x670] sm:$0xff] }
 0x249   : > { %4248 = vmatpush2.bf16.msra.mxu1 %v5946_v30  ;;  %4208 = vmatprep.subr.bf16.mxu0 %v5811_v32  ;;  %v5899_v27 = vcombine.high %v950_v21, %v954_v22  ;;  %v814_v28 = vld [vmem:[#allocation8 + $0x210] sm:$0xff]  ;;  %v5898_v35 = vcombine.low %v950_v21, %v954_v22 }
 0x24a   : > { %4249 = vmatprep.subr.bf16.mxu1 %v5939_v33  ;;  %v818_v30 = vld [vmem:[#allocation8 + $0x230] sm:$0xff] }
 0x24b   : > { %v942_v32 = vld [vmem:[#allocation8 + $0x610] sm:$0xff]  ;;  %v5763_v36 = vcombine.high %v814_v28, %v818_v30  ;;  %v5762_v40 = vcombine.low %v814_v28, %v818_v30 }
 0x24c   : > { %4209 = vmatpush2.bf16.msra.mxu0 %v5810_v39  ;;  %v946_v33 = vld [vmem:[#allocation8 + $0x630] sm:$0xff] }
 0x24d   : > { %4250 = vmatpush2.bf16.msra.mxu1 %v5938_v42  ;;  %4210 = vmatprep.subr.bf16.mxu0 %v5803_v43  ;;  %v5891_v38 = vcombine.high %v942_v32, %v946_v33  ;;  %v1062_v39 = vld [vmem:[#allocation8 + $0x9d0] sm:$0xff]  ;;  %v5890_v41 = vcombine.low %v942_v32, %v946_v33 }
 0x24e   : > { %4251 = vmatprep.subr.bf16.mxu1 %v5931_v50  ;;  %v1066_v42 = vld [vmem:[#allocation8 + $0x9f0] sm:$0xff] }
 0x24f   : > { %v1190_v43 = vld [vmem:[#allocation8 + $0xdd0] sm:$0xff]  ;;  %v6011_v52 = vcombine.high %v1062_v39, %v1066_v42 }
 0x250   : > { %4211 = vmatpush2.bf16.msra.mxu0 %v5802_v55  ;;  %v1194_v50 = vld [vmem:[#allocation8 + $0xdf0] sm:$0xff] }
 0x251   : > { %4252 = vmatpush2.bf16.msra.mxu1 %v5930_v56  ;;  %4212 = vmatprep.subr.bf16.mxu0 %v5795_v57  ;;  %v6139_v53 = vcombine.high %v1190_v43, %v1194_v50  ;;  %v1054_v55 = vld [vmem:[#allocation8 + $0x990] sm:$0xff]  ;;  %v6010_v57 = vcombine.low %v1062_v39, %v1066_v42  ;;  %v6138_v46 = vcombine.low %v1190_v43, %v1194_v50 }
 0x252   : > { %4253 = vmatprep.subr.bf16.mxu1 %v5923_v58  ;;  %v1058_v56 = vld [vmem:[#allocation8 + $0x9b0] sm:$0xff] }
 0x253   : > { %v1182_v58 = vld [vmem:[#allocation8 + $0xd90] sm:$0xff]  ;;  %v6003_v60 = vcombine.high %v1054_v55, %v1058_v56  ;;  %v6002_v18 = vcombine.low %v1054_v55, %v1058_v56 }
 0x254   : > { %4213 = vmatpush2.bf16.msra.mxu0 %v5794_v63  ;;  %v1186_v59 = vld [vmem:[#allocation8 + $0xdb0] sm:$0xff] }
 0x255   : > { %4254 = vmatpush2.bf16.msra.mxu1 %v5922_v0  ;;  %4214 = vmatprep.subr.bf16.mxu0 %v5787_v1  ;;  %v1046_v62 = vld [vmem:[#allocation8 + $0x950] sm:$0xff]  ;;  %v6131_v1 = vcombine.high %v1182_v58, %v1186_v59 }
 0x256   : > { %4255 = vmatprep.subr.bf16.mxu1 %v5915_v3  ;;  %v1050_v63 = vld [vmem:[#allocation8 + $0x970] sm:$0xff] }
 0x257   : > { %v1174_v3 = vld [vmem:[#allocation8 + $0xd50] sm:$0xff]  ;;  %v5994_v30 = vcombine.low %v1046_v62, %v1050_v63 }
 0x258   : > { %4215 = vmatpush2.bf16.msra.mxu0 %v5786_v7  ;;  %v1178_v4 = vld [vmem:[#allocation8 + $0xd70] sm:$0xff] }
 0x259   : > { %4256 = vmatpush2.bf16.msra.mxu1 %v5914_v8  ;;  %4216 = vmatprep.subr.bf16.mxu0 %v5779_v10  ;;  %v6130_v8 = vcombine.low %v1182_v58, %v1186_v59  ;;  %v5995_v10 = vcombine.high %v1046_v62, %v1050_v63  ;;  %v1038_v21 = vld [vmem:[#allocation8 + $0x910] sm:$0xff]  ;;  %v6122_v33 = vcombine.low %v1174_v3, %v1178_v4 }
 0x25a   : > { %4257 = vmatprep.subr.bf16.mxu1 %v5907_v13  ;;  %v1042_v22 = vld [vmem:[#allocation8 + $0x930] sm:$0xff] }
 0x25b   : > { %v1158_v39 = vld [vmem:[#allocation8 + $0xcd0] sm:$0xff]  ;;  %v5986_v43 = vcombine.low %v1038_v21, %v1042_v22 }
 0x25c   : > { %4217 = vmatpush2.bf16.msra.mxu0 %v5778_v24  ;;  %v1162_v42 = vld [vmem:[#allocation8 + $0xcf0] sm:$0xff] }
 0x25d   : > { %4258 = vmatpush2.bf16.msra.mxu1 %v5906_v25  ;;  %4218 = vmatprep.subr.bf16.mxu0 %v5771_v26  ;;  %v1166_v25 = vld [vmem:[#allocation8 + $0xd10] sm:$0xff]  ;;  %v6106_v58 = vcombine.low %v1158_v39, %v1162_v42 }
 0x25e   : > { %4259 = vmatprep.subr.bf16.mxu1 %v5899_v27  ;;  %v1170_v26 = vld [vmem:[#allocation8 + $0xd30] sm:$0xff] }
 0x25f   : > { %v6114_v50 = vcombine.low %v1166_v25, %v1170_v26  ;;  %v1150_v55 = vld [vmem:[#allocation8 + $0xc90] sm:$0xff] }
 0x260   : > { %4219 = vmatpush2.bf16.msra.mxu0 %v5770_v34  ;;  %v5987_v34 = vcombine.high %v1038_v21, %v1042_v22  ;;  %v1154_v56 = vld [vmem:[#allocation8 + $0xcb0] sm:$0xff] }
 0x261   : > { %4260 = vmatpush2.bf16.msra.mxu1 %v5898_v35  ;;  %4220 = vmatprep.subr.bf16.mxu0 %v5763_v36  ;;  %v6115_v35 = vcombine.high %v1166_v25, %v1170_v26  ;;  %v1030_v36 = vld [vmem:[#allocation8 + $0x8d0] sm:$0xff] }
 0x262   : > { %4261 = vmatprep.subr.bf16.mxu1 %v5891_v38  ;;  %v1034_v38 = vld [vmem:[#allocation8 + $0x8f0] sm:$0xff] }
 0x263   : > { %v1018_v62 = vld [vmem:[#allocation8 + $0x870] sm:$0xff] }
 0x264   : > { %4221 = vmatpush2.bf16.msra.mxu0 %v5762_v40  ;;  %v5979_v40 = vcombine.high %v1030_v36, %v1034_v38  ;;  %v1142_v63 = vld [vmem:[#allocation8 + $0xc50] sm:$0xff] }
 0x265   : > { %4262 = vmatpush2.bf16.msra.mxu1 %v5890_v41  ;;  %4272 = vmatprep.subr.bf16.mxu0 %v6011_v52  ;;  %v6107_v41 = vcombine.high %v1158_v39, %v1162_v42  ;;  %v1022_v52 = vld [vmem:[#allocation8 + $0x890] sm:$0xff] }
 0x266   : > { %4313 = vmatprep.subr.bf16.mxu1 %v6139_v53  ;;  %v1026_v53 = vld [vmem:[#allocation8 + $0x8b0] sm:$0xff] }
 0x267   : > { %v3978_v0 = vpop.f32.mrf.mxu0  ;;  %4223 = vmatmul.mubr.bf16.vlgmr.msra.gmra.mxu0 %v7217_v15  ;;  %v4019_v6 = vpop.f32.mrf.mxu1  ;;  %v5971_v59 = vcombine.high %v1022_v52, %v1026_v53  ;;  %v1126_v21 = vld [vmem:[#allocation8 + $0xbd0] sm:$0xff] }
 0x268   : > { %v3979_v23 = vadd.f32 %v3978_v0, %v7269_v5  ;;  %4264 = vmatmul.mubr.bf16.vlgmr.msra.gmra.mxu1 %v7210_v11  ;;  %4273 = vmatpush1.bf16.msra.mxu0 %v6010_v57  ;;  %v6123_v5 = vcombine.high %v1174_v3, %v1178_v4  ;;  %v5978_v57 = vcombine.low %v1030_v36, %v1034_v38  ;;  %v1146_v0 = vld [vmem:[#allocation8 + $0xc70] sm:$0xff] }
 0x269   : > { %4304 = vmatprep.mubr.bf16.mxu0 %v7232_v51  ;;  %4314 = vmatpush1.bf16.msra.mxu1 %v6138_v46  ;;  %v3980_v7 = vpop.f32.mrf.mxu0  ;;  %v4021_v20 = vpop.f32.mrf.mxu1  ;;  %v6099_v46 = vcombine.high %v1150_v55, %v1154_v56  ;;  %v6098_v3 = vcombine.low %v1150_v55, %v1154_v56  ;;  %v1130_v22 = vld [vmem:[#allocation8 + $0xbf0] sm:$0xff] }
 0x26a   : > { %v7278_v13 = vadd.f32 %v4019_v6, %v3979_v23  ;;  %4345 = vmatprep.mubr.bf16.mxu1 %v7234_v54  ;;  %v3981_v14 = vadd.f32 %v3980_v7, %v7272_v19  ;;  %4274 = vmatprep.subr.bf16.mxu0 %v6003_v60  ;;  %v1014_v60 = vld [vmem:[#allocation8 + $0x850] sm:$0xff]  ;;  %v6091_v23 = vcombine.high %v1142_v63, %v1146_v0 }
 0x26b   : > { %v3982_v24 = vpop.f32.mrf.mxu0  ;;  %4315 = vmatprep.subr.bf16.mxu1 %v6131_v1  ;;  %v4023_v28 = vpop.f32.mrf.mxu1  ;;  %v5970_v1 = vcombine.low %v1022_v52, %v1026_v53  ;;  %v5963_v4 = vcombine.high %v1014_v60, %v1018_v62  ;;  %v1006_v6 = vld [vmem:[#allocation8 + $0x810] sm:$0xff]  ;;  %v6074_v36 = vcombine.low %v1126_v21, %v1130_v22 }
 0x26c   : > { %v7282_v27 = vadd.f32 %v4021_v20, %v3981_v14  ;;  %4275 = vmatpush1.bf16.msra.mxu0 %v6002_v18  ;;  %v1010_v18 = vld [vmem:[#allocation8 + $0x830] sm:$0xff]  ;;  %v6090_v14 = vcombine.low %v1142_v63, %v1146_v0 }
 0x26d   : > { %4316 = vmatpush1.bf16.msra.mxu1 %v6130_v8  ;;  %v3983_v32 = vpop.f32.mrf.mxu0  ;;  %4276 = vmatprep.subr.bf16.mxu0 %v5995_v10  ;;  %v4024_v19 = vpop.f32.mrf.mxu1  ;;  %v1134_v7 = vld [vmem:[#allocation8 + $0xc10] sm:$0xff]  ;;  %v5962_v10 = vcombine.low %v1014_v60, %v1018_v62  ;;  %v5955_v20 = vcombine.high %v1006_v6, %v1010_v18  ;;  %v5954_v26 = vcombine.low %v1006_v6, %v1010_v18 }
 0x26e   : > { %4317 = vmatprep.subr.bf16.mxu1 %v6123_v5  ;;  %v1138_v8 = vld [vmem:[#allocation8 + $0xc30] sm:$0xff] }
 0x26f   : > { %v6083_v5 = vcombine.high %v1134_v7, %v1138_v8  ;;  %v1254_v24 = vld [vmem:[#allocation8 + $0xfd0] sm:$0xff]  ;;  %v6082_v28 = vcombine.low %v1134_v7, %v1138_v8 }
 0x270   : > { %4277 = vmatpush1.bf16.msra.mxu0 %v5994_v30  ;;  %v1258_v25 = vld [vmem:[#allocation8 + $0xff0] sm:$0xff]  ;;  %v6075_v30 = vcombine.high %v1126_v21, %v1130_v22 }
 0x271   : > { %4318 = vmatpush1.bf16.msra.mxu1 %v6122_v33  ;;  %4278 = vmatprep.subr.bf16.mxu0 %v5987_v34  ;;  %v6203_v32 = vcombine.high %v1254_v24, %v1258_v25  ;;  %v1118_v33 = vld [vmem:[#allocation8 + $0xb90] sm:$0xff]  ;;  %v6202_v38 = vcombine.low %v1254_v24, %v1258_v25 }
 0x272   : > { %4319 = vmatprep.subr.bf16.mxu1 %v6115_v35  ;;  %v1122_v34 = vld [vmem:[#allocation8 + $0xbb0] sm:$0xff] }
 0x273   : > { %v1246_v19 = vld [vmem:[#allocation8 + $0xf90] sm:$0xff]  ;;  %v6067_v39 = vcombine.high %v1118_v33, %v1122_v34  ;;  %v6066_v52 = vcombine.low %v1118_v33, %v1122_v34 }
 0x274   : > { %4279 = vmatpush1.bf16.msra.mxu0 %v5986_v43  ;;  %v1250_v35 = vld [vmem:[#allocation8 + $0xfb0] sm:$0xff] }
 0x275   : > { %4320 = vmatpush1.bf16.msra.mxu1 %v6114_v50  ;;  %4280 = vmatprep.subr.bf16.mxu0 %v5979_v40  ;;  %v6195_v42 = vcombine.high %v1246_v19, %v1250_v35  ;;  %v1110_v43 = vld [vmem:[#allocation8 + $0xb50] sm:$0xff]  ;;  %v6194_v53 = vcombine.low %v1246_v19, %v1250_v35 }
 0x276   : > { %4321 = vmatprep.subr.bf16.mxu1 %v6107_v41  ;;  %v1114_v50 = vld [vmem:[#allocation8 + $0xb70] sm:$0xff] }
 0x277   : > { %v1238_v40 = vld [vmem:[#allocation8 + $0xf50] sm:$0xff]  ;;  %v6059_v55 = vcombine.high %v1110_v43, %v1114_v50  ;;  %v6058_v60 = vcombine.low %v1110_v43, %v1114_v50 }
 0x278   : > { %4281 = vmatpush1.bf16.msra.mxu0 %v5978_v57  ;;  %v1242_v41 = vld [vmem:[#allocation8 + $0xf70] sm:$0xff] }
 0x279   : > { %4322 = vmatpush1.bf16.msra.mxu1 %v6106_v58  ;;  %4282 = vmatprep.subr.bf16.mxu0 %v5971_v59  ;;  %v6187_v56 = vcombine.high %v1238_v40, %v1242_v41  ;;  %v1102_v57 = vld [vmem:[#allocation8 + $0xb10] sm:$0xff]  ;;  %v6186_v62 = vcombine.low %v1238_v40, %v1242_v41 }
 0x27a   : > { %4323 = vmatprep.subr.bf16.mxu1 %v6099_v46  ;;  %v1106_v58 = vld [vmem:[#allocation8 + $0xb30] sm:$0xff] }
 0x27b   : > { %v1230_v59 = vld [vmem:[#allocation8 + $0xf10] sm:$0xff]  ;;  %v6051_v63 = vcombine.high %v1102_v57, %v1106_v58  ;;  %v6050_v6 = vcombine.low %v1102_v57, %v1106_v58 }
 0x27c   : > { %4283 = vmatpush1.bf16.msra.mxu0 %v5970_v1  ;;  %v1234_v46 = vld [vmem:[#allocation8 + $0xf30] sm:$0xff] }
 0x27d   : > { %4324 = vmatpush1.bf16.msra.mxu1 %v6098_v3  ;;  %4284 = vmatprep.subr.bf16.mxu0 %v5963_v4  ;;  %v6179_v0 = vcombine.high %v1230_v59, %v1234_v46  ;;  %v1094_v1 = vld [vmem:[#allocation8 + $0xad0] sm:$0xff]  ;;  %v6178_v18 = vcombine.low %v1230_v59, %v1234_v46 }
 0x27e   : > { %4325 = vmatprep.subr.bf16.mxu1 %v6091_v23  ;;  %v1098_v3 = vld [vmem:[#allocation8 + $0xaf0] sm:$0xff] }
 0x27f   : > { %v1222_v4 = vld [vmem:[#allocation8 + $0xed0] sm:$0xff]  ;;  %v6043_v7 = vcombine.high %v1094_v1, %v1098_v3  ;;  %v6042_v21 = vcombine.low %v1094_v1, %v1098_v3  ;;  %v927_v1 = vld [vmem:[#allocation8 + $0x598] sm:$0xff] }
 0x280   : > { %4285 = vmatpush1.bf16.msra.mxu0 %v5962_v10  ;;  %v1226_v23 = vld [vmem:[#allocation8 + $0xef0] sm:$0xff]  ;;  %v931_v3 = vld [vmem:[#allocation8 + $0x5b8] sm:$0xff] }
 0x281   : > { %4326 = vmatpush1.bf16.msra.mxu1 %v6090_v14  ;;  %4286 = vmatprep.subr.bf16.mxu0 %v5955_v20  ;;  %v6171_v8 = vcombine.high %v1222_v4, %v1226_v23  ;;  %v1086_v10 = vld [vmem:[#allocation8 + $0xa90] sm:$0xff]  ;;  %v6170_v22 = vcombine.low %v1222_v4, %v1226_v23  ;;  %v1277_v23 = vrot.slane %v7260_v37, %v458_v49 }
 0x282   : > { %4327 = vmatprep.subr.bf16.mxu1 %v6083_v5  ;;  %v1090_v14 = vld [vmem:[#allocation8 + $0xab0] sm:$0xff]  ;;  %v5876_v49 = vcombine.low %v927_v1, %v931_v3 }
 0x283   : > { %v1214_v20 = vld [vmem:[#allocation8 + $0xe90] sm:$0xff]  ;;  %v6035_v24 = vcombine.high %v1086_v10, %v1090_v14  ;;  %v6034_v33 = vcombine.low %v1086_v10, %v1090_v14  ;;  %v5877_v10 = vcombine.high %v927_v1, %v931_v3  ;;  %v919_v14 = vld [vmem:[#allocation8 + $0x558] sm:$0xff] }
 0x284   : > { %4287 = vmatpush1.bf16.msra.mxu0 %v5954_v26  ;;  %v1218_v5 = vld [vmem:[#allocation8 + $0xeb0] sm:$0xff]  ;;  %v759_v3 = vld [vmem:[#allocation8 + $0x58] sm:$0xff] }
 0x285   : > { %4328 = vmatpush1.bf16.msra.mxu1 %v6082_v28  ;;  %4288 = vmatprep.subr.bf16.mxu0 %v6075_v30  ;;  %v6163_v25 = vcombine.high %v1214_v20, %v1218_v5  ;;  %v1078_v26 = vld [vmem:[#allocation8 + $0xa50] sm:$0xff]  ;;  %v6162_v34 = vcombine.low %v1214_v20, %v1218_v5 }
 0x286   : > { %4329 = vmatprep.subr.bf16.mxu1 %v6203_v32  ;;  %v1082_v28 = vld [vmem:[#allocation8 + $0xa70] sm:$0xff] }
 0x287   : > { %v1206_v30 = vld [vmem:[#allocation8 + $0xe50] sm:$0xff]  ;;  %v6027_v19 = vcombine.high %v1078_v26, %v1082_v28  ;;  %v6026_v43 = vcombine.low %v1078_v26, %v1082_v28 }
 0x288   : > { %4289 = vmatpush2.bf16.msra.mxu0 %v6074_v36  ;;  %v1210_v32 = vld [vmem:[#allocation8 + $0xe70] sm:$0xff] }
 0x289   : > { %4330 = vmatpush2.bf16.msra.mxu1 %v6202_v38  ;;  %4290 = vmatprep.subr.bf16.mxu0 %v6067_v39  ;;  %v6155_v35 = vcombine.high %v1206_v30, %v1210_v32  ;;  %v1070_v36 = vld [vmem:[#allocation8 + $0xa10] sm:$0xff]  ;;  %v6154_v50 = vcombine.low %v1206_v30, %v1210_v32  ;;  %v783_v30 = vld [vmem:[#allocation8 + $0x118] sm:$0xff] }
 0x28a   : > { %4331 = vmatprep.subr.bf16.mxu1 %v6195_v42  ;;  %v1074_v38 = vld [vmem:[#allocation8 + $0xa30] sm:$0xff]  ;;  %v787_v32 = vld [vmem:[#allocation8 + $0x138] sm:$0xff] }
 0x28b   : > { %v1198_v39 = vld [vmem:[#allocation8 + $0xe10] sm:$0xff]  ;;  %v6019_v40 = vcombine.high %v1070_v36, %v1074_v38  ;;  %v6018_v57 = vcombine.low %v1070_v36, %v1074_v38 }
 0x28c   : > { %4291 = vmatpush2.bf16.msra.mxu0 %v6066_v52  ;;  %v1202_v42 = vld [vmem:[#allocation8 + $0xe30] sm:$0xff]  ;;  %v807_v52 = vld [vmem:[#allocation8 + $0x1d8] sm:$0xff] }
 0x28d   : > { %4332 = vmatpush2.bf16.msra.mxu1 %v6194_v53  ;;  %4292 = vmatprep.subr.bf16.mxu0 %v6059_v55  ;;  %v6147_v41 = vcombine.high %v1198_v39, %v1202_v42  ;;  %v811_v53 = vld [vmem:[#allocation8 + $0x1f8] sm:$0xff]  ;;  %v6146_v58 = vcombine.low %v1198_v39, %v1202_v42 }
 0x28e   : > { %4333 = vmatprep.subr.bf16.mxu1 %v6187_v56  ;;  %v935_v55 = vld [vmem:[#allocation8 + $0x5d8] sm:$0xff]  ;;  %v5757_v59 = vcombine.high %v807_v52, %v811_v53 }
 0x28f   : > { %v939_v56 = vld [vmem:[#allocation8 + $0x5f8] sm:$0xff] }
 0x290   : > { %4293 = vmatpush2.bf16.msra.mxu0 %v6058_v60  ;;  %v5885_v46 = vcombine.high %v935_v55, %v939_v56  ;;  %v799_v60 = vld [vmem:[#allocation8 + $0x198] sm:$0xff]  ;;  %v5884_v4 = vcombine.low %v935_v55, %v939_v56 }
 0x291   : > { %4334 = vmatpush2.bf16.msra.mxu1 %v6186_v62  ;;  %4294 = vmatprep.subr.bf16.mxu0 %v6051_v63  ;;  %v803_v62 = vld [vmem:[#allocation8 + $0x1b8] sm:$0xff]  ;;  %v1273_v63 = vrot.slane %v7260_v37, %v454_v47 }
 0x292   : > { %4335 = vmatprep.subr.bf16.mxu1 %v6179_v0  ;;  %v5756_v0 = vcombine.low %v807_v52, %v811_v53  ;;  %v923_v47 = vld [vmem:[#allocation8 + $0x578] sm:$0xff]  ;;  %v5732_v53 = vcombine.low %v783_v30, %v787_v32 }
 0x293   : > { %v5869_v28 = vcombine.high %v919_v14, %v923_v47  ;;  %v5868_v39 = vcombine.low %v919_v14, %v923_v47  ;;  %v907_v52 = vld [vmem:[#allocation8 + $0x4f8] sm:$0xff] }
 0x294   : > { %4295 = vmatpush2.bf16.msra.mxu0 %v6050_v6  ;;  %v5749_v6 = vcombine.high %v799_v60, %v803_v62  ;;  %v751_v14 = vld [vmem:[#allocation8 + $0x18] sm:$0xff] }
 0x295   : > { %4336 = vmatpush2.bf16.msra.mxu1 %v6178_v18  ;;  %4296 = vmatprep.subr.bf16.mxu0 %v6043_v7  ;;  %v791_v18 = vld [vmem:[#allocation8 + $0x158] sm:$0xff] }
 0x296   : > { %4337 = vmatprep.subr.bf16.mxu1 %v6171_v8  ;;  %v795_v7 = vld [vmem:[#allocation8 + $0x178] sm:$0xff] }
 0x297   : > { %v5741_v37 = vcombine.high %v791_v18, %v795_v7  ;;  %v5740_v36 = vcombine.low %v791_v18, %v795_v7  ;;  %v755_v47 = vld [vmem:[#allocation8 + $0x38] sm:$0xff] }
 0x298   : > { %4297 = vmatpush2.bf16.msra.mxu0 %v6042_v21  ;;  %v5748_v21 = vcombine.low %v799_v60, %v803_v62  ;;  %v899_v60 = vld [vmem:[#allocation8 + $0x4b8] sm:$0xff] }
 0x299   : > { %4338 = vmatpush2.bf16.msra.mxu1 %v6170_v22  ;;  %4298 = vmatprep.subr.bf16.mxu0 %v6035_v24 }
 0x29a   : > { %4339 = vmatprep.subr.bf16.mxu1 %v6163_v25 }
 0x29c   : > { %4299 = vmatpush2.bf16.msra.mxu0 %v6034_v33 }
 0x29d   : > { %4340 = vmatpush2.bf16.msra.mxu1 %v6162_v34  ;;  %4300 = vmatprep.subr.bf16.mxu0 %v6027_v19  ;;  %v911_v34 = vld [vmem:[#allocation8 + $0x518] sm:$0xff] }
 0x29e   : > { %4341 = vmatprep.subr.bf16.mxu1 %v6155_v35  ;;  %v915_v19 = vld [vmem:[#allocation8 + $0x538] sm:$0xff] }
 0x29f   : > { %v5860_v55 = vcombine.low %v911_v34, %v915_v19 }
 0x2a0   : > { %4301 = vmatpush2.bf16.msra.mxu0 %v6026_v43  ;;  %v5861_v43 = vcombine.high %v911_v34, %v915_v19 }
 0x2a1   : > { %4342 = vmatpush2.bf16.msra.mxu1 %v6154_v50  ;;  %4302 = vmatprep.subr.bf16.mxu0 %v6019_v40  ;;  %v775_v50 = vld [vmem:[#allocation8 + $0xd8] sm:$0xff] }
 0x2a2   : > { %4343 = vmatprep.subr.bf16.mxu1 %v6147_v41  ;;  %v779_v40 = vld [vmem:[#allocation8 + $0xf8] sm:$0xff] }
 0x2a3   : > { %v903_v41 = vld [vmem:[#allocation8 + $0x4d8] sm:$0xff]  ;;  %v5725_v56 = vcombine.high %v775_v50, %v779_v40  ;;  %v5724_v62 = vcombine.low %v775_v50, %v779_v40 }
 0x2a4   : > { %4303 = vmatpush2.bf16.msra.mxu0 %v6018_v57  ;;  %v5853_v57 = vcombine.high %v903_v41, %v907_v52  ;;  %v855_v40 = vld [vmem:[#allocation8 + $0x358] sm:$0xff] }
 0x2a5   : > { %4344 = vmatpush2.bf16.msra.mxu1 %v6146_v58  ;;  %4354 = vmatprep.subr.bf16.mxu0 %v5757_v59  ;;  %v767_v58 = vld [vmem:[#allocation8 + $0x98] sm:$0xff] }
 0x2a6   : > { %4395 = vmatprep.subr.bf16.mxu1 %v5885_v46  ;;  %v771_v59 = vld [vmem:[#allocation8 + $0xb8] sm:$0xff] }
 0x2a7   : > { %v4060_v8 = vpop.f32.mrf.mxu0  ;;  %4305 = vmatmul.mubr.bf16.vlgmr.msra.gmra.mxu0 %v7250_v17  ;;  %v895_v46 = vld [vmem:[#allocation8 + $0x498] sm:$0xff]  ;;  %v5716_v18 = vcombine.low %v767_v58, %v771_v59 }
 0x2a8   : > { %v4061_v20 = vadd.f32 %v4060_v8, %v1273_v63  ;;  %v4101_v5 = vpop.f32.mrf.mxu1  ;;  %4346 = vmatmul.mubr.bf16.vlgmr.msra.gmra.mxu1 %v7248_v9  ;;  %4355 = vmatpush1.bf16.msra.mxu0 %v5756_v0  ;;  %v5852_v63 = vcombine.low %v903_v41, %v907_v52  ;;  %v5717_v0 = vcombine.high %v767_v58, %v771_v59  ;;  %v859_v41 = vld [vmem:[#allocation8 + $0x378] sm:$0xff] }
 0x2a9   : > { %4386 = vmatprep.mubr.bf16.mxu0 %v7212_v12  ;;  %4396 = vmatpush1.bf16.msra.mxu1 %v5884_v4  ;;  %v4062_v22 = vpop.f32.mrf.mxu0  ;;  %v5845_v1 = vcombine.high %v895_v46, %v899_v60  ;;  %v763_v4 = vld [vmem:[#allocation8 + $0x78] sm:$0xff]  ;;  %v5844_v7 = vcombine.low %v895_v46, %v899_v60 }
 0x2aa   : > { %v7293_v24 = vadd.f32 %v4101_v5, %v4061_v20  ;;  %4427 = vmatprep.mubr.bf16.mxu1 %v7219_v16  ;;  %v4063_v25 = vadd.f32 %v4062_v22, %v1277_v23  ;;  %v4103_v26 = vpop.f32.mrf.mxu1  ;;  %4356 = vmatprep.subr.bf16.mxu0 %v5749_v6  ;;  %v5733_v16 = vcombine.high %v783_v30, %v787_v32  ;;  %v887_v23 = vld [vmem:[#allocation8 + $0x458] sm:$0xff] }
 0x2ab   : > { %v4064_v33 = vpop.f32.mrf.mxu0  ;;  %4397 = vmatprep.subr.bf16.mxu1 %v5877_v10  ;;  %v891_v6 = vld [vmem:[#allocation8 + $0x478] sm:$0xff]  ;;  %v5709_v8 = vcombine.high %v759_v3, %v763_v4  ;;  %v5700_v32 = vcombine.low %v751_v14, %v755_v47 }
 0x2ac   : > { %v7296_v35 = vadd.f32 %v4103_v26, %v4063_v25  ;;  %v4105_v12 = vpop.f32.mrf.mxu1  ;;  %4357 = vmatpush1.bf16.msra.mxu0 %v5748_v21  ;;  %v5837_v10 = vcombine.high %v887_v23, %v891_v6  ;;  %v879_v20 = vld [vmem:[#allocation8 + $0x418] sm:$0xff]  ;;  %v5708_v21 = vcombine.low %v759_v3, %v763_v4  ;;  %v5836_v22 = vcombine.low %v887_v23, %v891_v6 }
 0x2ad   : > { %4398 = vmatpush1.bf16.msra.mxu1 %v5876_v49  ;;  %v4065_v38 = vpop.f32.mrf.mxu0  ;;  %4358 = vmatprep.subr.bf16.mxu0 %v5741_v37  ;;  %v883_v5 = vld [vmem:[#allocation8 + $0x438] sm:$0xff]  ;;  %v5701_v49 = vcombine.high %v751_v14, %v755_v47 }
 0x2ae   : > { %v4106_v42 = vpop.f32.mrf.mxu1  ;;  %4399 = vmatprep.subr.bf16.mxu1 %v5869_v28  ;;  %v5829_v37 = vcombine.high %v879_v20, %v883_v5  ;;  %v871_v25 = vld [vmem:[#allocation8 + $0x3d8] sm:$0xff]  ;;  %v5828_v33 = vcombine.low %v879_v20, %v883_v5 }
 0x2af   : > { %v875_v26 = vld [vmem:[#allocation8 + $0x3f8] sm:$0xff] }
 0x2b0   : > { %4359 = vmatpush1.bf16.msra.mxu0 %v5740_v36  ;;  %v999_v28 = vld [vmem:[#allocation8 + $0x7d8] sm:$0xff]  ;;  %v5821_v34 = vcombine.high %v871_v25, %v875_v26 }
 0x2b1   : > { %4400 = vmatpush1.bf16.msra.mxu1 %v5868_v39  ;;  %4360 = vmatprep.subr.bf16.mxu0 %v5733_v16  ;;  %v1003_v30 = vld [vmem:[#allocation8 + $0x7f8] sm:$0xff]  ;;  %v5820_v16 = vcombine.low %v871_v25, %v875_v26 }
 0x2b2   : > { %4401 = vmatprep.subr.bf16.mxu1 %v5861_v43  ;;  %v5949_v19 = vcombine.high %v999_v28, %v1003_v30  ;;  %v863_v12 = vld [vmem:[#allocation8 + $0x398] sm:$0xff]  ;;  %v5948_v42 = vcombine.low %v999_v28, %v1003_v30 }
 0x2b3   : > { %v867_v36 = vld [vmem:[#allocation8 + $0x3b8] sm:$0xff] }
 0x2b4   : > { %4361 = vmatpush1.bf16.msra.mxu0 %v5732_v53  ;;  %v991_v38 = vld [vmem:[#allocation8 + $0x798] sm:$0xff]  ;;  %v5813_v43 = vcombine.high %v863_v12, %v867_v36 }
 0x2b5   : > { %4402 = vmatpush1.bf16.msra.mxu1 %v5860_v55  ;;  %4362 = vmatprep.subr.bf16.mxu0 %v5725_v56  ;;  %v995_v39 = vld [vmem:[#allocation8 + $0x7b8] sm:$0xff]  ;;  %v5812_v55 = vcombine.low %v863_v12, %v867_v36 }
 0x2b6   : > { %4403 = vmatprep.subr.bf16.mxu1 %v5853_v57  ;;  %v5941_v50 = vcombine.high %v991_v38, %v995_v39  ;;  %v983_v52 = vld [vmem:[#allocation8 + $0x758] sm:$0xff]  ;;  %v5940_v56 = vcombine.low %v991_v38, %v995_v39  ;;  %v5805_v57 = vcombine.high %v855_v40, %v859_v41 }
 0x2b7   : > { %v987_v53 = vld [vmem:[#allocation8 + $0x778] sm:$0xff] }
 0x2b8   : > { %4363 = vmatpush1.bf16.msra.mxu0 %v5724_v62  ;;  %v5933_v58 = vcombine.high %v983_v52, %v987_v53  ;;  %v847_v59 = vld [vmem:[#allocation8 + $0x318] sm:$0xff] }
 0x2b9   : > { %4404 = vmatpush1.bf16.msra.mxu1 %v5852_v63  ;;  %4364 = vmatprep.subr.bf16.mxu0 %v5717_v0  ;;  %v851_v46 = vld [vmem:[#allocation8 + $0x338] sm:$0xff]  ;;  %v5804_v63 = vcombine.low %v855_v40, %v859_v41  ;;  %v5932_v0 = vcombine.low %v983_v52, %v987_v53 }
 0x2ba   : > { %4405 = vmatprep.subr.bf16.mxu1 %v5845_v1  ;;  %v975_v60 = vld [vmem:[#allocation8 + $0x718] sm:$0xff]  ;;  %v5797_v1 = vcombine.high %v847_v59, %v851_v46 }
 0x2bb   : > { %v979_v62 = vld [vmem:[#allocation8 + $0x738] sm:$0xff] }
 0x2bc   : > { %4365 = vmatpush1.bf16.msra.mxu0 %v5716_v18  ;;  %v5925_v3 = vcombine.high %v975_v60, %v979_v62  ;;  %v839_v4 = vld [vmem:[#allocation8 + $0x2d8] sm:$0xff] }
 0x2bd   : > { %4406 = vmatpush1.bf16.msra.mxu1 %v5844_v7  ;;  %4366 = vmatprep.subr.bf16.mxu0 %v5709_v8  ;;  %v843_v23 = vld [vmem:[#allocation8 + $0x2f8] sm:$0xff]  ;;  %v5796_v7 = vcombine.low %v847_v59, %v851_v46  ;;  %v5924_v8 = vcombine.low %v975_v60, %v979_v62 }
 0x2be   : > { %4407 = vmatprep.subr.bf16.mxu1 %v5837_v10  ;;  %v967_v6 = vld [vmem:[#allocation8 + $0x6d8] sm:$0xff]  ;;  %v5789_v10 = vcombine.high %v839_v4, %v843_v23 }
 0x2bf   : > { %v971_v18 = vld [vmem:[#allocation8 + $0x6f8] sm:$0xff] }
 0x2c0   : > { %4367 = vmatpush1.bf16.msra.mxu0 %v5708_v21  ;;  %v5917_v14 = vcombine.high %v967_v6, %v971_v18  ;;  %v831_v47 = vld [vmem:[#allocation8 + $0x298] sm:$0xff] }
 0x2c1   : > { %4408 = vmatpush1.bf16.msra.mxu1 %v5836_v22  ;;  %4368 = vmatprep.subr.bf16.mxu0 %v5701_v49  ;;  %v835_v20 = vld [vmem:[#allocation8 + $0x2b8] sm:$0xff]  ;;  %v5788_v22 = vcombine.low %v839_v4, %v843_v23  ;;  %v5916_v49 = vcombine.low %v967_v6, %v971_v18 }
 0x2c2   : > { %4409 = vmatprep.subr.bf16.mxu1 %v5829_v37  ;;  %v959_v5 = vld [vmem:[#allocation8 + $0x698] sm:$0xff]  ;;  %v5781_v37 = vcombine.high %v831_v47, %v835_v20 }
 0x2c3   : > { %v963_v21 = vld [vmem:[#allocation8 + $0x6b8] sm:$0xff] }
 0x2c4   : > { %4369 = vmatpush1.bf16.msra.mxu0 %v5700_v32  ;;  %v5909_v25 = vcombine.high %v959_v5, %v963_v21  ;;  %v823_v26 = vld [vmem:[#allocation8 + $0x258] sm:$0xff] }
 0x2c5   : > { %4410 = vmatpush1.bf16.msra.mxu1 %v5828_v33  ;;  %4370 = vmatprep.subr.bf16.mxu0 %v5821_v34  ;;  %v827_v28 = vld [vmem:[#allocation8 + $0x278] sm:$0xff]  ;;  %v5780_v33 = vcombine.low %v831_v47, %v835_v20  ;;  %v5908_v34 = vcombine.low %v959_v5, %v963_v21 }
 0x2c6   : > { %4411 = vmatprep.subr.bf16.mxu1 %v5949_v19  ;;  %v951_v30 = vld [vmem:[#allocation8 + $0x658] sm:$0xff]  ;;  %v5773_v19 = vcombine.high %v823_v26, %v827_v28 }
 0x2c7   : > { %v955_v32 = vld [vmem:[#allocation8 + $0x678] sm:$0xff] }
 0x2c8   : > { %4371 = vmatpush2.bf16.msra.mxu0 %v5820_v16  ;;  %v5901_v12 = vcombine.high %v951_v30, %v955_v32  ;;  %v815_v36 = vld [vmem:[#allocation8 + $0x218] sm:$0xff] }
 0x2c9   : > { %4412 = vmatpush2.bf16.msra.mxu1 %v5948_v42  ;;  %4372 = vmatprep.subr.bf16.mxu0 %v5813_v43  ;;  %v819_v38 = vld [vmem:[#allocation8 + $0x238] sm:$0xff]  ;;  %v5772_v42 = vcombine.low %v823_v26, %v827_v28  ;;  %v5900_v43 = vcombine.low %v951_v30, %v955_v32 }
 0x2ca   : > { %4413 = vmatprep.subr.bf16.mxu1 %v5941_v50  ;;  %v943_v39 = vld [vmem:[#allocation8 + $0x618] sm:$0xff]  ;;  %v5765_v50 = vcombine.high %v815_v36, %v819_v38 }
 0x2cb   : > { %v947_v16 = vld [vmem:[#allocation8 + $0x638] sm:$0xff] }
 0x2cc   : > { %4373 = vmatpush2.bf16.msra.mxu0 %v5812_v55  ;;  %v5893_v40 = vcombine.high %v943_v39, %v947_v16  ;;  %v1063_v41 = vld [vmem:[#allocation8 + $0x9d8] sm:$0xff] }
 0x2cd   : > { %4414 = vmatpush2.bf16.msra.mxu1 %v5940_v56  ;;  %4374 = vmatprep.subr.bf16.mxu0 %v5805_v57  ;;  %v1067_v52 = vld [vmem:[#allocation8 + $0x9f8] sm:$0xff]  ;;  %v5764_v56 = vcombine.low %v815_v36, %v819_v38  ;;  %v5892_v57 = vcombine.low %v943_v39, %v947_v16 }
 0x2ce   : > { %4415 = vmatprep.subr.bf16.mxu1 %v5933_v58  ;;  %v1191_v53 = vld [vmem:[#allocation8 + $0xdd8] sm:$0xff]  ;;  %v6013_v58 = vcombine.high %v1063_v41, %v1067_v52  ;;  %v6012_v62 = vcombine.low %v1063_v41, %v1067_v52 }
 0x2cf   : > { %v1195_v55 = vld [vmem:[#allocation8 + $0xdf8] sm:$0xff] }
 0x2d0   : > { %4375 = vmatpush2.bf16.msra.mxu0 %v5804_v63  ;;  %v6141_v59 = vcombine.high %v1191_v53, %v1195_v55  ;;  %v1055_v46 = vld [vmem:[#allocation8 + $0x998] sm:$0xff] }
 0x2d1   : > { %4416 = vmatpush2.bf16.msra.mxu1 %v5932_v0  ;;  %4376 = vmatprep.subr.bf16.mxu0 %v5797_v1  ;;  %v1059_v60 = vld [vmem:[#allocation8 + $0x9b8] sm:$0xff]  ;;  %v6140_v1 = vcombine.low %v1191_v53, %v1195_v55 }
 0x2d2   : > { %4417 = vmatprep.subr.bf16.mxu1 %v5925_v3  ;;  %v1183_v63 = vld [vmem:[#allocation8 + $0xd98] sm:$0xff]  ;;  %v6005_v3 = vcombine.high %v1055_v46, %v1059_v60  ;;  %v6004_v47 = vcombine.low %v1055_v46, %v1059_v60 }
 0x2d3   : > { %v1187_v0 = vld [vmem:[#allocation8 + $0xdb8] sm:$0xff] }
 0x2d4   : > { %4377 = vmatpush2.bf16.msra.mxu0 %v5796_v7  ;;  %v1047_v4 = vld [vmem:[#allocation8 + $0x958] sm:$0xff]  ;;  %v6133_v18 = vcombine.high %v1183_v63, %v1187_v0  ;;  %v6132_v5 = vcombine.low %v1183_v63, %v1187_v0 }
 0x2d5   : > { %4418 = vmatpush2.bf16.msra.mxu1 %v5924_v8  ;;  %4378 = vmatprep.subr.bf16.mxu0 %v5789_v10  ;;  %v1051_v23 = vld [vmem:[#allocation8 + $0x978] sm:$0xff] }
 0x2d6   : > { %4419 = vmatprep.subr.bf16.mxu1 %v5917_v14  ;;  %v1175_v7 = vld [vmem:[#allocation8 + $0xd58] sm:$0xff]  ;;  %v5997_v21 = vcombine.high %v1047_v4, %v1051_v23  ;;  %v5996_v28 = vcombine.low %v1047_v4, %v1051_v23 }
 0x2d7   : > { %v1179_v8 = vld [vmem:[#allocation8 + $0xd78] sm:$0xff] }
 0x2d8   : > { %4379 = vmatpush2.bf16.msra.mxu0 %v5788_v22  ;;  %v1171_v26 = vld [vmem:[#allocation8 + $0xd38] sm:$0xff]  ;;  %v6124_v32 = vcombine.low %v1175_v7, %v1179_v8 }
 0x2d9   : > { %4420 = vmatpush2.bf16.msra.mxu1 %v5916_v49  ;;  %4380 = vmatprep.subr.bf16.mxu0 %v5781_v37  ;;  %v1039_v49 = vld [vmem:[#allocation8 + $0x918] sm:$0xff] }
 0x2da   : > { %4421 = vmatprep.subr.bf16.mxu1 %v5909_v25  ;;  %v1043_v37 = vld [vmem:[#allocation8 + $0x938] sm:$0xff] }
 0x2db   : > { %v1167_v25 = vld [vmem:[#allocation8 + $0xd18] sm:$0xff]  ;;  %v5988_v39 = vcombine.low %v1039_v49, %v1043_v37 }
 0x2dc   : > { %4381 = vmatpush2.bf16.msra.mxu0 %v5780_v33  ;;  %v5989_v33 = vcombine.high %v1039_v49, %v1043_v37  ;;  %v1159_v36 = vld [vmem:[#allocation8 + $0xcd8] sm:$0xff]  ;;  %v6116_v16 = vcombine.low %v1167_v25, %v1171_v26 }
 0x2dd   : > { %4422 = vmatpush2.bf16.msra.mxu1 %v5908_v34  ;;  %4382 = vmatprep.subr.bf16.mxu0 %v5773_v19  ;;  %v1031_v19 = vld [vmem:[#allocation8 + $0x8d8] sm:$0xff] }
 0x2de   : > { %4423 = vmatprep.subr.bf16.mxu1 %v5901_v12  ;;  %v1035_v12 = vld [vmem:[#allocation8 + $0x8f8] sm:$0xff] }
 0x2df   : > { %v1163_v38 = vld [vmem:[#allocation8 + $0xcf8] sm:$0xff]  ;;  %v5980_v53 = vcombine.low %v1031_v19, %v1035_v12 }
 0x2e0   : > { %4383 = vmatpush2.bf16.msra.mxu0 %v5772_v42  ;;  %v5981_v42 = vcombine.high %v1031_v19, %v1035_v12  ;;  %v1151_v41 = vld [vmem:[#allocation8 + $0xc98] sm:$0xff]  ;;  %v6108_v55 = vcombine.low %v1159_v36, %v1163_v38 }
 0x2e1   : > { %4424 = vmatpush2.bf16.msra.mxu1 %v5900_v43  ;;  %4384 = vmatprep.subr.bf16.mxu0 %v5765_v50  ;;  %v6109_v43 = vcombine.high %v1159_v36, %v1163_v38  ;;  %v1023_v50 = vld [vmem:[#allocation8 + $0x898] sm:$0xff] }
 0x2e2   : > { %4425 = vmatprep.subr.bf16.mxu1 %v5893_v40  ;;  %v1027_v40 = vld [vmem:[#allocation8 + $0x8b8] sm:$0xff] }
 0x2e3   : > { %v1155_v52 = vld [vmem:[#allocation8 + $0xcb8] sm:$0xff] }
 0x2e4   : > { %4385 = vmatpush2.bf16.msra.mxu0 %v5764_v56  ;;  %v5973_v56 = vcombine.high %v1023_v50, %v1027_v40  ;;  %v1143_v46 = vld [vmem:[#allocation8 + $0xc58] sm:$0xff]  ;;  %v6100_v63 = vcombine.low %v1151_v41, %v1155_v52 }
 0x2e5   : > { %4426 = vmatpush2.bf16.msra.mxu1 %v5892_v57  ;;  %4436 = vmatprep.subr.bf16.mxu0 %v6013_v58  ;;  %v6101_v57 = vcombine.high %v1151_v41, %v1155_v52  ;;  %v1015_v58 = vld [vmem:[#allocation8 + $0x858] sm:$0xff] }
 0x2e6   : > { %4477 = vmatprep.subr.bf16.mxu1 %v6141_v59  ;;  %v1019_v59 = vld [vmem:[#allocation8 + $0x878] sm:$0xff] }
 0x2e7   : > { %v4142_v6 = vpop.f32.mrf.mxu0  ;;  %4387 = vmatmul.mubr.bf16.vlgmr.msra.gmra.mxu0 %v7217_v15  ;;  %v1147_v60 = vld [vmem:[#allocation8 + $0xc78] sm:$0xff]  ;;  %v5965_v0 = vcombine.high %v1015_v58, %v1019_v59 }
 0x2e8   : > { %v4143_v10 = vadd.f32 %v4142_v6, %v7293_v24  ;;  %v4183_v14 = vpop.f32.mrf.mxu1  ;;  %4428 = vmatmul.mubr.bf16.vlgmr.msra.gmra.mxu1 %v7210_v11  ;;  %4437 = vmatpush1.bf16.msra.mxu0 %v6012_v62  ;;  %v6125_v24 = vcombine.high %v1175_v7, %v1179_v8  ;;  %v5972_v62 = vcombine.low %v1023_v50, %v1027_v40  ;;  %v1011_v4 = vld [vmem:[#allocation8 + $0x838] sm:$0xff] }
 0x2e9   : > { %4468 = vmatprep.mubr.bf16.mxu0 %v7232_v51  ;;  %4478 = vmatpush1.bf16.msra.mxu1 %v6140_v1  ;;  %v7302_v20 = vpop.f32.mrf.mxu0  ;;  %v6093_v1 = vcombine.high %v1143_v46, %v1147_v60  ;;  %v1135_v23 = vld [vmem:[#allocation8 + $0xc18] sm:$0xff]  ;;  %v6092_v7 = vcombine.low %v1143_v46, %v1147_v60 }
 0x2ea   : > { %v7304_v22 = vadd.f32 %v4183_v14, %v4143_v10  ;;  %4509 = vmatprep.mubr.bf16.mxu1 %v7234_v54  ;;  %v7307_v15 = vpop.f32.mrf.mxu1  ;;  %4438 = vmatprep.subr.bf16.mxu0 %v6005_v3  ;;  %v6117_v54 = vcombine.high %v1167_v25, %v1171_v26  ;;  %v1007_v3 = vld [vmem:[#allocation8 + $0x818] sm:$0xff] }
 0x2eb   : > { %v4146_v11 = vpop.f32.mrf.mxu0  ;;  %4479 = vmatprep.subr.bf16.mxu1 %v6133_v18  ;;  %v1139_v6 = vld [vmem:[#allocation8 + $0xc38] sm:$0xff]  ;;  %v5964_v18 = vcombine.low %v1015_v58, %v1019_v59  ;;  %v5957_v8 = vcombine.high %v1007_v3, %v1011_v4 }
 0x2ec   : > { %v4187_v51 = vpop.f32.mrf.mxu1  ;;  %4439 = vmatpush1.bf16.msra.mxu0 %v6004_v47  ;;  %v6085_v10 = vcombine.high %v1135_v23, %v1139_v6  ;;  %v1127_v14 = vld [vmem:[#allocation8 + $0xbd8] sm:$0xff]  ;;  %v6084_v49 = vcombine.low %v1135_v23, %v1139_v6 }
 0x2ed   : > { %4480 = vmatpush1.bf16.msra.mxu1 %v6132_v5  ;;  %v4147_v30 = vpop.f32.mrf.mxu0  ;;  %4440 = vmatprep.subr.bf16.mxu0 %v5997_v21  ;;  %v1131_v47 = vld [vmem:[#allocation8 + $0xbf8] sm:$0xff] }
 0x2ee   : > { %v4188_v34 = vpop.f32.mrf.mxu1  ;;  %4481 = vmatprep.subr.bf16.mxu1 %v6125_v24  ;;  %v1255_v5 = vld [vmem:[#allocation8 + $0xfd8] sm:$0xff]  ;;  %v5956_v24 = vcombine.low %v1007_v3, %v1011_v4  ;;  %v6077_v37 = vcombine.high %v1127_v14, %v1131_v47  ;;  %v6076_v30 = vcombine.low %v1127_v14, %v1131_v47 }
 0x2ef   : > { %v1259_v21 = vld [vmem:[#allocation8 + $0xff8] sm:$0xff] }
 0x2f0   : > { %4441 = vmatpush1.bf16.msra.mxu0 %v5996_v28  ;;  %v6205_v11 = vcombine.high %v1255_v5, %v1259_v21  ;;  %v1119_v25 = vld [vmem:[#allocation8 + $0xb98] sm:$0xff] }
 0x2f1   : > { %4482 = vmatpush1.bf16.msra.mxu1 %v6124_v32  ;;  %4442 = vmatprep.subr.bf16.mxu0 %v5989_v33  ;;  %v1123_v26 = vld [vmem:[#allocation8 + $0xbb8] sm:$0xff]  ;;  %v6204_v32 = vcombine.low %v1255_v5, %v1259_v21 }
 0x2f2   : > { %4483 = vmatprep.subr.bf16.mxu1 %v6117_v54  ;;  %v1247_v51 = vld [vmem:[#allocation8 + $0xf98] sm:$0xff]  ;;  %v6069_v33 = vcombine.high %v1119_v25, %v1123_v26  ;;  %v6068_v38 = vcombine.low %v1119_v25, %v1123_v26 }
 0x2f3   : > { %v1251_v28 = vld [vmem:[#allocation8 + $0xfb8] sm:$0xff] }
 0x2f4   : > { %4443 = vmatpush1.bf16.msra.mxu0 %v5988_v39  ;;  %v6197_v34 = vcombine.high %v1247_v51, %v1251_v28  ;;  %v1111_v54 = vld [vmem:[#allocation8 + $0xb58] sm:$0xff]  ;;  %v6196_v39 = vcombine.low %v1247_v51, %v1251_v28  ;;  %v4145_v28 = vadd.f32 %v7302_v20, %v7296_v35 }
 0x2f5   : > { %4484 = vmatpush1.bf16.msra.mxu1 %v6116_v16  ;;  %4444 = vmatprep.subr.bf16.mxu0 %v5981_v42  ;;  %v1115_v19 = vld [vmem:[#allocation8 + $0xb78] sm:$0xff] }
 0x2f6   : > { %4485 = vmatprep.subr.bf16.mxu1 %v6109_v43  ;;  %v1239_v12 = vld [vmem:[#allocation8 + $0xf58] sm:$0xff]  ;;  %v6061_v16 = vcombine.high %v1111_v54, %v1115_v19  ;;  %v6060_v52 = vcombine.low %v1111_v54, %v1115_v19  ;;  %v4186_v54 = vadd.f32 %v7307_v15, %v4145_v28 }
 0x2f7   : > { %v1243_v36 = vld [vmem:[#allocation8 + $0xf78] sm:$0xff] }
 0x2f8   : > { %4445 = vmatpush1.bf16.msra.mxu0 %v5980_v53  ;;  %v6189_v42 = vcombine.high %v1239_v12, %v1243_v36  ;;  %v1103_v43 = vld [vmem:[#allocation8 + $0xb18] sm:$0xff]  ;;  %v6188_v53 = vcombine.low %v1239_v12, %v1243_v36  ;;  %v4519_v36 = vmax.f32 %v7282_v27, 0.0  ;;  %v6477_v27 = vld [vmem:[%s7168_s22 + $0x164] ss:$8 sps:$4 sm:$0xff]  }
 0x2f9   : > { %4486 = vmatpush1.bf16.msra.mxu1 %v6108_v55  ;;  %4446 = vmatprep.subr.bf16.mxu0 %v5973_v56  ;;  %v1107_v50 = vld [vmem:[#allocation8 + $0xb38] sm:$0xff] }
 0x2fa   : > { %4487 = vmatprep.subr.bf16.mxu1 %v6101_v57  ;;  %v1231_v40 = vld [vmem:[#allocation8 + $0xf18] sm:$0xff]  ;;  %v6053_v55 = vcombine.high %v1103_v43, %v1107_v50  ;;  %v6052_v60 = vcombine.low %v1103_v43, %v1107_v50  ;;  %v6474_v43 = vld [vmem:[%s7168_s22 + $0x64] ss:$8 sps:$4 sm:$0xff]   ;;  %v4527_v50 = vpack.c.bf16 %v4519_v36, %v4519_v36 }
 0x2fb   : > { %v1235_v41 = vld [vmem:[#allocation8 + $0xf38] sm:$0xff] }
 0x2fc   : > { %4447 = vmatpush1.bf16.msra.mxu0 %v5972_v62  ;;  %v6181_v56 = vcombine.high %v1231_v40, %v1235_v41  ;;  %v1095_v57 = vld [vmem:[#allocation8 + $0xad8] sm:$0xff]  ;;  %v6180_v62 = vcombine.low %v1231_v40, %v1235_v41 }
 0x2fd   : > { %4488 = vmatpush1.bf16.msra.mxu1 %v6100_v63  ;;  %4448 = vmatprep.subr.bf16.mxu0 %v5965_v0  ;;  %v1099_v58 = vld [vmem:[#allocation8 + $0xaf8] sm:$0xff] }
 0x2fe   : > { %4489 = vmatprep.subr.bf16.mxu1 %v6093_v1  ;;  %v1223_v59 = vld [vmem:[#allocation8 + $0xed8] sm:$0xff]  ;;  %v6045_v63 = vcombine.high %v1095_v57, %v1099_v58  ;;  %v6044_v6 = vcombine.low %v1095_v57, %v1099_v58 }
 0x2ff   : > { %v1227_v46 = vld [vmem:[#allocation8 + $0xef8] sm:$0xff] }
 0x300   : > { %4449 = vmatpush1.bf16.msra.mxu0 %v5964_v18  ;;  %v6173_v0 = vcombine.high %v1223_v59, %v1227_v46  ;;  %v1087_v1 = vld [vmem:[#allocation8 + $0xa98] sm:$0xff]  ;;  %v6172_v18 = vcombine.low %v1223_v59, %v1227_v46 }
 0x301   : > { %4490 = vmatpush1.bf16.msra.mxu1 %v6092_v7  ;;  %4450 = vmatprep.subr.bf16.mxu0 %v5957_v8  ;;  %v1091_v3 = vld [vmem:[#allocation8 + $0xab8] sm:$0xff] }
 0x302   : > { %4491 = vmatprep.subr.bf16.mxu1 %v6085_v10  ;;  %v1215_v4 = vld [vmem:[#allocation8 + $0xe98] sm:$0xff]  ;;  %v6037_v7 = vcombine.high %v1087_v1, %v1091_v3  ;;  %v6036_v21 = vcombine.low %v1087_v1, %v1091_v3  ;;  %v6489_v3 = vld [vmem:[%s7168_s22 + $0x144] ss:$8 sps:$4 sm:$0xff]  }
 0x303   : > { %v1219_v23 = vld [vmem:[#allocation8 + $0xeb8] sm:$0xff] }
 0x304   : > { %4451 = vmatpush1.bf16.msra.mxu0 %v5956_v24  ;;  %v6165_v8 = vcombine.high %v1215_v4, %v1219_v23  ;;  %v1079_v10 = vld [vmem:[#allocation8 + $0xa58] sm:$0xff]  ;;  %v6164_v24 = vcombine.low %v1215_v4, %v1219_v23  ;;  %v6484_v4 = vld [vmem:[%s7168_s22 + $0x40] ss:$8 sps:$4 sm:$0xff]  }
 0x305   : > { %4492 = vmatpush1.bf16.msra.mxu1 %v6084_v49  ;;  %4452 = vmatprep.subr.bf16.mxu0 %v6077_v37  ;;  %v1083_v14 = vld [vmem:[#allocation8 + $0xa78] sm:$0xff]  ;;  %v6487_v23 = vld [vmem:[%s7168_s22 + $0x140] ss:$8 sps:$4 sm:$0xff]  }
 0x306   : > { %4493 = vmatprep.subr.bf16.mxu1 %v6205_v11  ;;  %v1207_v47 = vld [vmem:[#allocation8 + $0xe58] sm:$0xff]  ;;  %v6029_v49 = vcombine.high %v1079_v10, %v1083_v14 }
 0x307   : > { %v1211_v5 = vld [vmem:[#allocation8 + $0xe78] sm:$0xff] }
 0x308   : > { %4453 = vmatpush2.bf16.msra.mxu0 %v6076_v30  ;;  %v6157_v37 = vcombine.high %v1207_v47, %v1211_v5  ;;  %v1071_v11 = vld [vmem:[#allocation8 + $0xa18] sm:$0xff]  ;;  %v6028_v30 = vcombine.low %v1079_v10, %v1083_v14  ;;  %v6498_v10 = vld [vmem:[%s7168_s22 + $0x24] ss:$8 sps:$4 sm:$0xff]  }
 0x309   : > { %4494 = vmatpush2.bf16.msra.mxu1 %v6204_v32  ;;  %4454 = vmatprep.subr.bf16.mxu0 %v6069_v33  ;;  %v1075_v25 = vld [vmem:[#allocation8 + $0xa38] sm:$0xff]  ;;  %v6156_v32 = vcombine.low %v1207_v47, %v1211_v5  ;;  %v6501_v14 = vld [vmem:[%s7168_s22 + $0x124] ss:$8 sps:$4 sm:$0xff]   ;;  %v6496_v47 = vld [vmem:[%s7168_s22 + $0x20] ss:$8 sps:$4 sm:$0xff]  }
 0x30a   : > { %4495 = vmatprep.subr.bf16.mxu1 %v6197_v34  ;;  %v1199_v26 = vld [vmem:[#allocation8 + $0xe18] sm:$0xff]  ;;  %v6021_v33 = vcombine.high %v1071_v11, %v1075_v25  ;;  %v6020_v19 = vcombine.low %v1071_v11, %v1075_v25  ;;  %v6499_v5 = vld [vmem:[%s7168_s22 + $0x120] ss:$8 sps:$4 sm:$0xff]   ;;  %v6510_v11 = vld [vmem:[%s7168_s22 + $0x4] ss:$8 sps:$4 sm:$0xff]  }
 0x30b   : > { %v1203_v51 = vld [vmem:[#allocation8 + $0xe38] sm:$0xff]  ;;  %v6513_v25 = vld [vmem:[%s7168_s22 + $0x104] ss:$8 sps:$4 sm:$0xff]  }
 0x30c   : > { %4455 = vmatpush2.bf16.msra.mxu0 %v6068_v38  ;;  %v6149_v34 = vcombine.high %v1199_v26, %v1203_v51  ;;  %v6148_v12 = vcombine.low %v1199_v26, %v1203_v51  ;;  %v6468_v35 = vld [vmem:[%s7168_s22 + $0x74] ss:$8 sps:$4 sm:$0xff]   ;;  %v4521_v38 = vmax.f32 %v4186_v54, 0.0  ;;  %v6508_v26 = vld [vmem:[%s7168_s22] ss:$8 sps:$4 sm:$0xff]  }
 0x30d   : > { %4496 = vmatpush2.bf16.msra.mxu1 %v6196_v39  ;;  %4456 = vmatprep.subr.bf16.mxu0 %v6061_v16  ;;  %v6471_v20 = vld [vmem:[%s7168_s22 + $0x174] ss:$8 sps:$4 sm:$0xff]   ;;  %v6466_v16 = vld [vmem:[%s7168_s22 + $0x70] ss:$8 sps:$4 sm:$0xff]   ;;  %v6511_v51 = vld [vmem:[%s7168_s22 + $0x100] ss:$8 sps:$4 sm:$0xff]  }
 0x30e   : > { %4497 = vmatprep.subr.bf16.mxu1 %v6189_v42  ;;  %v7315_v39 = vld [vmem:[#allocation10] sm:$0xff]  ;;  %v4529_v41 = vpack.c.bf16 %v4521_v38, %v4521_v38  ;;  %v6525_v54 = vld [vmem:[%s7168_s22 + $0x1e4] ss:$8 sps:$4 sm:$0xff]  }
 0x30f   : > { %v1281_v15 = vrot.slane %v7315_v39, %v462_v31  ;;  %v6469_v42 = vld [vmem:[%s7168_s22 + $0x170] ss:$8 sps:$4 sm:$0xff]   ;;  %v6472_v31 = vld [vmem:[%s7168_s22 + $0x60] ss:$8 sps:$4 sm:$0xff]   ;;  %v6480_v57 = vld [vmem:[%s7168_s22 + $0x54] ss:$8 sps:$4 sm:$0xff]  }
 0x310   : > { %4457 = vmatpush2.bf16.msra.mxu0 %v6060_v52  ;;  %v6516_v28 = vld [vmem:[%s7168_s22 + $0xf4] ss:$8 sps:$4 sm:$0xff]   ;;  %v6526_v36 = vld [vmem:[%s7168_s22 + $0xd0] ss:$8 sps:$4 sm:$0xff]  }
 0x311   : > { %4498 = vmatpush2.bf16.msra.mxu1 %v6188_v53  ;;  %4458 = vmatprep.subr.bf16.mxu0 %v6053_v55  ;;  %v6529_v38 = vld [vmem:[%s7168_s22 + $0x1d0] ss:$8 sps:$4 sm:$0xff]  }
 0x312   : > { %4499 = vmatprep.subr.bf16.mxu1 %v6181_v56  ;;  %v6475_v56 = vld [vmem:[%s7168_s22 + $0x160] ss:$8 sps:$4 sm:$0xff]  }
 0x314   : > { %4459 = vmatpush2.bf16.msra.mxu0 %v6052_v60  ;;  %v6478_v60 = vld [vmem:[%s7168_s22 + $0x50] ss:$8 sps:$4 sm:$0xff]  }
 0x315   : > { %4500 = vmatpush2.bf16.msra.mxu1 %v6180_v62  ;;  %4460 = vmatprep.subr.bf16.mxu0 %v6045_v63  ;;  %v6481_v63 = vld [vmem:[%s7168_s22 + $0x150] ss:$8 sps:$4 sm:$0xff]  }
 0x316   : > { %4501 = vmatprep.subr.bf16.mxu1 %v6173_v0  ;;  %v6486_v0 = vld [vmem:[%s7168_s22 + $0x44] ss:$8 sps:$4 sm:$0xff]  }
 0x318   : > { %4461 = vmatpush2.bf16.msra.mxu0 %v6044_v6  ;;  %v6492_v6 = vld [vmem:[%s7168_s22 + $0x34] ss:$8 sps:$4 sm:$0xff]  }
 0x319   : > { %4502 = vmatpush2.bf16.msra.mxu1 %v6172_v18  ;;  %4462 = vmatprep.subr.bf16.mxu0 %v6037_v7  ;;  %v6495_v18 = vld [vmem:[%s7168_s22 + $0x134] ss:$8 sps:$4 sm:$0xff]   ;;  %v6490_v7 = vld [vmem:[%s7168_s22 + $0x30] ss:$8 sps:$4 sm:$0xff]  }
 0x31a   : > { %4503 = vmatprep.subr.bf16.mxu1 %v6165_v8  ;;  %v6493_v8 = vld [vmem:[%s7168_s22 + $0x130] ss:$8 sps:$4 sm:$0xff]  }
 0x31c   : > { %4463 = vmatpush2.bf16.msra.mxu0 %v6036_v21  ;;  %v6504_v21 = vld [vmem:[%s7168_s22 + $0x14] ss:$8 sps:$4 sm:$0xff]  }
 0x31d   : > { %4504 = vmatpush2.bf16.msra.mxu1 %v6164_v24  ;;  %4464 = vmatprep.subr.bf16.mxu0 %v6029_v49  ;;  %v6507_v24 = vld [vmem:[%s7168_s22 + $0x114] ss:$8 sps:$4 sm:$0xff]   ;;  %v6502_v49 = vld [vmem:[%s7168_s22 + $0x10] ss:$8 sps:$4 sm:$0xff]  }
 0x31e   : > { %4505 = vmatprep.subr.bf16.mxu1 %v6157_v37  ;;  %v6505_v37 = vld [vmem:[%s7168_s22 + $0x110] ss:$8 sps:$4 sm:$0xff]  }
 0x320   : > { %4465 = vmatpush2.bf16.msra.mxu0 %v6028_v30  ;;  %v6519_v30 = vld [vmem:[%s7168_s22 + $0x1f4] ss:$8 sps:$4 sm:$0xff]  }
 0x321   : > { %4506 = vmatpush2.bf16.msra.mxu1 %v6156_v32  ;;  %4466 = vmatprep.subr.bf16.mxu0 %v6021_v33  ;;  %v6514_v32 = vld [vmem:[%s7168_s22 + $0xf0] ss:$8 sps:$4 sm:$0xff]  }
 0x322   : > { %4507 = vmatprep.subr.bf16.mxu1 %v6149_v34  ;;  %v6517_v33 = vld [vmem:[%s7168_s22 + $0x1f0] ss:$8 sps:$4 sm:$0xff]   ;;  %v6522_v34 = vld [vmem:[%s7168_s22 + $0xe4] ss:$8 sps:$4 sm:$0xff]  }
 0x324   : > { %4467 = vmatpush2.bf16.msra.mxu0 %v6020_v19  ;;  %v6520_v19 = vld [vmem:[%s7168_s22 + $0xe0] ss:$8 sps:$4 sm:$0xff]  }
 0x325   : > { %4508 = vmatpush2.bf16.msra.mxu1 %v6148_v12  ;;  %5314 = vmatprep.subr.bf16.mxu0 %v6468_v35  ;;  %v6523_v12 = vld [vmem:[%s7168_s22 + $0x1e0] ss:$8 sps:$4 sm:$0xff]   ;;  %v6528_v35 = vld [vmem:[%s7168_s22 + $0xd4] ss:$8 sps:$4 sm:$0xff]  }
 0x326   : > { %5355 = vmatprep.subr.bf16.mxu1 %v6471_v20  ;;  %v6531_v20 = vld [vmem:[%s7168_s22 + $0x1d4] ss:$8 sps:$4 sm:$0xff]  }
 0x327   : > { %v4224_v40 = vpop.f32.mrf.mxu0  ;;  %4469 = vmatmul.mubr.bf16.vlgmr.msra.gmra.mxu0 %v7250_v17 }
 0x328   : > { %v4225_v52 = vadd.f32 %v4224_v40, %v1281_v15  ;;  %v4265_v53 = vpop.f32.mrf.mxu1  ;;  %4510 = vmatmul.mubr.bf16.vlgmr.msra.gmra.mxu1 %v7248_v9  ;;  %5315 = vmatpush1.bf16.msra.mxu0 %v6466_v16  ;;  %v6483_v9 = vld [vmem:[%s7168_s22 + $0x154] ss:$8 sps:$4 sm:$0xff]   ;;  %v6534_v15 = vld [vmem:[%s7168_s22 + $0xc4] ss:$8 sps:$4 sm:$0xff]  }
 0x329   : > { %5346 = vmatprep.mubr.bf16.mxu0 %v4527_v50  ;;  %5356 = vmatpush1.bf16.msra.mxu1 %v6469_v42  ;;  %v7327_v55 = vpop.f32.mrf.mxu0  ;;  %v6537_v16 = vld [vmem:[%s7168_s22 + $0x1c4] ss:$8 sps:$4 sm:$0xff]   ;;  %v6532_v42 = vld [vmem:[%s7168_s22 + $0xc0] ss:$8 sps:$4 sm:$0xff]   ;;  %v6540_v50 = vld [vmem:[%s7168_s22 + $0xb4] ss:$8 sps:$4 sm:$0xff]  }
 0x32a   : > { %v7331_v58 = vadd.f32 %v4265_v53, %v4225_v52  ;;  %5387 = vmatprep.mubr.bf16.mxu1 %v4529_v41  ;;  %v7333_v17 = vpop.f32.mrf.mxu1  ;;  %5316 = vmatprep.subr.bf16.mxu0 %v6474_v43  ;;  %v6535_v43 = vld [vmem:[%s7168_s22 + $0x1c0] ss:$8 sps:$4 sm:$0xff]   ;;  %v6543_v40 = vld [vmem:[%s7168_s22 + $0x1b4] ss:$8 sps:$4 sm:$0xff]   ;;  %v6541_v41 = vld [vmem:[%s7168_s22 + $0x1b0] ss:$8 sps:$4 sm:$0xff]  }
 0x32b   : > { %v4228_v59 = vpop.f32.mrf.mxu0  ;;  %5357 = vmatprep.subr.bf16.mxu1 %v6477_v27  ;;  %v6538_v27 = vld [vmem:[%s7168_s22 + $0xb0] ss:$8 sps:$4 sm:$0xff]   ;;  %v6546_v52 = vld [vmem:[%s7168_s22 + $0xa4] ss:$8 sps:$4 sm:$0xff]  }
 0x32c   : > { %v4269_v46 = vpop.f32.mrf.mxu1  ;;  %5317 = vmatpush1.bf16.msra.mxu0 %v6472_v31  ;;  %v6549_v53 = vld [vmem:[%s7168_s22 + $0x1a4] ss:$8 sps:$4 sm:$0xff]   ;;  %v6544_v31 = vld [vmem:[%s7168_s22 + $0xa0] ss:$8 sps:$4 sm:$0xff]   ;;  %v6550_v59 = vld [vmem:[%s7168_s22 + $0x90] ss:$8 sps:$4 sm:$0xff]  }
 0x32d   : > { %5358 = vmatpush1.bf16.msra.mxu1 %v6475_v56  ;;  %v4229_v62 = vpop.f32.mrf.mxu0  ;;  %5318 = vmatprep.subr.bf16.mxu0 %v6480_v57  ;;  %v6547_v56 = vld [vmem:[%s7168_s22 + $0x1a0] ss:$8 sps:$4 sm:$0xff]   ;;  %v6552_v57 = vld [vmem:[%s7168_s22 + $0x94] ss:$8 sps:$4 sm:$0xff]   ;;  %v6553_v46 = vld [vmem:[%s7168_s22 + $0x190] ss:$8 sps:$4 sm:$0xff]  }
 0x32e   : > { %v4270_v1 = vpop.f32.mrf.mxu1  ;;  %5359 = vmatprep.subr.bf16.mxu1 %v6483_v9  ;;  %v6555_v9 = vld [vmem:[%s7168_s22 + $0x194] ss:$8 sps:$4 sm:$0xff]   ;;  %v6561_v62 = vld [vmem:[%s7168_s22 + $0x184] ss:$8 sps:$4 sm:$0xff]  }
 0x32f   : > { %v4518_v1 = vmax.f32 %v7278_v13, 0.0  ;;  %v6610_v13 = vld [vmem:[%s7168_s22 + $0x370] ss:$8 sps:$4 sm:$0xff]  }
 0x330   : > { %5319 = vmatpush1.bf16.msra.mxu0 %v6478_v60  ;;  %v6558_v60 = vld [vmem:[%s7168_s22 + $0x84] ss:$8 sps:$4 sm:$0xff]  }
 0x331   : > { %5360 = vmatpush1.bf16.msra.mxu1 %v6481_v63  ;;  %5320 = vmatprep.subr.bf16.mxu0 %v6486_v0  ;;  %v1285_v63 = vrot.slane %v7315_v39, %v466_v61  ;;  %v6556_v0 = vld [vmem:[%s7168_s22 + $0x80] ss:$8 sps:$4 sm:$0xff]   ;;  %v6562_v61 = vld [vmem:[%s7168_s22 + $0x270] ss:$8 sps:$4 sm:$0xff]  }
 0x332   : > { %5361 = vmatprep.subr.bf16.mxu1 %v6489_v3  ;;  %v6559_v3 = vld [vmem:[%s7168_s22 + $0x180] ss:$8 sps:$4 sm:$0xff]  }
 0x334   : > { %5321 = vmatpush1.bf16.msra.mxu0 %v6484_v4  ;;  %v6564_v4 = vld [vmem:[%s7168_s22 + $0x274] ss:$8 sps:$4 sm:$0xff]  }
 0x335   : > { %5362 = vmatpush1.bf16.msra.mxu1 %v6487_v23  ;;  %5322 = vmatprep.subr.bf16.mxu0 %v6492_v6  ;;  %v4520_v23 = vmax.f32 %v7304_v22, 0.0  ;;  %v6612_v6 = vld [vmem:[%s7168_s22 + $0x374] ss:$8 sps:$4 sm:$0xff]  }
 0x336   : > { %5363 = vmatprep.subr.bf16.mxu1 %v6495_v18  ;;  %v4227_v18 = vadd.f32 %v7327_v55, %v1285_v63  ;;  %v6634_v63 = vld [vmem:[%s7168_s22 + $0x3f0] ss:$8 sps:$4 sm:$0xff]  }
 0x338   : > { %5323 = vmatpush1.bf16.msra.mxu0 %v6490_v7  ;;  %v4526_v7 = vpack.c.bf16 %v4518_v1, %v4518_v1  ;;  %v4268_v22 = vadd.f32 %v7333_v17, %v4227_v18  ;;  %v6589_v1 = vld [vmem:[%s7168_s22 + $0x2e0] ss:$8 sps:$4 sm:$0xff]   ;;  %v6597_v18 = vld [vmem:[%s7168_s22 + $0x2c4] ss:$8 sps:$4 sm:$0xff]  }
 0x339   : > { %5364 = vmatpush1.bf16.msra.mxu1 %v6493_v8  ;;  %5324 = vmatprep.subr.bf16.mxu0 %v6498_v10  ;;  %v6567_v8 = vld [vmem:[%s7168_s22 + $0x264] ss:$8 sps:$4 sm:$0xff]   ;;  %v4528_v10 = vpack.c.bf16 %v4520_v23, %v4520_v23  ;;  %v6642_v23 = vld [vmem:[%s7168_s22 + $0x3d4] ss:$8 sps:$4 sm:$0xff]  }
 0x33a   : > { %5365 = vmatprep.subr.bf16.mxu1 %v6501_v14  ;;  %v6615_v14 = vld [vmem:[%s7168_s22 + $0x364] ss:$8 sps:$4 sm:$0xff]  }
 0x33c   : > { %5325 = vmatpush1.bf16.msra.mxu0 %v6496_v47 }
 0x33d   : > { %5366 = vmatpush1.bf16.msra.mxu1 %v6499_v5  ;;  %5326 = vmatprep.subr.bf16.mxu0 %v6504_v21  ;;  %v6565_v5 = vld [vmem:[%s7168_s22 + $0x260] ss:$8 sps:$4 sm:$0xff]  }
 0x33e   : > { %5367 = vmatprep.subr.bf16.mxu1 %v6507_v24  ;;  %v6570_v24 = vld [vmem:[%s7168_s22 + $0x254] ss:$8 sps:$4 sm:$0xff]  }
 0x340   : > { %5327 = vmatpush1.bf16.msra.mxu0 %v6502_v49  ;;  %v6613_v49 = vld [vmem:[%s7168_s22 + $0x360] ss:$8 sps:$4 sm:$0xff]  }
 0x341   : > { %5368 = vmatpush1.bf16.msra.mxu1 %v6505_v37  ;;  %5328 = vmatprep.subr.bf16.mxu0 %v6510_v11 }
 0x342   : > { %5369 = vmatprep.subr.bf16.mxu1 %v6513_v25  ;;  %v6618_v25 = vld [vmem:[%s7168_s22 + $0x354] ss:$8 sps:$4 sm:$0xff]  }
 0x344   : > { %5329 = vmatpush1.bf16.msra.mxu0 %v6508_v26 }
 0x345   : > { %5370 = vmatpush1.bf16.msra.mxu1 %v6511_v51  ;;  %5330 = vmatprep.subr.bf16.mxu0 %v6516_v28  ;;  %v6568_v28 = vld [vmem:[%s7168_s22 + $0x250] ss:$8 sps:$4 sm:$0xff]  }
 0x346   : > { %5371 = vmatprep.subr.bf16.mxu1 %v6519_v30 }
 0x348   : > { %5331 = vmatpush2.bf16.msra.mxu0 %v6514_v32  ;;  %v6573_v32 = vld [vmem:[%s7168_s22 + $0x244] ss:$8 sps:$4 sm:$0xff]  }
 0x349   : > { %5372 = vmatpush2.bf16.msra.mxu1 %v6517_v33  ;;  %5332 = vmatprep.subr.bf16.mxu0 %v6522_v34  ;;  %v6616_v33 = vld [vmem:[%s7168_s22 + $0x350] ss:$8 sps:$4 sm:$0xff]  }
 0x34a   : > { %5373 = vmatprep.subr.bf16.mxu1 %v6525_v54 }
 0x34c   : > { %5333 = vmatpush2.bf16.msra.mxu0 %v6520_v19  ;;  %v6621_v19 = vld [vmem:[%s7168_s22 + $0x344] ss:$8 sps:$4 sm:$0xff]  }
 0x34d   : > { %5374 = vmatpush2.bf16.msra.mxu1 %v6523_v12  ;;  %5334 = vmatprep.subr.bf16.mxu0 %v6528_v35  ;;  %v6571_v35 = vld [vmem:[%s7168_s22 + $0x240] ss:$8 sps:$4 sm:$0xff]  }
 0x34e   : > { %5375 = vmatprep.subr.bf16.mxu1 %v6531_v20  ;;  %v6576_v20 = vld [vmem:[%s7168_s22 + $0x234] ss:$8 sps:$4 sm:$0xff]  }
 0x350   : > { %5335 = vmatpush2.bf16.msra.mxu0 %v6526_v36  ;;  %v6619_v36 = vld [vmem:[%s7168_s22 + $0x340] ss:$8 sps:$4 sm:$0xff]  }
 0x351   : > { %5376 = vmatpush2.bf16.msra.mxu1 %v6529_v38  ;;  %5336 = vmatprep.subr.bf16.mxu0 %v6534_v15  ;;  %v6624_v38 = vld [vmem:[%s7168_s22 + $0x334] ss:$8 sps:$4 sm:$0xff]   ;;  %v6574_v15 = vld [vmem:[%s7168_s22 + $0x230] ss:$8 sps:$4 sm:$0xff]  }
 0x352   : > { %5377 = vmatprep.subr.bf16.mxu1 %v6537_v16  ;;  %v6579_v16 = vld [vmem:[%s7168_s22 + $0x224] ss:$8 sps:$4 sm:$0xff]  }
 0x354   : > { %5337 = vmatpush2.bf16.msra.mxu0 %v6532_v42  ;;  %v6622_v42 = vld [vmem:[%s7168_s22 + $0x330] ss:$8 sps:$4 sm:$0xff]  }
 0x355   : > { %5378 = vmatpush2.bf16.msra.mxu1 %v6535_v43  ;;  %5338 = vmatprep.subr.bf16.mxu0 %v6540_v50  ;;  %v6627_v43 = vld [vmem:[%s7168_s22 + $0x324] ss:$8 sps:$4 sm:$0xff]   ;;  %v6577_v50 = vld [vmem:[%s7168_s22 + $0x220] ss:$8 sps:$4 sm:$0xff]  }
 0x356   : > { %5379 = vmatprep.subr.bf16.mxu1 %v6543_v40  ;;  %v6582_v40 = vld [vmem:[%s7168_s22 + $0x214] ss:$8 sps:$4 sm:$0xff]  }
 0x358   : > { %5339 = vmatpush2.bf16.msra.mxu0 %v6538_v27  ;;  %v6625_v27 = vld [vmem:[%s7168_s22 + $0x320] ss:$8 sps:$4 sm:$0xff]  }
 0x359   : > { %5380 = vmatpush2.bf16.msra.mxu1 %v6541_v41  ;;  %5340 = vmatprep.subr.bf16.mxu0 %v6546_v52  ;;  %v6630_v41 = vld [vmem:[%s7168_s22 + $0x314] ss:$8 sps:$4 sm:$0xff]   ;;  %v6580_v52 = vld [vmem:[%s7168_s22 + $0x210] ss:$8 sps:$4 sm:$0xff]  }
 0x35a   : > { %5381 = vmatprep.subr.bf16.mxu1 %v6549_v53  ;;  %v6585_v53 = vld [vmem:[%s7168_s22 + $0x204] ss:$8 sps:$4 sm:$0xff]  }
 0x35c   : > { %5341 = vmatpush2.bf16.msra.mxu0 %v6544_v31  ;;  %v6628_v31 = vld [vmem:[%s7168_s22 + $0x310] ss:$8 sps:$4 sm:$0xff]  }
 0x35d   : > { %5382 = vmatpush2.bf16.msra.mxu1 %v6547_v56  ;;  %5342 = vmatprep.subr.bf16.mxu0 %v6552_v57  ;;  %v6633_v56 = vld [vmem:[%s7168_s22 + $0x304] ss:$8 sps:$4 sm:$0xff]   ;;  %v6583_v57 = vld [vmem:[%s7168_s22 + $0x200] ss:$8 sps:$4 sm:$0xff]  }
 0x35e   : > { %5383 = vmatprep.subr.bf16.mxu1 %v6555_v9  ;;  %v6588_v9 = vld [vmem:[%s7168_s22 + $0x2f4] ss:$8 sps:$4 sm:$0xff]  }
 0x360   : > { %5343 = vmatpush2.bf16.msra.mxu0 %v6550_v59  ;;  %v6631_v59 = vld [vmem:[%s7168_s22 + $0x300] ss:$8 sps:$4 sm:$0xff]  }
 0x361   : > { %5384 = vmatpush2.bf16.msra.mxu1 %v6553_v46  ;;  %5344 = vmatprep.subr.bf16.mxu0 %v6558_v60  ;;  %v6636_v46 = vld [vmem:[%s7168_s22 + $0x3f4] ss:$8 sps:$4 sm:$0xff]   ;;  %v6586_v60 = vld [vmem:[%s7168_s22 + $0x2f0] ss:$8 sps:$4 sm:$0xff]  }
 0x362   : > { %5385 = vmatprep.subr.bf16.mxu1 %v6561_v62  ;;  %v6591_v62 = vld [vmem:[%s7168_s22 + $0x2e4] ss:$8 sps:$4 sm:$0xff]  }
 0x364   : > { %5345 = vmatpush2.bf16.msra.mxu0 %v6556_v0  ;;  %v6639_v0 = vld [vmem:[%s7168_s22 + $0x3e4] ss:$8 sps:$4 sm:$0xff]  }
 0x365   : > { %5386 = vmatpush2.bf16.msra.mxu1 %v6559_v3  ;;  %5396 = vmatprep.subr.bf16.mxu0 %v6564_v4  ;;  %v6594_v3 = vld [vmem:[%s7168_s22 + $0x2d4] ss:$8 sps:$4 sm:$0xff]   ;;  %v6637_v4 = vld [vmem:[%s7168_s22 + $0x3e0] ss:$8 sps:$4 sm:$0xff]  }
 0x366   : > { %5437 = vmatprep.subr.bf16.mxu1 %v6612_v6  ;;  %v6592_v6 = vld [vmem:[%s7168_s22 + $0x2d0] ss:$8 sps:$4 sm:$0xff]  }
 0x367   : > { %v7402_v47 = vpop.f32.mrf.mxu0  ;;  %5347 = vmatmul.mubr.bf16.vlgmr.msra.gmra.mxu0 %v4526_v7  ;;  %v6645_v7 = vld [vmem:[%s7168_s22 + $0x3c4] ss:$8 sps:$4 sm:$0xff]  }
 0x368   : > { %v7405_v55 = vpop.f32.mrf.mxu1  ;;  %5388 = vmatmul.mubr.bf16.vlgmr.msra.gmra.mxu1 %v4528_v10  ;;  %5397 = vmatpush1.bf16.msra.mxu0 %v6562_v61  ;;  %v6640_v61 = vld [vmem:[%s7168_s22 + $0x3d0] ss:$8 sps:$4 sm:$0xff]   ;;  %v6643_v10 = vld [vmem:[%s7168_s22 + $0x3c0] ss:$8 sps:$4 sm:$0xff]  }
 0x369   : > { %v4308_v21 = vpop.f32.mrf.mxu0  ;;  %5398 = vmatprep.subr.bf16.mxu0 %v6567_v8  ;;  %5438 = vmatpush1.bf16.msra.mxu1 %v6610_v13  ;;  %v6595_v8 = vld [vmem:[%s7168_s22 + $0x2c0] ss:$8 sps:$4 sm:$0xff]   ;;  %v6600_v13 = vld [vmem:[%s7168_s22 + $0x2b4] ss:$8 sps:$4 sm:$0xff]  }
 0x36a   : > { %v4309_v37 = vadd.f32 %v4308_v21, %v4268_v22  ;;  %v4349_v11 = vpop.f32.mrf.mxu1  ;;  %5439 = vmatprep.subr.bf16.mxu1 %v6615_v14  ;;  %v6648_v14 = vld [vmem:[%s7168_s22 + $0x3b4] ss:$8 sps:$4 sm:$0xff]   ;;  %v6598_v22 = vld [vmem:[%s7168_s22 + $0x2b0] ss:$8 sps:$4 sm:$0xff]  }
 0x36b   : > { %v4310_v26 = vpop.f32.mrf.mxu0  ;;  %v6646_v21 = vld [vmem:[%s7168_s22 + $0x3b0] ss:$8 sps:$4 sm:$0xff]  }
 0x36c   : > { %v4350_v17 = vadd.f32 %v4349_v11, %v4309_v37  ;;  %v4351_v51 = vpop.f32.mrf.mxu1  ;;  %5399 = vmatpush1.bf16.msra.mxu0 %v6565_v5  ;;  %v6603_v5 = vld [vmem:[%s7168_s22 + $0x2a4] ss:$8 sps:$4 sm:$0xff]   ;;  %v4307_v37 = vadd.f32 %v7402_v47, %v7331_v58  ;;  %v6606_v11 = vld [vmem:[%s7168_s22 + $0x294] ss:$8 sps:$4 sm:$0xff]   ;;  %v6607_v58 = vld [vmem:[%s7168_s22 + $0x280] ss:$8 sps:$4 sm:$0xff]  }
 0x36d   : > { %v4311_v30 = vpop.f32.mrf.mxu0  ;;  %5400 = vmatprep.subr.bf16.mxu0 %v6570_v24  ;;  %5440 = vmatpush1.bf16.msra.mxu1 %v6613_v49  ;;  %v6651_v24 = vld [vmem:[%s7168_s22 + $0x3a4] ss:$8 sps:$4 sm:$0xff]   ;;  %v6601_v49 = vld [vmem:[%s7168_s22 + $0x2a0] ss:$8 sps:$4 sm:$0xff]   ;;  %v6654_v26 = vld [vmem:[%s7168_s22 + $0x394] ss:$8 sps:$4 sm:$0xff]  }
 0x36e   : > { %v4523_v34 = vmax.f32 %v4350_v17, 0.0  ;;  %v4352_v54 = vpop.f32.mrf.mxu1  ;;  %5441 = vmatprep.subr.bf16.mxu1 %v6618_v25  ;;  %v6649_v25 = vld [vmem:[%s7168_s22 + $0x3a0] ss:$8 sps:$4 sm:$0xff]   ;;  %v6604_v17 = vld [vmem:[%s7168_s22 + $0x290] ss:$8 sps:$4 sm:$0xff]   ;;  %v4348_v51 = vadd.f32 %v7405_v55, %v4307_v37 }
 0x36f   : > { %v6652_v30 = vld [vmem:[%s7168_s22 + $0x390] ss:$8 sps:$4 sm:$0xff]  }
 0x370   : > { %v4531_v12 = vpack.c.bf16 %v4523_v34, %v4523_v34  ;;  %5401 = vmatpush1.bf16.msra.mxu0 %v6568_v28  ;;  %v6609_v28 = vld [vmem:[%s7168_s22 + $0x284] ss:$8 sps:$4 sm:$0xff]   ;;  %v4522_v47 = vmax.f32 %v4348_v51, 0.0 }
 0x371   : > { %5402 = vmatprep.subr.bf16.mxu0 %v6573_v32  ;;  %5442 = vmatpush1.bf16.msra.mxu1 %v6616_v33  ;;  %v6657_v32 = vld [vmem:[%s7168_s22 + $0x384] ss:$8 sps:$4 sm:$0xff]   ;;  %v6655_v33 = vld [vmem:[%s7168_s22 + $0x380] ss:$8 sps:$4 sm:$0xff]  }
 0x372   : > { %5428 = vmatprep.mubr.bf16.mxu0 %v4531_v12  ;;  %5443 = vmatprep.subr.bf16.mxu1 %v6621_v19  ;;  %v4530_v34 = vpack.c.bf16 %v4522_v47, %v4522_v47 }
 0x374   : > { %5403 = vmatpush1.bf16.msra.mxu0 %v6571_v35 }
 0x375   : > { %5404 = vmatprep.subr.bf16.mxu0 %v6576_v20  ;;  %5444 = vmatpush1.bf16.msra.mxu1 %v6619_v36 }
 0x376   : > { %5445 = vmatprep.subr.bf16.mxu1 %v6624_v38 }
 0x378   : > { %5405 = vmatpush1.bf16.msra.mxu0 %v6574_v15  ;;  %v1289_v15 = vrot.slane %v7315_v39, %v470_v29 }
 0x379   : > { %5406 = vmatprep.subr.bf16.mxu0 %v6579_v16  ;;  %5446 = vmatpush1.bf16.msra.mxu1 %v6622_v42  ;;  %v1293_v16 = vrot.slane %v7315_v39, %v474_v2 }
 0x37a   : > { %5447 = vmatprep.subr.bf16.mxu1 %v6627_v43 }
 0x37c   : > { %5407 = vmatpush1.bf16.msra.mxu0 %v6577_v50 }
 0x37d   : > { %5408 = vmatprep.subr.bf16.mxu0 %v6582_v40  ;;  %5448 = vmatpush1.bf16.msra.mxu1 %v6625_v27 }
 0x37e   : > { %5449 = vmatprep.subr.bf16.mxu1 %v6630_v41 }
 0x380   : > { %5409 = vmatpush1.bf16.msra.mxu0 %v6580_v52 }
 0x381   : > { %5410 = vmatprep.subr.bf16.mxu0 %v6585_v53  ;;  %5450 = vmatpush1.bf16.msra.mxu1 %v6628_v31 }
 0x382   : > { %5451 = vmatprep.subr.bf16.mxu1 %v6633_v56 }
 0x384   : > { %5411 = vmatpush1.bf16.msra.mxu0 %v6583_v57 }
 0x385   : > { %5412 = vmatprep.subr.bf16.mxu0 %v6588_v9  ;;  %5452 = vmatpush1.bf16.msra.mxu1 %v6631_v59 }
 0x386   : > { %5453 = vmatprep.subr.bf16.mxu1 %v6636_v46 }
 0x388   : > { %5413 = vmatpush2.bf16.msra.mxu0 %v6586_v60 }
 0x389   : > { %5414 = vmatprep.subr.bf16.mxu0 %v6591_v62  ;;  %5454 = vmatpush2.bf16.msra.mxu1 %v6634_v63  ;;  %v4662_v63 = vld [vmem:[%s384_s9] sm:$0x3] }
 0x38a   : > { %5455 = vmatprep.subr.bf16.mxu1 %v6639_v0  ;;  %v4667_v0 = vrot.slane %v4662_v63, %v7189_v45 }
 0x38c   : > { %5415 = vmatpush2.bf16.msra.mxu0 %v6589_v1  ;;  %v4671_v1 = vrot.slane %v4662_v63, %v7195_v48 }
 0x38d   : > { %5416 = vmatprep.subr.bf16.mxu0 %v6594_v3  ;;  %5456 = vmatpush2.bf16.msra.mxu1 %v6637_v4 }
 0x38e   : > { %5457 = vmatprep.subr.bf16.mxu1 %v6642_v23 }
 0x390   : > { %5417 = vmatpush2.bf16.msra.mxu0 %v6592_v6 }
 0x391   : > { %5418 = vmatprep.subr.bf16.mxu0 %v6597_v18  ;;  %5458 = vmatpush2.bf16.msra.mxu1 %v6640_v61 }
 0x392   : > { %5459 = vmatprep.subr.bf16.mxu1 %v6645_v7 }
 0x394   : > { %5419 = vmatpush2.bf16.msra.mxu0 %v6595_v8 }
 0x395   : > { %5420 = vmatprep.subr.bf16.mxu0 %v6600_v13  ;;  %5460 = vmatpush2.bf16.msra.mxu1 %v6643_v10 }
 0x396   : > { %5461 = vmatprep.subr.bf16.mxu1 %v6648_v14 }
 0x398   : > { %5421 = vmatpush2.bf16.msra.mxu0 %v6598_v22 }
 0x399   : > { %5422 = vmatprep.subr.bf16.mxu0 %v6603_v5  ;;  %5462 = vmatpush2.bf16.msra.mxu1 %v6646_v21 }
 0x39a   : > { %5463 = vmatprep.subr.bf16.mxu1 %v6651_v24 }
 0x39c   : > { %5423 = vmatpush2.bf16.msra.mxu0 %v6601_v49 }
 0x39d   : > { %5424 = vmatprep.subr.bf16.mxu0 %v6606_v11  ;;  %5464 = vmatpush2.bf16.msra.mxu1 %v6649_v25 }
 0x39e   : > { %5465 = vmatprep.subr.bf16.mxu1 %v6654_v26 }
 0x3a0   : > { %5425 = vmatpush2.bf16.msra.mxu0 %v6604_v17 }
 0x3a1   : > { %5426 = vmatprep.subr.bf16.mxu0 %v6609_v28  ;;  %5466 = vmatpush2.bf16.msra.mxu1 %v6652_v30 }
 0x3a2   : > { %5467 = vmatprep.subr.bf16.mxu1 %v6657_v32 }
 0x3a4   : > { %5427 = vmatpush2.bf16.msra.mxu0 %v6607_v58 }
 0x3a5   : > { %5468 = vmatpush2.bf16.msra.mxu1 %v6655_v33 }
 0x3a7   : > { %v4388_v54 = vpop.f32.mrf.mxu0  ;;  %5429 = vmatmul.mubr.bf16.vlgmr.msra.gmra.mxu0 %v4530_v34 }
 0x3a8   : > { %v4429_v19 = vpop.f32.mrf.mxu1  ;;  %v4389_v42 = vadd.f32 %v4388_v54, %v1289_v15 }
 0x3a9   : > { %v4390_v55 = vpop.f32.mrf.mxu0 }
 0x3aa   : > { %v4431_v12 = vpop.f32.mrf.mxu1  ;;  %v4391_v43 = vadd.f32 %v4390_v55, %v1293_v16  ;;  %v4430_v50 = vadd.f32 %v4429_v19, %v4389_v42 }
 0x3ab   : > { %v4392_v35 = vpop.f32.mrf.mxu0 }
 0x3ac   : > { %v4433_v20 = vpop.f32.mrf.mxu1  ;;  %v4432_v27 = vadd.f32 %v4431_v12, %v4391_v43 }
 0x3ad   : > { %v4393_v36 = vpop.f32.mrf.mxu0 }
 0x3ae   : > { %v4434_v38 = vpop.f32.mrf.mxu1 }
 0x3e7   : > { %v4470_v40 = vpop.f32.mrf.mxu0 }
 0x3e8   : > { %v4471_v41 = vadd.f32 %v4470_v40, %v4430_v50  ;;  %v4511_v52 = vpop.f32.mrf.mxu1 }
 0x3e9   : > { %v4472_v53 = vpop.f32.mrf.mxu0 }
 0x3ea   : > { %v4512_v31 = vadd.f32 %v4511_v52, %v4471_v41  ;;  %v4473_v56 = vadd.f32 %v4472_v53, %v4432_v27  ;;  %v4513_v57 = vpop.f32.mrf.mxu1 }
 0x3eb   : > { %v4474_v9 = vpop.f32.mrf.mxu0 }
 0x3ec   : > { %v4514_v59 = vadd.f32 %v4513_v57, %v4473_v56  ;;  %v4515_v46 = vpop.f32.mrf.mxu1  ;;  %v4524_v29 = vmax.f32 %v4512_v31, 0.0 }
 0x3ed   : > { %v4475_v60 = vpop.f32.mrf.mxu0 }
 0x3ee   : > { %v4525_v44 = vmax.f32 %v4514_v59, 0.0  ;;  %v4516_v62 = vpop.f32.mrf.mxu1  ;;  %v4532_v39 = vpack.c.bf16 %v4524_v29, %v4524_v29 }
 0x3f0   : > { %v4533_v2 = vpack.c.bf16 %v4525_v44, %v4525_v44 }
 0x3f2   : > { %5469 = vmatprep.mubr.bf16.mxu1 %v4533_v2 }
 0x3f3   : > { %5470 = vmatmul.mubr.bf16.vlgmr.msra.gmra.mxu1 %v4532_v39 }
 0x427   : > { %v5348_v3 = vpop.f32.mrf.mxu0 }
 0x428   : > { %v5349_v4 = vadd.f32 %v5348_v3, %v4667_v0  ;;  %v5389_v23 = vpop.f32.mrf.mxu1 }
 0x429   : > { %v5350_v6 = vpop.f32.mrf.mxu0 }
 0x42a   : > { %v5390_v18 = vadd.f32 %v5389_v23, %v5349_v4  ;;  %v5351_v61 = vadd.f32 %v5350_v6, %v4671_v1  ;;  %v5391_v7 = vpop.f32.mrf.mxu1 }
 0x42b   : > { %v5352_v8 = vpop.f32.mrf.mxu0 }
 0x42c   : > { %v5392_v13 = vadd.f32 %v5391_v7, %v5351_v61  ;;  %v5393_v10 = vpop.f32.mrf.mxu1 }
 0x42d   : > { %v5353_v14 = vpop.f32.mrf.mxu0 }
 0x42e   : > { %v5394_v22 = vpop.f32.mrf.mxu1 }
 0x467   : > { %v5430_v5 = vpop.f32.mrf.mxu0 }
 0x468   : > { %v5431_v21 = vadd.f32 %v5430_v5, %v5390_v18 }
 0x469   : > { %v5432_v24 = vpop.f32.mrf.mxu0 }
 0x46a   : > { %v5433_v45 = vadd.f32 %v5432_v24, %v5392_v13 }
 0x46b   : > { %v5434_v49 = vpop.f32.mrf.mxu0 }
 0x46d   : > { %v5435_v48 = vpop.f32.mrf.mxu0 }
 0x4b3   : > { %v5471_v37 = vpop.f32.mrf.mxu1 }
 0x4b4   : > { %v5472_v11 = vadd.f32 %v5471_v37, %v5431_v21 }
 0x4b5   : > { %v5473_v25 = vpop.f32.mrf.mxu1 }
 0x4b6   : > { %5478 = vst [vmem:[%s419_s1] sm:$0xff] %v5472_v11  ;;  %v5474_v26 = vadd.f32 %v5473_v25, %v5433_v45 }
 0x4b7   : > { %v5475_v17 = vpop.f32.mrf.mxu1 }
 0x4b8   : > { %5479 = vst [vmem:[%s419_s1 + $0x8] sm:$0xff] %v5474_v26 }
 0x4b9   : > { %v5476_v51 = vpop.f32.mrf.mxu1 }
 0x4ba   : > { %6858 = shalt.err (!%p6855_p13)
}
 0x4bb   : > { %s6859_s23 = scalar_lea.hbm %s7482_s12, 256  ;;  %s6863_s21 = scalar_lea.hbm %s7536_s7, 768 }
 0x4bc   : > { %p6860_p9 = scmp.ne.s32.totalorder %s7482_s12, %s6859_s23  ;;  %p6864_p1 = scmp.lt.s32.totalorder %s7482_s12, %s7536_s7 }
 0x4bd   : > { %p6865_p12 = scmp.lt.s32.totalorder %s6863_s21, %s6859_s23 }
 0x4be   : > { %p6861_p3 = pnand %p6860_p9, %p7085_p7 }
 0x4bf   : > { %p6866_p8 = por %p6865_p12, %p6864_p1 }
 0x4c0   : > { %p6862_p11 = pneg %p6861_p3 }
 0x4c2   : > { %p6867_p4 = pnand %p6866_p8, %p6862_p11 }
 0x4c4   : > { %6870 = shalt.err (!%p6867_p4)
}
 0x4c5   : > { %6366 = dma.vmem_to_hbm [thread:$0]  (%p7085_p7), %s7484_s13, 256, %s7482_s12, %s5481_s27  }
 0x4c6 PF: > { %s7569_s30 = sld [smem:[#allocation20_spill]]  ;;  %p6406_p2 = scmp.ge.s32.totalorder %s6937_s29, 2 }
 0x4c7   : > { %s5509_s9 = sand.u32 1, %s6917_s24  }
 0x4c8   : > { %s5510_s15 = scalar_lea.sflag [#allocation4], %s5509_s9 }
 0x4cc   : > { %p7570_p6 = scmp.ne.s32.totalorder %s7569_s30, 0 }
 0x4ce   : > { %p6392_p10 = pnand %p6406_p2, %p7570_p6 }
 0x4d0   : > { %p6393_p0 = pneg %p6392_p10 }
 0x4d2   : > { %6912 = dma.done.wait (%p6393_p0), %s5510_s15, 256  }
 0x4d3   : > { %6914 = vsyncadd (%p6393_p0), %s5510_s15, 4294967040  ;;  %s26_s29 = sadd.s32 1, %s6937_s29   ;;  %s7571_s18 = sld [smem:[#allocation22_spill]] }
 0x4d4   : > { %p23_p5 = scmp.ge.s32.totalorder %s26_s29, 5   ;;  %s7572_s19 = sld [smem:[#allocation21_spill]] }
 0x4d5   : > { %s7573_s24 = smov %s6921_s25  ;;  %s7574_s25 = smov %s6925_s26 }
 0x4d6   : > { %s7576_s27 = smov %s6933_s28  ;;  %25 = sbr.rel (!%p23_p5) target bundleno = 13 (0xd), region = 126 }
 0x4d9   : > { %s7575_s26 = smov %s7571_s18 }
 0x4da   : > { %s7577_s28 = smov %s7572_s19 }
 0x4db   :  { %5515 = vsyncpa [#allocation3], 1 }
 0x4dc   :  { %5517 = vsyncpa [#allocation3 + $0x1], 1 }
 0x4dd   :  { %5518 = vsyncpa [#allocation6], 1 }
 0x4de   :  { %5519 = vsyncpa [#allocation9], 1 }
 0x4df   :  { %5520 = vsyncpa [#allocation12], 1 }
 0x4e0   :  { %5522 = vsyncpa [#allocation12 + $0x1], 1 }
 0x4e1   :  { %5523 = vsyncpa [#allocation4], 1 }
 0x4e2   :  { %5525 = vsyncpa [#allocation4 + $0x1], 1 }

</bundles_post_ra>
